<compile_context>
chip_gen: v6e
topology: v6e:2x2x1
jax: 0.10.0
libtpu: 0.0.40
codegen_flags: <defaults>
</compile_context>

<pallas_src>
import functools

import jax
import jax.numpy as jnp
from jax.experimental import pallas as pl
from jax.experimental.pallas import tpu as pltpu

TM_MAX = 512                          # lane tile over M for the tiled fallback
FUSED_VMEM_BUDGET = 32 * 1024 * 1024  # use whole-layer fused kernel below this


def _round_up(x, m):
    return (x + m - 1) // m * m


def _apply_act(y, act, neg_slope):
    if act == "leakyrelu":
        return jnp.where(y >= 0, y, neg_slope * y)
    if act == "sigmoid":
        return jax.nn.sigmoid(y)
    return y


# ---------------------------------------------------------------------------
# Pallas kernels
# ---------------------------------------------------------------------------
def _fused_layer_kernel(w_ref, p_ref, o_ref, *, act, neg_slope, batch_norm, eps):
    # Whole layer in one shot: W [Cout, K] bf16, patchesT [K, M] bf16,
    # out [Cout, M] f32.  BN statistics are computed over the lane axis.
    y = jnp.dot(w_ref[...], p_ref[...], preferred_element_type=jnp.float32)
    if batch_norm:
        # TODO(synk): training-mode batch statistics, gamma=1, beta=0 (matches
        # nn.BatchNorm3d only at init; eval/running stats not modeled).
        m = y.shape[1]
        mean = jnp.sum(y, axis=1, keepdims=True) * (1.0 / m)
        var = jnp.sum(y * y, axis=1, keepdims=True) * (1.0 / m) - mean * mean
        var = jnp.maximum(var, 0.0)
        y = (y - mean) * jax.lax.rsqrt(var + eps)
    o_ref[...] = _apply_act(y, act, neg_slope)


def _matmul_act_kernel(w_ref, p_ref, o_ref, *, act, neg_slope):
    # Tiled fallback (non-BN): fused GEMM + activation per M tile.
    y = jnp.dot(w_ref[...], p_ref[...], preferred_element_type=jnp.float32)
    o_ref[...] = _apply_act(y, act, neg_slope)


def _matmul_stats_kernel(w_ref, p_ref, o_ref, s_ref, ss_ref):
    # Tiled fallback (BN, pass A): GEMM + per-tile partial BN statistics.
    y = jnp.dot(w_ref[...], p_ref[...], preferred_element_type=jnp.float32)
    o_ref[...] = y
    s_ref[0] = jnp.sum(y, axis=1, keepdims=True)        # [Cout, 1]
    ss_ref[0] = jnp.sum(y * y, axis=1, keepdims=True)   # [Cout, 1]


def _affine_act_kernel(x_ref, sc_ref, sh_ref, o_ref, *, act, neg_slope):
    # Tiled fallback (BN, pass B): per-channel affine + activation.
    y = x_ref[...] * sc_ref[...] + sh_ref[...]
    o_ref[...] = _apply_act(y, act, neg_slope)


# ---------------------------------------------------------------------------
# Pallas wrappers
# ---------------------------------------------------------------------------
def pallas_fused_layer(wt, pT, act, neg_slope, batch_norm, eps):
    """Single-kernel layer: act(BN?(wt @ pT)).  Everything resident in VMEM."""
    Cout, K = wt.shape
    _, M = pT.shape
    kern = functools.partial(_fused_layer_kernel, act=act, neg_slope=neg_slope,
                             batch_norm=batch_norm, eps=eps)
    return pl.pallas_call(
        kern,
        out_shape=jax.ShapeDtypeStruct((Cout, M), jnp.float32),
        in_specs=[pl.BlockSpec(memory_space=pltpu.MemorySpace.VMEM),
                  pl.BlockSpec(memory_space=pltpu.MemorySpace.VMEM)],
        out_specs=pl.BlockSpec(memory_space=pltpu.MemorySpace.VMEM),
        compiler_params=pltpu.CompilerParams(vmem_limit_bytes=64 << 20),
    )(wt, pT)


def _tile_and_pad(pT):
    """Choose lane tile over M and pad M only if needed (never for pow-2 M)."""
    K, M = pT.shape
    if M >= TM_MAX:
        tm = TM_MAX
        Mp = _round_up(M, tm)
        if Mp != M:
            pT = jnp.pad(pT, ((0, 0), (0, Mp - M)))
    else:
        tm, Mp = M, M
    return pT, tm, Mp


def pallas_conv_act(wt, pT, act, neg_slope):
    """wt: [Cout, K] bf16, pT: [K, M] bf16 -> act(wt @ pT) [Cout, Mp] f32."""
    Cout, K = wt.shape
    pT, tm, Mp = _tile_and_pad(pT)
    kern = functools.partial(_matmul_act_kernel, act=act, neg_slope=neg_slope)
    return pl.pallas_call(
        kern,
        out_shape=jax.ShapeDtypeStruct((Cout, Mp), jnp.float32),
        grid=(Mp // tm,),
        in_specs=[
            pl.BlockSpec((Cout, K), lambda j: (0, 0)),   # weight resident
            pl.BlockSpec((K, tm), lambda j: (0, j)),     # patch tile
        ],
        out_specs=pl.BlockSpec((Cout, tm), lambda j: (0, j)),
        compiler_params=pltpu.CompilerParams(dimension_semantics=("parallel",)),
    )(wt, pT)


def pallas_conv_stats(wt, pT):
    """Conv GEMM + per-tile partial sum / sum-of-squares for BatchNorm."""
    Cout, K = wt.shape
    pT, tm, Mp = _tile_and_pad(pT)
    g = Mp // tm
    conv, s, ss = pl.pallas_call(
        _matmul_stats_kernel,
        out_shape=(
            jax.ShapeDtypeStruct((Cout, Mp), jnp.float32),
            jax.ShapeDtypeStruct((g, Cout, 1), jnp.float32),
            jax.ShapeDtypeStruct((g, Cout, 1), jnp.float32),
        ),
        grid=(g,),
        in_specs=[
            pl.BlockSpec((Cout, K), lambda j: (0, 0)),
            pl.BlockSpec((K, tm), lambda j: (0, j)),
        ],
        out_specs=(
            pl.BlockSpec((Cout, tm), lambda j: (0, j)),
            pl.BlockSpec((1, Cout, 1), lambda j: (j, 0, 0)),
            pl.BlockSpec((1, Cout, 1), lambda j: (j, 0, 0)),
        ),
        compiler_params=pltpu.CompilerParams(dimension_semantics=("parallel",)),
    )(wt, pT)
    return conv, s, ss, tm


def pallas_affine_act(x, scale, shift, act, neg_slope, tm):
    """x: [Cout, Mp] f32; scale/shift: [Cout, 1]; y = act(x*scale + shift)."""
    Cout, Mp = x.shape
    kern = functools.partial(_affine_act_kernel, act=act, neg_slope=neg_slope)
    return pl.pallas_call(
        kern,
        out_shape=jax.ShapeDtypeStruct((Cout, Mp), jnp.float32),
        grid=(Mp // tm,),
        in_specs=[
            pl.BlockSpec((Cout, tm), lambda j: (0, j)),
            pl.BlockSpec((Cout, 1), lambda j: (0, 0)),
            pl.BlockSpec((Cout, 1), lambda j: (0, 0)),
        ],
        out_specs=pl.BlockSpec((Cout, tm), lambda j: (0, j)),
        compiler_params=pltpu.CompilerParams(dimension_semantics=("parallel",)),
    )(x, scale, shift)


# ---------------------------------------------------------------------------
# Glue: transposed im2col for Conv3d(kernel=4, stride=2, padding=1)
# Input layout is channel-first: x [C, N, D, H, W]  ->  patchesT [K, M]
# with K = C*k^3 (row-major C,kd,kh,kw) and M = N*Do*Ho*Wo (row-major).
# ---------------------------------------------------------------------------
def im2col_T(x, kernel=4, stride=2, pad=1):
    C, N, D, H, W = x.shape
    Do = (D + 2 * pad - kernel) // stride + 1
    Ho = (H + 2 * pad - kernel) // stride + 1
    Wo = (W + 2 * pad - kernel) // stride + 1
    xp = jnp.pad(x, ((0, 0), (0, 0), (pad, pad), (pad, pad), (pad, pad)))
    cols = []
    for kd in range(kernel):
        for kh in range(kernel):
            for kw in range(kernel):
                sl = jax.lax.slice(
                    xp,
                    (0, 0, kd, kh, kw),
                    (C, N,
                     kd + stride * (Do - 1) + 1,
                     kh + stride * (Ho - 1) + 1,
                     kw + stride * (Wo - 1) + 1),
                    (1, 1, stride, stride, stride),
                )
                cols.append(sl)  # [C, N, Do, Ho, Wo]
    p = jnp.stack(cols, axis=0).reshape(kernel, kernel, kernel, C, N, Do, Ho, Wo)
    p = p.transpose(3, 0, 1, 2, 4, 5, 6, 7)          # [C, kd, kh, kw, N, Do, Ho, Wo]
    return p.reshape(C * kernel ** 3, N * Do * Ho * Wo), (N, Do, Ho, Wo)


def conv_bn_act_layer(x_cn, w, act, batch_norm, neg_slope=0.2, eps=1e-5):
    """x_cn: [Cin, N, D, H, W], w: [Cout, Cin, 4, 4, 4] -> [Cout, N, D/2, H/2, W/2]."""
    Cout = w.shape[0]
    pT, (N, Do, Ho, Wo) = im2col_T(x_cn)
    K, M = pT.shape
    pT = pT.astype(jnp.bfloat16)                     # MXU-native operands
    wt = w.reshape(Cout, K).astype(jnp.bfloat16)

    # VMEM estimate for the whole-layer fused kernel: pT + W + (out & f32 temp).
    fused_bytes = K * M * 2 + Cout * K * 2 + 2 * (Cout * M * 4)
    if fused_bytes <= FUSED_VMEM_BUDGET:
        out_t = pallas_fused_layer(wt, pT, act, neg_slope, batch_norm, eps)
    else:
        if not batch_norm:
            out_t = pallas_conv_act(wt, pT, act, neg_slope)
        else:
            conv, s, ss, tm = pallas_conv_stats(wt, pT)
            sums = jnp.sum(s[..., 0], axis=0)            # [Cout]
            sumsq = jnp.sum(ss[..., 0], axis=0)          # [Cout]
            mean = sums / M                              # padded cols are zero
            var = jnp.maximum(sumsq / M - mean * mean, 0.0)
            inv = jax.lax.rsqrt(var + eps)
            scale = inv.reshape(Cout, 1)
            shift = (-mean * inv).reshape(Cout, 1)
            out_t = pallas_affine_act(conv, scale, shift, act, neg_slope, tm)
        if out_t.shape[1] != M:                          # strip lane padding
            out_t = out_t[:, :M]

    return out_t.reshape(Cout, N, Do, Ho, Wo)


# ---------------------------------------------------------------------------
# Encoder: 5 conv blocks (k=4, s=2, p=1, ch_mult=2, start channels=1)
# ---------------------------------------------------------------------------
LAYER_CFG = [
    # (Cin, Cout, batch_norm, activation)
    (1, 2, False, "leakyrelu"),
    (2, 4, True, "leakyrelu"),
    (4, 8, True, "leakyrelu"),
    (8, 16, True, "leakyrelu"),
    (16, 32, False, "sigmoid"),
]


def init_weights(key):
    ws = []
    for (cin, cout, _, _) in LAYER_CFG:
        key, sub = jax.random.split(key)
        fan_in = cin * 4 * 4 * 4
        ws.append(jax.random.normal(sub, (cout, cin, 4, 4, 4), jnp.float32)
                  * (1.0 / jnp.sqrt(fan_in)))
    return ws


def encoder_forward(x, weights):
    out = jnp.transpose(x, (1, 0, 2, 3, 4))          # NCDHW -> CNDHW (once)
    for w, (_, _, bn, act) in zip(weights, LAYER_CFG):
        out = conv_bn_act_layer(out, w, act=act, batch_norm=bn, neg_slope=0.2)
    return jnp.transpose(out, (1, 0, 2, 3, 4))       # back to NCDHW


# Pure-JAX reference for correctness checking (not part of the kernel path).
# Conv operands are cast to bf16 (same as the kernel) with f32 accumulation,
# so differences are only accumulation-order noise.
def reference_forward(x, weights):
    out = x
    for w, (_, _, bn, act) in zip(weights, LAYER_CFG):
        out = jax.lax.conv_general_dilated(
            out.astype(jnp.bfloat16), w.astype(jnp.bfloat16),
            window_strides=(2, 2, 2),
            padding=((1, 1), (1, 1), (1, 1)),
            dimension_numbers=("NCDHW", "OIDHW", "NCDHW"),
            preferred_element_type=jnp.float32,
            precision=jax.lax.Precision.HIGHEST,
        )
        if bn:
            mean = out.mean(axis=(0, 2, 3, 4), keepdims=True)
            var = jnp.var(out, axis=(0, 2, 3, 4), keepdims=True)
            out = (out - mean) / jnp.sqrt(var + 1e-5)
        if act == "leakyrelu":
            out = jnp.where(out >= 0, out, 0.2 * out)
        else:
            out = jax.nn.sigmoid(out)
    return out


if __name__ == "__main__":
    key = jax.random.PRNGKey(0)
    key_x, key_w = jax.random.split(key)
    # small cube_edge=32 (module default is 128); 5 stride-2 convs: 32 -> 1
    x = jax.random.normal(key_x, (2, 1, 32, 32, 32), jnp.float32)
    weights = init_weights(key_w)

    out = jax.jit(encoder_forward)(x, weights)
    out = jax.block_until_ready(out)
    assert out.shape == (2, 32, 1, 1, 1), out.shape

    ref = jax.block_until_ready(reference_forward(x, weights))
    assert jnp.allclose(out, ref, atol=1e-3, rtol=1e-3), (
        float(jnp.max(jnp.abs(out - ref))))

    print("KERNEL_OK")
</pallas_src>

<mosaic_0001>
module attributes {stable_mosaic.version = 11 : i64} {
  func.func @_fused_layer_kernel(%arg0: memref<2x64xbf16, #tpu.memory_space<vmem>>, %arg1: memref<64x8192xbf16, #tpu.memory_space<vmem>>, %arg2: memref<2x8192xf32, #tpu.memory_space<vmem>>) attributes {dimension_semantics = [], scalar_prefetch = 0 : i64, scratch_operands = 0 : i64, tpu.core_type = #tpu.core_type<tc>} {
    %c0 = arith.constant 0 : index
    %c0_0 = arith.constant 0 : index
    %0 = vector.load %arg0[%c0, %c0_0] : memref<2x64xbf16, #tpu.memory_space<vmem>>, vector<2x64xbf16>
    %c0_1 = arith.constant 0 : index
    %c0_2 = arith.constant 0 : index
    %1 = vector.load %arg1[%c0_1, %c0_2] : memref<64x8192xbf16, #tpu.memory_space<vmem>>, vector<64x8192xbf16>
    %cst = arith.constant dense<0.000000e+00> : vector<2x8192xf32>
    %2 = tpu.matmul %0, %1, %cst {dimension_numbers = #tpu.dot_dimension_numbers<[1], [0], [0], [1], [0, 0, 1, 1], [], []>} : vector<2x64xbf16>, vector<64x8192xbf16>, vector<2x8192xf32> -> vector<2x8192xf32>
    %cst_3 = arith.constant 0.000000e+00 : f32
    %3 = vector.broadcast %cst_3 : f32 to vector<2x8192xf32>
    %4 = arith.cmpf oge, %2, %3 : vector<2x8192xf32>
    %cst_4 = arith.constant 2.000000e-01 : f32
    %5 = vector.broadcast %cst_4 : f32 to vector<2x8192xf32>
    %6 = arith.mulf %5, %2 : vector<2x8192xf32>
    %7 = arith.select %4, %2, %6 : vector<2x8192xi1>, vector<2x8192xf32>
    %c0_5 = arith.constant 0 : index
    %c0_6 = arith.constant 0 : index
    %8 = vector.load %arg2[%c0_5, %c0_6] : memref<2x8192xf32, #tpu.memory_space<vmem>>, vector<2x8192xf32>
    tpu.vector_store %arg2[%c0_5, %c0_6], %7 {strides = array<i32>} : memref<2x8192xf32, #tpu.memory_space<vmem>>, vector<2x8192xf32>,
    return
  }
}

module attributes {stable_mosaic.version = 11 : i64} {
  func.func @_fused_layer_kernel(%arg0: memref<4x128xbf16, #tpu.memory_space<vmem>>, %arg1: memref<128x1024xbf16, #tpu.memory_space<vmem>>, %arg2: memref<4x1024xf32, #tpu.memory_space<vmem>>) attributes {dimension_semantics = [], scalar_prefetch = 0 : i64, scratch_operands = 0 : i64, tpu.core_type = #tpu.core_type<tc>} {
    %c0 = arith.constant 0 : index
    %c0_0 = arith.constant 0 : index
    %0 = vector.load %arg0[%c0, %c0_0] : memref<4x128xbf16, #tpu.memory_space<vmem>>, vector<4x128xbf16>
    %c0_1 = arith.constant 0 : index
    %c0_2 = arith.constant 0 : index
    %1 = vector.load %arg1[%c0_1, %c0_2] : memref<128x1024xbf16, #tpu.memory_space<vmem>>, vector<128x1024xbf16>
    %cst = arith.constant dense<0.000000e+00> : vector<4x1024xf32>
    %2 = tpu.matmul %0, %1, %cst {dimension_numbers = #tpu.dot_dimension_numbers<[1], [0], [0], [1], [0, 0, 1, 1], [], []>} : vector<4x128xbf16>, vector<128x1024xbf16>, vector<4x1024xf32> -> vector<4x1024xf32>
    %cst_3 = arith.constant dense<0.000000e+00> : vector<4xf32>
    %3 = vector.multi_reduction <add>, %2, %cst_3 [1] : vector<4x1024xf32> to vector<4xf32>
    %4 = vector.shape_cast %3 : vector<4xf32> to vector<4x1xf32>
    %cst_4 = arith.constant 9.765625E-4 : f32
    %5 = vector.broadcast %cst_4 : f32 to vector<4x1xf32>
    %6 = arith.mulf %4, %5 : vector<4x1xf32>
    %7 = arith.mulf %2, %2 : vector<4x1024xf32>
    %cst_5 = arith.constant dense<0.000000e+00> : vector<4xf32>
    %8 = vector.multi_reduction <add>, %7, %cst_5 [1] : vector<4x1024xf32> to vector<4xf32>
    %9 = vector.shape_cast %8 : vector<4xf32> to vector<4x1xf32>
    %cst_6 = arith.constant 9.765625E-4 : f32
    %10 = vector.broadcast %cst_6 : f32 to vector<4x1xf32>
    %11 = arith.mulf %9, %10 : vector<4x1xf32>
    %12 = arith.mulf %6, %6 : vector<4x1xf32>
    %13 = arith.subf %11, %12 : vector<4x1xf32>
    %cst_7 = arith.constant 0.000000e+00 : f32
    %14 = vector.broadcast %cst_7 : f32 to vector<4x1xf32>
    %15 = arith.maximumf %13, %14 : vector<4x1xf32>
    %16 = vector.broadcast %6 : vector<4x1xf32> to vector<4x1024xf32>
    %17 = arith.subf %2, %16 : vector<4x1024xf32>
    %cst_8 = arith.constant 9.99999974E-6 : f32
    %18 = vector.broadcast %cst_8 : f32 to vector<4x1xf32>
    %19 = arith.addf %15, %18 : vector<4x1xf32>
    %20 = math.rsqrt %19 : vector<4x1xf32>
    %21 = vector.broadcast %20 : vector<4x1xf32> to vector<4x1024xf32>
    %22 = arith.mulf %17, %21 : vector<4x1024xf32>
    %cst_9 = arith.constant 0.000000e+00 : f32
    %23 = vector.broadcast %cst_9 : f32 to vector<4x1024xf32>
    %24 = arith.cmpf oge, %22, %23 : vector<4x1024xf32>
    %cst_10 = arith.constant 2.000000e-01 : f32
    %25 = vector.broadcast %cst_10 : f32 to vector<4x1024xf32>
    %26 = arith.mulf %25, %22 : vector<4x1024xf32>
    %27 = arith.select %24, %22, %26 : vector<4x1024xi1>, vector<4x1024xf32>
    %c0_11 = arith.constant 0 : index
    %c0_12 = arith.constant 0 : index
    %28 = vector.load %arg2[%c0_11, %c0_12] : memref<4x1024xf32, #tpu.memory_space<vmem>>, vector<4x1024xf32>
    tpu.vector_store %arg2[%c0_11, %c0_12], %27 {strides = array<i32>} : memref<4x1024xf32, #tpu.memory_space<vmem>>, vector<4x1024xf32>,
    return
  }
}

module attributes {stable_mosaic.version = 11 : i64} {
  func.func @_fused_layer_kernel(%arg0: memref<8x256xbf16, #tpu.memory_space<vmem>>, %arg1: memref<256x128xbf16, #tpu.memory_space<vmem>>, %arg2: memref<8x128xf32, #tpu.memory_space<vmem>>) attributes {dimension_semantics = [], scalar_prefetch = 0 : i64, scratch_operands = 0 : i64, tpu.core_type = #tpu.core_type<tc>} {
    %c0 = arith.constant 0 : index
    %c0_0 = arith.constant 0 : index
    %0 = vector.load %arg0[%c0, %c0_0] : memref<8x256xbf16, #tpu.memory_space<vmem>>, vector<8x256xbf16>
    %c0_1 = arith.constant 0 : index
    %c0_2 = arith.constant 0 : index
    %1 = vector.load %arg1[%c0_1, %c0_2] : memref<256x128xbf16, #tpu.memory_space<vmem>>, vector<256x128xbf16>
    %cst = arith.constant dense<0.000000e+00> : vector<8x128xf32>
    %2 = tpu.matmul %0, %1, %cst {dimension_numbers = #tpu.dot_dimension_numbers<[1], [0], [0], [1], [0, 0, 1, 1], [], []>} : vector<8x256xbf16>, vector<256x128xbf16>, vector<8x128xf32> -> vector<8x128xf32>
    %cst_3 = arith.constant dense<0.000000e+00> : vector<8xf32>
    %3 = vector.multi_reduction <add>, %2, %cst_3 [1] : vector<8x128xf32> to vector<8xf32>
    %4 = vector.shape_cast %3 : vector<8xf32> to vector<8x1xf32>
    %cst_4 = arith.constant 7.812500e-03 : f32
    %5 = vector.broadcast %cst_4 : f32 to vector<8x1xf32>
    %6 = arith.mulf %4, %5 : vector<8x1xf32>
    %7 = arith.mulf %2, %2 : vector<8x128xf32>
    %cst_5 = arith.constant dense<0.000000e+00> : vector<8xf32>
    %8 = vector.multi_reduction <add>, %7, %cst_5 [1] : vector<8x128xf32> to vector<8xf32>
    %9 = vector.shape_cast %8 : vector<8xf32> to vector<8x1xf32>
    %cst_6 = arith.constant 7.812500e-03 : f32
    %10 = vector.broadcast %cst_6 : f32 to vector<8x1xf32>
    %11 = arith.mulf %9, %10 : vector<8x1xf32>
    %12 = arith.mulf %6, %6 : vector<8x1xf32>
    %13 = arith.subf %11, %12 : vector<8x1xf32>
    %cst_7 = arith.constant 0.000000e+00 : f32
    %14 = vector.broadcast %cst_7 : f32 to vector<8x1xf32>
    %15 = arith.maximumf %13, %14 : vector<8x1xf32>
    %16 = vector.broadcast %6 : vector<8x1xf32> to vector<8x128xf32>
    %17 = arith.subf %2, %16 : vector<8x128xf32>
    %cst_8 = arith.constant 9.99999974E-6 : f32
    %18 = vector.broadcast %cst_8 : f32 to vector<8x1xf32>
    %19 = arith.addf %15, %18 : vector<8x1xf32>
    %20 = math.rsqrt %19 : vector<8x1xf32>
    %21 = vector.broadcast %20 : vector<8x1xf32> to vector<8x128xf32>
    %22 = arith.mulf %17, %21 : vector<8x128xf32>
    %cst_9 = arith.constant 0.000000e+00 : f32
    %23 = vector.broadcast %cst_9 : f32 to vector<8x128xf32>
    %24 = arith.cmpf oge, %22, %23 : vector<8x128xf32>
    %cst_10 = arith.constant 2.000000e-01 : f32
    %25 = vector.broadcast %cst_10 : f32 to vector<8x128xf32>
    %26 = arith.mulf %25, %22 : vector<8x128xf32>
    %27 = arith.select %24, %22, %26 : vector<8x128xi1>, vector<8x128xf32>
    %c0_11 = arith.constant 0 : index
    %c0_12 = arith.constant 0 : index
    %28 = vector.load %arg2[%c0_11, %c0_12] : memref<8x128xf32, #tpu.memory_space<vmem>>, vector<8x128xf32>
    tpu.vector_store %arg2[%c0_11, %c0_12], %27 {strides = array<i32>} : memref<8x128xf32, #tpu.memory_space<vmem>>, vector<8x128xf32>,
    return
  }
}

module attributes {stable_mosaic.version = 11 : i64} {
  func.func @_fused_layer_kernel(%arg0: memref<16x512xbf16, #tpu.memory_space<vmem>>, %arg1: memref<512x16xbf16, #tpu.memory_space<vmem>>, %arg2: memref<16x16xf32, #tpu.memory_space<vmem>>) attributes {dimension_semantics = [], scalar_prefetch = 0 : i64, scratch_operands = 0 : i64, tpu.core_type = #tpu.core_type<tc>} {
    %c0 = arith.constant 0 : index
    %c0_0 = arith.constant 0 : index
    %0 = vector.load %arg0[%c0, %c0_0] : memref<16x512xbf16, #tpu.memory_space<vmem>>, vector<16x512xbf16>
    %c0_1 = arith.constant 0 : index
    %c0_2 = arith.constant 0 : index
    %1 = vector.load %arg1[%c0_1, %c0_2] : memref<512x16xbf16, #tpu.memory_space<vmem>>, vector<512x16xbf16>
    %cst = arith.constant dense<0.000000e+00> : vector<16x16xf32>
    %2 = tpu.matmul %0, %1, %cst {dimension_numbers = #tpu.dot_dimension_numbers<[1], [0], [0], [1], [0, 0, 1, 1], [], []>} : vector<16x512xbf16>, vector<512x16xbf16>, vector<16x16xf32> -> vector<16x16xf32>
    %cst_3 = arith.constant dense<0.000000e+00> : vector<16xf32>
    %3 = vector.multi_reduction <add>, %2, %cst_3 [1] : vector<16x16xf32> to vector<16xf32>
    %4 = vector.shape_cast %3 : vector<16xf32> to vector<16x1xf32>
    %cst_4 = arith.constant 6.250000e-02 : f32
    %5 = vector.broadcast %cst_4 : f32 to vector<16x1xf32>
    %6 = arith.mulf %4, %5 : vector<16x1xf32>
    %7 = arith.mulf %2, %2 : vector<16x16xf32>
    %cst_5 = arith.constant dense<0.000000e+00> : vector<16xf32>
    %8 = vector.multi_reduction <add>, %7, %cst_5 [1] : vector<16x16xf32> to vector<16xf32>
    %9 = vector.shape_cast %8 : vector<16xf32> to vector<16x1xf32>
    %cst_6 = arith.constant 6.250000e-02 : f32
    %10 = vector.broadcast %cst_6 : f32 to vector<16x1xf32>
    %11 = arith.mulf %9, %10 : vector<16x1xf32>
    %12 = arith.mulf %6, %6 : vector<16x1xf32>
    %13 = arith.subf %11, %12 : vector<16x1xf32>
    %cst_7 = arith.constant 0.000000e+00 : f32
    %14 = vector.broadcast %cst_7 : f32 to vector<16x1xf32>
    %15 = arith.maximumf %13, %14 : vector<16x1xf32>
    %16 = vector.broadcast %6 : vector<16x1xf32> to vector<16x16xf32>
    %17 = arith.subf %2, %16 : vector<16x16xf32>
    %cst_8 = arith.constant 9.99999974E-6 : f32
    %18 = vector.broadcast %cst_8 : f32 to vector<16x1xf32>
    %19 = arith.addf %15, %18 : vector<16x1xf32>
    %20 = math.rsqrt %19 : vector<16x1xf32>
    %21 = vector.broadcast %20 : vector<16x1xf32> to vector<16x16xf32>
    %22 = arith.mulf %17, %21 : vector<16x16xf32>
    %cst_9 = arith.constant 0.000000e+00 : f32
    %23 = vector.broadcast %cst_9 : f32 to vector<16x16xf32>
    %24 = arith.cmpf oge, %22, %23 : vector<16x16xf32>
    %cst_10 = arith.constant 2.000000e-01 : f32
    %25 = vector.broadcast %cst_10 : f32 to vector<16x16xf32>
    %26 = arith.mulf %25, %22 : vector<16x16xf32>
    %27 = arith.select %24, %22, %26 : vector<16x16xi1>, vector<16x16xf32>
    %c0_11 = arith.constant 0 : index
    %c0_12 = arith.constant 0 : index
    %28 = vector.load %arg2[%c0_11, %c0_12] : memref<16x16xf32, #tpu.memory_space<vmem>>, vector<16x16xf32>
    tpu.vector_store %arg2[%c0_11, %c0_12], %27 {strides = array<i32>} : memref<16x16xf32, #tpu.memory_space<vmem>>, vector<16x16xf32>,
    return
  }
}

module attributes {stable_mosaic.version = 11 : i64} {
  func.func @_fused_layer_kernel(%arg0: memref<32x1024xbf16, #tpu.memory_space<vmem>>, %arg1: memref<1024x2xbf16, #tpu.memory_space<vmem>>, %arg2: memref<32x2xf32, #tpu.memory_space<vmem>>) attributes {dimension_semantics = [], scalar_prefetch = 0 : i64, scratch_operands = 0 : i64, tpu.core_type = #tpu.core_type<tc>} {
    %c0 = arith.constant 0 : index
    %c0_0 = arith.constant 0 : index
    %0 = vector.load %arg0[%c0, %c0_0] : memref<32x1024xbf16, #tpu.memory_space<vmem>>, vector<32x1024xbf16>
    %c0_1 = arith.constant 0 : index
    %c0_2 = arith.constant 0 : index
    %1 = vector.load %arg1[%c0_1, %c0_2] : memref<1024x2xbf16, #tpu.memory_space<vmem>>, vector<1024x2xbf16>
    %cst = arith.constant dense<0.000000e+00> : vector<32x2xf32>
    %2 = tpu.matmul %0, %1, %cst {dimension_numbers = #tpu.dot_dimension_numbers<[1], [0], [0], [1], [0, 0, 1, 1], [], []>} : vector<32x1024xbf16>, vector<1024x2xbf16>, vector<32x2xf32> -> vector<32x2xf32>
    %3 = arith.negf %2 : vector<32x2xf32>
    %4 = math.exp %3 : vector<32x2xf32>
    %cst_3 = arith.constant 1.000000e+00 : f32
    %5 = vector.broadcast %cst_3 : f32 to vector<32x2xf32>
    %6 = arith.addf %5, %4 : vector<32x2xf32>
    %7 = arith.divf %5, %6 : vector<32x2xf32>
    %c0_4 = arith.constant 0 : index
    %c0_5 = arith.constant 0 : index
    %8 = vector.load %arg2[%c0_4, %c0_5] : memref<32x2xf32, #tpu.memory_space<vmem>>, vector<32x2xf32>
    tpu.vector_store %arg2[%c0_4, %c0_5], %7 {strides = array<i32>} : memref<32x2xf32, #tpu.memory_space<vmem>>, vector<32x2xf32>,
    return
  }
}

</mosaic_0001>

<bundles_post_ra>
// kernel: encoder_forward.5
= control target key start
LH: loop header
LB: loop body
LE: loop exit
PB: predicated region body
PF: predicated region fallthrough
CT: control target
= control target key end

     0   :  { %v3720_v3 = vmov 0   ;;  %vm1549_vm0 = vcmask 523264   ;;  %s4699_s1 = inlined_call_operand.vmem [shape: bf16[64,8192], index: 1, kind: input, shape index: {}]   ;;  %s4700_s0 = inlined_call_operand.vmem [shape: bf16[2,64], index: 0, kind: input, shape index: {}]   ;;  %s4701_s2 = inlined_call_operand.vmem [shape: f32[2,8192], index: 2, kind: output, shape index: {}]  }
   0x1   :  { %v205_v0 = vld [vmem:[%s4699_s1 + $0x600] sm:$0xff]  ;;  %v206_v2 = vld [vmem:[%s4699_s1 + $0x608] sm:$0xff]  ;;  %1585 = vmatprep.mubr.bf16.mxu0 %v3720_v3  ;;  %1626 = vmatprep.mubr.bf16.mxu1 %v3720_v3  ;;  %v207_v31 = vld [vmem:[%s4699_s1 + $0x610] sm:$0xff] }
   0x2   :  { %v237_v1 = vld [vmem:[%s4699_s1 + $0x700] sm:$0xff]  ;;  %v238_v5 = vld [vmem:[%s4699_s1 + $0x708] sm:$0xff]  ;;  %v239_v32 = vld [vmem:[%s4699_s1 + $0x710] sm:$0xff] }
   0x3   :  { %v3622_v4 = vcombine.high %v205_v0, %v237_v1  ;;  %v3621_v6 = vcombine.low %v205_v0, %v237_v1  ;;  %v141_v7 = vld [vmem:[%s4699_s1 + $0x400] sm:$0xff]  ;;  %v3624_v9 = vcombine.high %v206_v2, %v238_v5  ;;  %v3623_v10 = vcombine.low %v206_v2, %v238_v5  ;;  %v142_v12 = vld [vmem:[%s4699_s1 + $0x408] sm:$0xff]  ;;  %v208_v33 = vld [vmem:[%s4699_s1 + $0x618] sm:$0xff] }
   0x4   :  { %v173_v8 = vld [vmem:[%s4699_s1 + $0x500] sm:$0xff]  ;;  %v174_v13 = vld [vmem:[%s4699_s1 + $0x508] sm:$0xff]  ;;  %v240_v34 = vld [vmem:[%s4699_s1 + $0x718] sm:$0xff]  ;;  %v3626_v37 = vcombine.high %v207_v31, %v239_v32  ;;  %v3625_v44 = vcombine.low %v207_v31, %v239_v32 }
   0x5   :  { %v3558_v11 = vcombine.high %v141_v7, %v173_v8  ;;  %v77_v14 = vld [vmem:[%s4699_s1 + $0x200] sm:$0xff]  ;;  %1561 = vmatprep.subr.bf16.mxu0 %v3622_v4  ;;  %v3560_v15 = vcombine.high %v142_v12, %v174_v13  ;;  %v78_v17 = vld [vmem:[%s4699_s1 + $0x208] sm:$0xff]  ;;  %1602 = vmatprep.subr.bf16.mxu1 %v3624_v9  ;;  %v3557_v19 = vcombine.low %v141_v7, %v173_v8  ;;  %v143_v39 = vld [vmem:[%s4699_s1 + $0x410] sm:$0xff] }
   0x6   :  { %v109_v16 = vld [vmem:[%s4699_s1 + $0x300] sm:$0xff]  ;;  %v110_v18 = vld [vmem:[%s4699_s1 + $0x308] sm:$0xff]  ;;  %1562 = vmatpush1.bf16.msra.mxu0 %v3621_v6  ;;  %1603 = vmatpush1.bf16.msra.mxu1 %v3623_v10  ;;  %v3559_v20 = vcombine.low %v142_v12, %v174_v13  ;;  %v3628_v38 = vcombine.high %v208_v33, %v240_v34  ;;  %v175_v40 = vld [vmem:[%s4699_s1 + $0x510] sm:$0xff]  ;;  %v3627_v45 = vcombine.low %v208_v33, %v240_v34 }
   0x7   :  { %1563 = vmatprep.subr.bf16.mxu0 %v3558_v11  ;;  %v3494_v21 = vcombine.high %v77_v14, %v109_v16  ;;  %1604 = vmatprep.subr.bf16.mxu1 %v3560_v15  ;;  %v3496_v22 = vcombine.high %v78_v17, %v110_v18  ;;  %v13_v23 = vld [vmem:[%s4699_s1] sm:$0xff]  ;;  %v14_v25 = vld [vmem:[%s4699_s1 + $0x8] sm:$0xff]  ;;  %v3493_v27 = vcombine.low %v77_v14, %v109_v16  ;;  %v144_v41 = vld [vmem:[%s4699_s1 + $0x418] sm:$0xff] }
   0x8   :  { %v45_v24 = vld [vmem:[%s4699_s1 + $0x100] sm:$0xff]  ;;  %v46_v26 = vld [vmem:[%s4699_s1 + $0x108] sm:$0xff]  ;;  %v3495_v28 = vcombine.low %v78_v17, %v110_v18  ;;  %v176_v42 = vld [vmem:[%s4699_s1 + $0x518] sm:$0xff]  ;;  %v3562_v46 = vcombine.high %v143_v39, %v175_v40  ;;  %v3561_v52 = vcombine.low %v143_v39, %v175_v40 }
   0x9   :  { %v3430_v29 = vcombine.high %v13_v23, %v45_v24  ;;  %v3432_v30 = vcombine.high %v14_v25, %v46_v26  ;;  %v3429_v35 = vcombine.low %v13_v23, %v45_v24  ;;  %v3431_v36 = vcombine.low %v14_v25, %v46_v26  ;;  %v3814_v43 = vld [vmem:[%s4700_s0] sm:$0x1]  ;;  %v79_v48 = vld [vmem:[%s4699_s1 + $0x210] sm:$0xff]  ;;  %v80_v50 = vld [vmem:[%s4699_s1 + $0x218] sm:$0xff] }
   0xa   :  { %1564 = vmatpush1.bf16.msra.mxu0 %v3557_v19  ;;  %1605 = vmatpush1.bf16.msra.mxu1 %v3559_v20  ;;  %v3564_v47 = vcombine.high %v144_v41, %v176_v42  ;;  %v111_v49 = vld [vmem:[%s4699_s1 + $0x310] sm:$0xff]  ;;  %v112_v51 = vld [vmem:[%s4699_s1 + $0x318] sm:$0xff]  ;;  %v3563_v53 = vcombine.low %v144_v41, %v176_v42  ;;  %v209_v0 = vld [vmem:[%s4699_s1 + $0x620] sm:$0xff] }
   0xb   :  { %1565 = vmatprep.subr.bf16.mxu0 %v3494_v21  ;;  %1606 = vmatprep.subr.bf16.mxu1 %v3496_v22  ;;  %v3498_v54 = vcombine.high %v79_v48, %v111_v49  ;;  %v3500_v55 = vcombine.high %v80_v50, %v112_v51  ;;  %v15_v56 = vld [vmem:[%s4699_s1 + $0x10] sm:$0xff]  ;;  %v16_v58 = vld [vmem:[%s4699_s1 + $0x18] sm:$0xff]  ;;  %v3497_v60 = vcombine.low %v79_v48, %v111_v49  ;;  %v241_v1 = vld [vmem:[%s4699_s1 + $0x720] sm:$0xff] }
   0xc   :  { %v47_v57 = vld [vmem:[%s4699_s1 + $0x110] sm:$0xff]  ;;  %v48_v59 = vld [vmem:[%s4699_s1 + $0x118] sm:$0xff]  ;;  %v3499_v61 = vcombine.low %v80_v50, %v112_v51  ;;  %v210_v2 = vld [vmem:[%s4699_s1 + $0x628] sm:$0xff]  ;;  %v3630_v7 = vcombine.high %v209_v0, %v241_v1  ;;  %v3629_v13 = vcombine.low %v209_v0, %v241_v1 }
   0xd   :  { %v3434_v62 = vcombine.high %v15_v56, %v47_v57  ;;  %v3436_v63 = vcombine.high %v16_v58, %v48_v59  ;;  %v242_v4 = vld [vmem:[%s4699_s1 + $0x728] sm:$0xff]  ;;  %v3433_v5 = vcombine.low %v15_v56, %v47_v57  ;;  %v3435_v6 = vcombine.low %v16_v58, %v48_v59  ;;  %v145_v9 = vld [vmem:[%s4699_s1 + $0x420] sm:$0xff]  ;;  %v211_v33 = vld [vmem:[%s4699_s1 + $0x630] sm:$0xff] }
   0xe   :  { %1566 = vmatpush1.bf16.msra.mxu0 %v3493_v27  ;;  %1607 = vmatpush1.bf16.msra.mxu1 %v3495_v28  ;;  %v3632_v8 = vcombine.high %v210_v2, %v242_v4  ;;  %v177_v10 = vld [vmem:[%s4699_s1 + $0x520] sm:$0xff]  ;;  %v146_v11 = vld [vmem:[%s4699_s1 + $0x428] sm:$0xff]  ;;  %v3631_v14 = vcombine.low %v210_v2, %v242_v4  ;;  %v243_v34 = vld [vmem:[%s4699_s1 + $0x730] sm:$0xff] }
   0xf   :  { %1567 = vmatprep.subr.bf16.mxu0 %v3430_v29  ;;  %1608 = vmatprep.subr.bf16.mxu1 %v3432_v30  ;;  %v178_v12 = vld [vmem:[%s4699_s1 + $0x528] sm:$0xff]  ;;  %v3566_v15 = vcombine.high %v145_v9, %v177_v10  ;;  %v81_v17 = vld [vmem:[%s4699_s1 + $0x220] sm:$0xff]  ;;  %v3565_v21 = vcombine.low %v145_v9, %v177_v10  ;;  %v3634_v39 = vcombine.high %v211_v33, %v243_v34  ;;  %v147_v41 = vld [vmem:[%s4699_s1 + $0x430] sm:$0xff] }
  0x10   :  { %v3568_v16 = vcombine.high %v146_v11, %v178_v12  ;;  %v113_v18 = vld [vmem:[%s4699_s1 + $0x320] sm:$0xff]  ;;  %v82_v19 = vld [vmem:[%s4699_s1 + $0x228] sm:$0xff]  ;;  %v3567_v22 = vcombine.low %v146_v11, %v178_v12  ;;  %v179_v42 = vld [vmem:[%s4699_s1 + $0x530] sm:$0xff] }
  0x11   :  { %v114_v20 = vld [vmem:[%s4699_s1 + $0x328] sm:$0xff]  ;;  %v3502_v23 = vcombine.high %v81_v17, %v113_v18  ;;  %v17_v25 = vld [vmem:[%s4699_s1 + $0x20] sm:$0xff]  ;;  %v3501_v29 = vcombine.low %v81_v17, %v113_v18  ;;  %v3570_v48 = vcombine.high %v147_v41, %v179_v42  ;;  %v83_v50 = vld [vmem:[%s4699_s1 + $0x230] sm:$0xff] }
  0x12   :  { %1568 = vmatpush1.bf16.msra.mxu0 %v3429_v35  ;;  %1609 = vmatpush1.bf16.msra.mxu1 %v3431_v36  ;;  %v3504_v24 = vcombine.high %v82_v19, %v114_v20  ;;  %v49_v26 = vld [vmem:[%s4699_s1 + $0x120] sm:$0xff]  ;;  %v18_v27 = vld [vmem:[%s4699_s1 + $0x28] sm:$0xff]  ;;  %v3503_v30 = vcombine.low %v82_v19, %v114_v20  ;;  %v212_v35 = vld [vmem:[%s4699_s1 + $0x638] sm:$0xff] }
  0x13   :  { %1643 = vmatprep.subr.bf16.mxu0 %v3626_v37  ;;  %1684 = vmatprep.subr.bf16.mxu1 %v3628_v38  ;;  %v50_v28 = vld [vmem:[%s4699_s1 + $0x128] sm:$0xff]  ;;  %v3438_v31 = vcombine.high %v17_v25, %v49_v26  ;;  %v244_v36 = vld [vmem:[%s4699_s1 + $0x738] sm:$0xff]  ;;  %v3437_v37 = vcombine.low %v17_v25, %v49_v26  ;;  %v115_v51 = vld [vmem:[%s4699_s1 + $0x330] sm:$0xff] }
  0x14   :  { %v3440_v32 = vcombine.high %v18_v27, %v50_v28  ;;  %v3439_v38 = vcombine.low %v18_v27, %v50_v28  ;;  %v3636_v40 = vcombine.high %v212_v35, %v244_v36  ;;  %v3506_v56 = vcombine.high %v83_v50, %v115_v51  ;;  %v19_v58 = vld [vmem:[%s4699_s1 + $0x30] sm:$0xff]  ;;  %v213_v2 = vld [vmem:[%s4699_s1 + $0x640] sm:$0xff] }
  0x15   :  { %3685 = vmatmul.mubr.msk.bf16.vlgmr.msra.gmra.mxu0 %vm1549_vm0, %v3814_v43  ;;  %3686 = vmatmul.mubr.msk.bf16.vlgmr.msra.gmra.mxu1 %vm1549_vm0, %v3814_v43  ;;  %v51_v59 = vld [vmem:[%s4699_s1 + $0x130] sm:$0xff]  ;;  %v245_v4 = vld [vmem:[%s4699_s1 + $0x740] sm:$0xff] }
  0x16   :  { %1644 = vmatpush1.bf16.msra.mxu0 %v3625_v44  ;;  %1685 = vmatpush1.bf16.msra.mxu1 %v3627_v45  ;;  %v148_v44 = vld [vmem:[%s4699_s1 + $0x438] sm:$0xff]  ;;  %v3442_v0 = vcombine.high %v19_v58, %v51_v59  ;;  %v3638_v9 = vcombine.high %v213_v2, %v245_v4  ;;  %v149_v11 = vld [vmem:[%s4699_s1 + $0x440] sm:$0xff] }
  0x17   :  { %1645 = vmatprep.subr.bf16.mxu0 %v3562_v46  ;;  %1686 = vmatprep.subr.bf16.mxu1 %v3564_v47  ;;  %v180_v45 = vld [vmem:[%s4699_s1 + $0x538] sm:$0xff]  ;;  %v3633_v46 = vcombine.low %v211_v33, %v243_v34  ;;  %v3635_v47 = vcombine.low %v212_v35, %v244_v36  ;;  %v181_v12 = vld [vmem:[%s4699_s1 + $0x540] sm:$0xff]  ;;  %v215_v35 = vld [vmem:[%s4699_s1 + $0x650] sm:$0xff] }
  0x18   :  { %1667 = vmatprep.mubr.bf16.mxu0 %v3720_v3  ;;  %1708 = vmatprep.mubr.bf16.mxu1 %v3720_v3  ;;  %v3572_v49 = vcombine.high %v148_v44, %v180_v45  ;;  %v3574_v17 = vcombine.high %v149_v11, %v181_v12  ;;  %v85_v19 = vld [vmem:[%s4699_s1 + $0x240] sm:$0xff]  ;;  %v247_v36 = vld [vmem:[%s4699_s1 + $0x750] sm:$0xff] }
  0x19   :  { %v117_v20 = vld [vmem:[%s4699_s1 + $0x340] sm:$0xff] }
  0x1a   :  { %1646 = vmatpush1.bf16.msra.mxu0 %v3561_v52  ;;  %1687 = vmatpush1.bf16.msra.mxu1 %v3563_v53  ;;  %v84_v52 = vld [vmem:[%s4699_s1 + $0x238] sm:$0xff]  ;;  %v3510_v25 = vcombine.high %v85_v19, %v117_v20  ;;  %v21_v27 = vld [vmem:[%s4699_s1 + $0x40] sm:$0xff] }
  0x1b   :  { %1647 = vmatprep.subr.bf16.mxu0 %v3498_v54  ;;  %1688 = vmatprep.subr.bf16.mxu1 %v3500_v55  ;;  %v116_v53 = vld [vmem:[%s4699_s1 + $0x338] sm:$0xff]  ;;  %v3569_v54 = vcombine.low %v147_v41, %v179_v42  ;;  %v3571_v55 = vcombine.low %v148_v44, %v180_v45  ;;  %v53_v28 = vld [vmem:[%s4699_s1 + $0x140] sm:$0xff]  ;;  %v3642_v41 = vcombine.high %v215_v35, %v247_v36  ;;  %v151_v44 = vld [vmem:[%s4699_s1 + $0x450] sm:$0xff] }
  0x1c   :  { %v3508_v57 = vcombine.high %v84_v52, %v116_v53  ;;  %v3446_v33 = vcombine.high %v21_v27, %v53_v28  ;;  %v183_v45 = vld [vmem:[%s4699_s1 + $0x550] sm:$0xff] }
  0x1e   :  { %1648 = vmatpush1.bf16.msra.mxu0 %v3497_v60  ;;  %1689 = vmatpush1.bf16.msra.mxu1 %v3499_v61  ;;  %v20_v60 = vld [vmem:[%s4699_s1 + $0x38] sm:$0xff] }
  0x1f   :  { %1649 = vmatprep.subr.bf16.mxu0 %v3434_v62  ;;  %1690 = vmatprep.subr.bf16.mxu1 %v3436_v63  ;;  %v52_v61 = vld [vmem:[%s4699_s1 + $0x138] sm:$0xff]  ;;  %v3505_v62 = vcombine.low %v83_v50, %v115_v51  ;;  %v3507_v63 = vcombine.low %v84_v52, %v116_v53  ;;  %v3578_v50 = vcombine.high %v151_v44, %v183_v45  ;;  %v87_v52 = vld [vmem:[%s4699_s1 + $0x250] sm:$0xff] }
  0x20   :  { %v3444_v1 = vcombine.high %v20_v60, %v52_v61  ;;  %v119_v53 = vld [vmem:[%s4699_s1 + $0x350] sm:$0xff] }
  0x22   :  { %1650 = vmatpush1.bf16.msra.mxu0 %v3433_v5  ;;  %1691 = vmatpush1.bf16.msra.mxu1 %v3435_v6  ;;  %v214_v5 = vld [vmem:[%s4699_s1 + $0x648] sm:$0xff] }
  0x23   :  { %1725 = vmatprep.subr.bf16.mxu0 %v3630_v7  ;;  %1766 = vmatprep.subr.bf16.mxu1 %v3632_v8  ;;  %v246_v6 = vld [vmem:[%s4699_s1 + $0x748] sm:$0xff]  ;;  %v3441_v7 = vcombine.low %v19_v58, %v51_v59  ;;  %v3443_v8 = vcombine.low %v20_v60, %v52_v61  ;;  %v3514_v58 = vcombine.high %v87_v52, %v119_v53  ;;  %v23_v60 = vld [vmem:[%s4699_s1 + $0x50] sm:$0xff] }
  0x24   :  { %v3640_v10 = vcombine.high %v214_v5, %v246_v6  ;;  %v55_v61 = vld [vmem:[%s4699_s1 + $0x150] sm:$0xff] }
  0x25   :  { %3687 = vmatmul.mubr.msk.bf16.vlgmr.msra.gmra.mxu0 %vm1549_vm0, %v3814_v43  ;;  %3688 = vmatmul.mubr.msk.bf16.vlgmr.msra.gmra.mxu1 %vm1549_vm0, %v3814_v43 }
  0x26   :  { %1726 = vmatpush1.bf16.msra.mxu0 %v3629_v13  ;;  %1767 = vmatpush1.bf16.msra.mxu1 %v3631_v14  ;;  %v150_v13 = vld [vmem:[%s4699_s1 + $0x448] sm:$0xff] }
  0x27   :  { %1727 = vmatprep.subr.bf16.mxu0 %v3566_v15  ;;  %1768 = vmatprep.subr.bf16.mxu1 %v3568_v16  ;;  %v182_v14 = vld [vmem:[%s4699_s1 + $0x548] sm:$0xff]  ;;  %v3637_v15 = vcombine.low %v213_v2, %v245_v4  ;;  %v3639_v16 = vcombine.low %v214_v5, %v246_v6  ;;  %v3450_v2 = vcombine.high %v23_v60, %v55_v61  ;;  %v217_v5 = vld [vmem:[%s4699_s1 + $0x660] sm:$0xff] }
  0x28   :  { %1749 = vmatprep.mubr.bf16.mxu0 %v3720_v3  ;;  %1790 = vmatprep.mubr.bf16.mxu1 %v3720_v3  ;;  %v3576_v18 = vcombine.high %v150_v13, %v182_v14  ;;  %v249_v6 = vld [vmem:[%s4699_s1 + $0x760] sm:$0xff] }
  0x2a   :  { %1728 = vmatpush1.bf16.msra.mxu0 %v3565_v21  ;;  %1769 = vmatpush1.bf16.msra.mxu1 %v3567_v22  ;;  %v86_v21 = vld [vmem:[%s4699_s1 + $0x248] sm:$0xff] }
  0x2b   :  { %1729 = vmatprep.subr.bf16.mxu0 %v3502_v23  ;;  %1770 = vmatprep.subr.bf16.mxu1 %v3504_v24  ;;  %v118_v22 = vld [vmem:[%s4699_s1 + $0x348] sm:$0xff]  ;;  %v3573_v23 = vcombine.low %v149_v11, %v181_v12  ;;  %v3575_v24 = vcombine.low %v150_v13, %v182_v14  ;;  %v3646_v11 = vcombine.high %v217_v5, %v249_v6  ;;  %v153_v13 = vld [vmem:[%s4699_s1 + $0x460] sm:$0xff] }
  0x2c   :  { %v3512_v26 = vcombine.high %v86_v21, %v118_v22  ;;  %v185_v14 = vld [vmem:[%s4699_s1 + $0x560] sm:$0xff] }
  0x2e   :  { %1730 = vmatpush1.bf16.msra.mxu0 %v3501_v29  ;;  %1771 = vmatpush1.bf16.msra.mxu1 %v3503_v30  ;;  %v22_v29 = vld [vmem:[%s4699_s1 + $0x48] sm:$0xff] }
  0x2f   :  { %1731 = vmatprep.subr.bf16.mxu0 %v3438_v31  ;;  %1772 = vmatprep.subr.bf16.mxu1 %v3440_v32  ;;  %v54_v30 = vld [vmem:[%s4699_s1 + $0x148] sm:$0xff]  ;;  %v3509_v31 = vcombine.low %v85_v19, %v117_v20  ;;  %v3511_v32 = vcombine.low %v86_v21, %v118_v22  ;;  %v3582_v19 = vcombine.high %v153_v13, %v185_v14  ;;  %v89_v21 = vld [vmem:[%s4699_s1 + $0x260] sm:$0xff] }
  0x30   :  { %v3448_v34 = vcombine.high %v22_v29, %v54_v30  ;;  %v121_v22 = vld [vmem:[%s4699_s1 + $0x360] sm:$0xff] }
  0x32   :  { %1732 = vmatpush1.bf16.msra.mxu0 %v3437_v37  ;;  %1773 = vmatpush1.bf16.msra.mxu1 %v3439_v38  ;;  %v216_v37 = vld [vmem:[%s4699_s1 + $0x658] sm:$0xff] }
  0x33   :  { %1807 = vmatprep.subr.bf16.mxu0 %v3634_v39  ;;  %1848 = vmatprep.subr.bf16.mxu1 %v3636_v40  ;;  %v248_v38 = vld [vmem:[%s4699_s1 + $0x758] sm:$0xff]  ;;  %v3445_v39 = vcombine.low %v21_v27, %v53_v28  ;;  %v3447_v40 = vcombine.low %v22_v29, %v54_v30  ;;  %v3518_v27 = vcombine.high %v89_v21, %v121_v22  ;;  %v25_v29 = vld [vmem:[%s4699_s1 + $0x60] sm:$0xff] }
  0x34   :  { %v3644_v42 = vcombine.high %v216_v37, %v248_v38  ;;  %v57_v30 = vld [vmem:[%s4699_s1 + $0x160] sm:$0xff] }
  0x35   :  { %3689 = vmatmul.mubr.msk.bf16.vlgmr.msra.gmra.mxu0 %vm1549_vm0, %v3814_v43  ;;  %3690 = vmatmul.mubr.msk.bf16.vlgmr.msra.gmra.mxu1 %vm1549_vm0, %v3814_v43 }
  0x36   :  { %1808 = vmatpush1.bf16.msra.mxu0 %v3633_v46  ;;  %1849 = vmatpush1.bf16.msra.mxu1 %v3635_v47  ;;  %v152_v46 = vld [vmem:[%s4699_s1 + $0x458] sm:$0xff] }
  0x37   :  { %1809 = vmatprep.subr.bf16.mxu0 %v3570_v48  ;;  %1850 = vmatprep.subr.bf16.mxu1 %v3572_v49  ;;  %v184_v47 = vld [vmem:[%s4699_s1 + $0x558] sm:$0xff]  ;;  %v3641_v48 = vcombine.low %v215_v35, %v247_v36  ;;  %v3643_v49 = vcombine.low %v216_v37, %v248_v38  ;;  %v3454_v35 = vcombine.high %v25_v29, %v57_v30  ;;  %v219_v37 = vld [vmem:[%s4699_s1 + $0x670] sm:$0xff] }
  0x38   :  { %1831 = vmatprep.mubr.bf16.mxu0 %v3720_v3  ;;  %1872 = vmatprep.mubr.bf16.mxu1 %v3720_v3  ;;  %v3580_v51 = vcombine.high %v152_v46, %v184_v47  ;;  %v251_v38 = vld [vmem:[%s4699_s1 + $0x770] sm:$0xff] }
  0x3a   :  { %1810 = vmatpush1.bf16.msra.mxu0 %v3569_v54  ;;  %1851 = vmatpush1.bf16.msra.mxu1 %v3571_v55  ;;  %v88_v54 = vld [vmem:[%s4699_s1 + $0x258] sm:$0xff] }
  0x3b   :  { %1811 = vmatprep.subr.bf16.mxu0 %v3506_v56  ;;  %1852 = vmatprep.subr.bf16.mxu1 %v3508_v57  ;;  %v120_v55 = vld [vmem:[%s4699_s1 + $0x358] sm:$0xff]  ;;  %v3577_v56 = vcombine.low %v151_v44, %v183_v45  ;;  %v3579_v57 = vcombine.low %v152_v46, %v184_v47  ;;  %v3650_v44 = vcombine.high %v219_v37, %v251_v38  ;;  %v155_v46 = vld [vmem:[%s4699_s1 + $0x470] sm:$0xff] }
  0x3c   :  { %v3516_v59 = vcombine.high %v88_v54, %v120_v55  ;;  %v187_v47 = vld [vmem:[%s4699_s1 + $0x570] sm:$0xff] }
  0x3e   :  { %1812 = vmatpush1.bf16.msra.mxu0 %v3505_v62  ;;  %1853 = vmatpush1.bf16.msra.mxu1 %v3507_v63  ;;  %v24_v62 = vld [vmem:[%s4699_s1 + $0x58] sm:$0xff] }
  0x3f   :  { %1813 = vmatprep.subr.bf16.mxu0 %v3442_v0  ;;  %1854 = vmatprep.subr.bf16.mxu1 %v3444_v1  ;;  %v56_v63 = vld [vmem:[%s4699_s1 + $0x158] sm:$0xff]  ;;  %v3513_v0 = vcombine.low %v87_v52, %v119_v53  ;;  %v3515_v1 = vcombine.low %v88_v54, %v120_v55  ;;  %v3586_v52 = vcombine.high %v155_v46, %v187_v47  ;;  %v91_v54 = vld [vmem:[%s4699_s1 + $0x270] sm:$0xff] }
  0x40   :  { %v3452_v4 = vcombine.high %v24_v62, %v56_v63  ;;  %v123_v55 = vld [vmem:[%s4699_s1 + $0x370] sm:$0xff] }
  0x42   :  { %1814 = vmatpush1.bf16.msra.mxu0 %v3441_v7  ;;  %1855 = vmatpush1.bf16.msra.mxu1 %v3443_v8  ;;  %v218_v7 = vld [vmem:[%s4699_s1 + $0x668] sm:$0xff] }
  0x43   :  { %1889 = vmatprep.subr.bf16.mxu0 %v3638_v9  ;;  %1930 = vmatprep.subr.bf16.mxu1 %v3640_v10  ;;  %v250_v8 = vld [vmem:[%s4699_s1 + $0x768] sm:$0xff]  ;;  %v3449_v9 = vcombine.low %v23_v60, %v55_v61  ;;  %v3451_v10 = vcombine.low %v24_v62, %v56_v63  ;;  %v3522_v60 = vcombine.high %v91_v54, %v123_v55  ;;  %v27_v62 = vld [vmem:[%s4699_s1 + $0x70] sm:$0xff] }
  0x44   :  { %v3648_v12 = vcombine.high %v218_v7, %v250_v8  ;;  %v59_v63 = vld [vmem:[%s4699_s1 + $0x170] sm:$0xff] }
  0x45   :  { %3691 = vmatmul.mubr.msk.bf16.vlgmr.msra.gmra.mxu0 %vm1549_vm0, %v3814_v43  ;;  %3692 = vmatmul.mubr.msk.bf16.vlgmr.msra.gmra.mxu1 %vm1549_vm0, %v3814_v43 }
  0x46   :  { %1890 = vmatpush1.bf16.msra.mxu0 %v3637_v15  ;;  %1931 = vmatpush1.bf16.msra.mxu1 %v3639_v16  ;;  %v154_v15 = vld [vmem:[%s4699_s1 + $0x468] sm:$0xff] }
  0x47   :  { %1891 = vmatprep.subr.bf16.mxu0 %v3574_v17  ;;  %1932 = vmatprep.subr.bf16.mxu1 %v3576_v18  ;;  %v186_v16 = vld [vmem:[%s4699_s1 + $0x568] sm:$0xff]  ;;  %v3645_v17 = vcombine.low %v217_v5, %v249_v6  ;;  %v3647_v18 = vcombine.low %v218_v7, %v250_v8  ;;  %v3458_v5 = vcombine.high %v27_v62, %v59_v63  ;;  %v221_v7 = vld [vmem:[%s4699_s1 + $0x680] sm:$0xff] }
  0x48   :  { %1913 = vmatprep.mubr.bf16.mxu0 %v3720_v3  ;;  %1954 = vmatprep.mubr.bf16.mxu1 %v3720_v3  ;;  %v3584_v20 = vcombine.high %v154_v15, %v186_v16  ;;  %v253_v8 = vld [vmem:[%s4699_s1 + $0x780] sm:$0xff] }
  0x4a   :  { %1892 = vmatpush1.bf16.msra.mxu0 %v3573_v23  ;;  %1933 = vmatpush1.bf16.msra.mxu1 %v3575_v24  ;;  %v90_v23 = vld [vmem:[%s4699_s1 + $0x268] sm:$0xff] }
  0x4b   :  { %1893 = vmatprep.subr.bf16.mxu0 %v3510_v25  ;;  %1934 = vmatprep.subr.bf16.mxu1 %v3512_v26  ;;  %v122_v24 = vld [vmem:[%s4699_s1 + $0x368] sm:$0xff]  ;;  %v3581_v25 = vcombine.low %v153_v13, %v185_v14  ;;  %v3583_v26 = vcombine.low %v154_v15, %v186_v16  ;;  %v3654_v13 = vcombine.high %v221_v7, %v253_v8  ;;  %v157_v15 = vld [vmem:[%s4699_s1 + $0x480] sm:$0xff] }
  0x4c   :  { %v3520_v28 = vcombine.high %v90_v23, %v122_v24  ;;  %v189_v16 = vld [vmem:[%s4699_s1 + $0x580] sm:$0xff] }
  0x4e   :  { %1894 = vmatpush1.bf16.msra.mxu0 %v3509_v31  ;;  %1935 = vmatpush1.bf16.msra.mxu1 %v3511_v32  ;;  %v26_v31 = vld [vmem:[%s4699_s1 + $0x68] sm:$0xff] }
  0x4f   :  { %1895 = vmatprep.subr.bf16.mxu0 %v3446_v33  ;;  %1936 = vmatprep.subr.bf16.mxu1 %v3448_v34  ;;  %v58_v32 = vld [vmem:[%s4699_s1 + $0x168] sm:$0xff]  ;;  %v3517_v33 = vcombine.low %v89_v21, %v121_v22  ;;  %v3519_v34 = vcombine.low %v90_v23, %v122_v24  ;;  %v3590_v21 = vcombine.high %v157_v15, %v189_v16  ;;  %v93_v23 = vld [vmem:[%s4699_s1 + $0x280] sm:$0xff] }
  0x50   :  { %v3456_v36 = vcombine.high %v26_v31, %v58_v32  ;;  %v125_v24 = vld [vmem:[%s4699_s1 + $0x380] sm:$0xff] }
  0x52   :  { %1896 = vmatpush1.bf16.msra.mxu0 %v3445_v39  ;;  %1937 = vmatpush1.bf16.msra.mxu1 %v3447_v40  ;;  %v220_v39 = vld [vmem:[%s4699_s1 + $0x678] sm:$0xff] }
  0x53   :  { %1971 = vmatprep.subr.bf16.mxu0 %v3642_v41  ;;  %2012 = vmatprep.subr.bf16.mxu1 %v3644_v42  ;;  %v252_v40 = vld [vmem:[%s4699_s1 + $0x778] sm:$0xff]  ;;  %v3453_v41 = vcombine.low %v25_v29, %v57_v30  ;;  %v3455_v42 = vcombine.low %v26_v31, %v58_v32  ;;  %v3526_v29 = vcombine.high %v93_v23, %v125_v24  ;;  %v29_v31 = vld [vmem:[%s4699_s1 + $0x80] sm:$0xff] }
  0x54   :  { %v3652_v45 = vcombine.high %v220_v39, %v252_v40  ;;  %v61_v32 = vld [vmem:[%s4699_s1 + $0x180] sm:$0xff] }
  0x55   :  { %3693 = vmatmul.mubr.msk.bf16.vlgmr.msra.gmra.mxu0 %vm1549_vm0, %v3814_v43  ;;  %3694 = vmatmul.mubr.msk.bf16.vlgmr.msra.gmra.mxu1 %vm1549_vm0, %v3814_v43 }
  0x56   :  { %1972 = vmatpush1.bf16.msra.mxu0 %v3641_v48  ;;  %2013 = vmatpush1.bf16.msra.mxu1 %v3643_v49  ;;  %v156_v48 = vld [vmem:[%s4699_s1 + $0x478] sm:$0xff] }
  0x57   :  { %1973 = vmatprep.subr.bf16.mxu0 %v3578_v50  ;;  %2014 = vmatprep.subr.bf16.mxu1 %v3580_v51  ;;  %v188_v49 = vld [vmem:[%s4699_s1 + $0x578] sm:$0xff]  ;;  %v3649_v50 = vcombine.low %v219_v37, %v251_v38  ;;  %v3651_v51 = vcombine.low %v220_v39, %v252_v40  ;;  %v3462_v37 = vcombine.high %v29_v31, %v61_v32  ;;  %v223_v39 = vld [vmem:[%s4699_s1 + $0x690] sm:$0xff] }
  0x58   :  { %1995 = vmatprep.mubr.bf16.mxu0 %v3720_v3  ;;  %2036 = vmatprep.mubr.bf16.mxu1 %v3720_v3  ;;  %v3588_v53 = vcombine.high %v156_v48, %v188_v49  ;;  %v255_v40 = vld [vmem:[%s4699_s1 + $0x790] sm:$0xff] }
  0x5a   :  { %1974 = vmatpush1.bf16.msra.mxu0 %v3577_v56  ;;  %2015 = vmatpush1.bf16.msra.mxu1 %v3579_v57  ;;  %v92_v56 = vld [vmem:[%s4699_s1 + $0x278] sm:$0xff] }
  0x5b   :  { %1975 = vmatprep.subr.bf16.mxu0 %v3514_v58  ;;  %2016 = vmatprep.subr.bf16.mxu1 %v3516_v59  ;;  %v124_v57 = vld [vmem:[%s4699_s1 + $0x378] sm:$0xff]  ;;  %v3585_v58 = vcombine.low %v155_v46, %v187_v47  ;;  %v3587_v59 = vcombine.low %v156_v48, %v188_v49  ;;  %v3658_v46 = vcombine.high %v223_v39, %v255_v40  ;;  %v159_v48 = vld [vmem:[%s4699_s1 + $0x490] sm:$0xff] }
  0x5c   :  { %v3524_v61 = vcombine.high %v92_v56, %v124_v57  ;;  %v191_v49 = vld [vmem:[%s4699_s1 + $0x590] sm:$0xff] }
  0x5e   :  { %1976 = vmatpush1.bf16.msra.mxu0 %v3513_v0  ;;  %2017 = vmatpush1.bf16.msra.mxu1 %v3515_v1  ;;  %v28_v0 = vld [vmem:[%s4699_s1 + $0x78] sm:$0xff] }
  0x5f   :  { %1977 = vmatprep.subr.bf16.mxu0 %v3450_v2  ;;  %2018 = vmatprep.subr.bf16.mxu1 %v3452_v4  ;;  %v60_v1 = vld [vmem:[%s4699_s1 + $0x178] sm:$0xff]  ;;  %v3521_v2 = vcombine.low %v91_v54, %v123_v55  ;;  %v3523_v4 = vcombine.low %v92_v56, %v124_v57  ;;  %v3594_v54 = vcombine.high %v159_v48, %v191_v49  ;;  %v95_v56 = vld [vmem:[%s4699_s1 + $0x290] sm:$0xff] }
  0x60   :  { %v3460_v6 = vcombine.high %v28_v0, %v60_v1  ;;  %v127_v57 = vld [vmem:[%s4699_s1 + $0x390] sm:$0xff] }
  0x62   :  { %1978 = vmatpush1.bf16.msra.mxu0 %v3449_v9  ;;  %2019 = vmatpush1.bf16.msra.mxu1 %v3451_v10  ;;  %v222_v9 = vld [vmem:[%s4699_s1 + $0x688] sm:$0xff] }
  0x63   :  { %2053 = vmatprep.subr.bf16.mxu0 %v3646_v11  ;;  %2094 = vmatprep.subr.bf16.mxu1 %v3648_v12  ;;  %v254_v10 = vld [vmem:[%s4699_s1 + $0x788] sm:$0xff]  ;;  %v3457_v11 = vcombine.low %v27_v62, %v59_v63  ;;  %v3459_v12 = vcombine.low %v28_v0, %v60_v1  ;;  %v3530_v62 = vcombine.high %v95_v56, %v127_v57  ;;  %v31_v0 = vld [vmem:[%s4699_s1 + $0x90] sm:$0xff] }
  0x64   :  { %v3656_v14 = vcombine.high %v222_v9, %v254_v10  ;;  %v63_v1 = vld [vmem:[%s4699_s1 + $0x190] sm:$0xff] }
  0x65   :  { %3695 = vmatmul.mubr.msk.bf16.vlgmr.msra.gmra.mxu0 %vm1549_vm0, %v3814_v43  ;;  %3696 = vmatmul.mubr.msk.bf16.vlgmr.msra.gmra.mxu1 %vm1549_vm0, %v3814_v43 }
  0x66   :  { %2054 = vmatpush1.bf16.msra.mxu0 %v3645_v17  ;;  %2095 = vmatpush1.bf16.msra.mxu1 %v3647_v18  ;;  %v158_v17 = vld [vmem:[%s4699_s1 + $0x488] sm:$0xff] }
  0x67   :  { %2055 = vmatprep.subr.bf16.mxu0 %v3582_v19  ;;  %2096 = vmatprep.subr.bf16.mxu1 %v3584_v20  ;;  %v190_v18 = vld [vmem:[%s4699_s1 + $0x588] sm:$0xff]  ;;  %v3653_v19 = vcombine.low %v221_v7, %v253_v8  ;;  %v3655_v20 = vcombine.low %v222_v9, %v254_v10  ;;  %v3466_v7 = vcombine.high %v31_v0, %v63_v1  ;;  %v225_v9 = vld [vmem:[%s4699_s1 + $0x6a0] sm:$0xff] }
  0x68   :  { %2077 = vmatprep.mubr.bf16.mxu0 %v3720_v3  ;;  %2118 = vmatprep.mubr.bf16.mxu1 %v3720_v3  ;;  %v3592_v22 = vcombine.high %v158_v17, %v190_v18  ;;  %v257_v10 = vld [vmem:[%s4699_s1 + $0x7a0] sm:$0xff] }
  0x6a   :  { %2056 = vmatpush1.bf16.msra.mxu0 %v3581_v25  ;;  %2097 = vmatpush1.bf16.msra.mxu1 %v3583_v26  ;;  %v94_v25 = vld [vmem:[%s4699_s1 + $0x288] sm:$0xff] }
  0x6b   :  { %2057 = vmatprep.subr.bf16.mxu0 %v3518_v27  ;;  %2098 = vmatprep.subr.bf16.mxu1 %v3520_v28  ;;  %v126_v26 = vld [vmem:[%s4699_s1 + $0x388] sm:$0xff]  ;;  %v3589_v27 = vcombine.low %v157_v15, %v189_v16  ;;  %v3591_v28 = vcombine.low %v158_v17, %v190_v18  ;;  %v3662_v15 = vcombine.high %v225_v9, %v257_v10  ;;  %v161_v17 = vld [vmem:[%s4699_s1 + $0x4a0] sm:$0xff] }
  0x6c   :  { %v3528_v30 = vcombine.high %v94_v25, %v126_v26  ;;  %v193_v18 = vld [vmem:[%s4699_s1 + $0x5a0] sm:$0xff] }
  0x6e   :  { %2058 = vmatpush1.bf16.msra.mxu0 %v3517_v33  ;;  %2099 = vmatpush1.bf16.msra.mxu1 %v3519_v34  ;;  %v30_v33 = vld [vmem:[%s4699_s1 + $0x88] sm:$0xff] }
  0x6f   :  { %2059 = vmatprep.subr.bf16.mxu0 %v3454_v35  ;;  %2100 = vmatprep.subr.bf16.mxu1 %v3456_v36  ;;  %v62_v34 = vld [vmem:[%s4699_s1 + $0x188] sm:$0xff]  ;;  %v3525_v35 = vcombine.low %v93_v23, %v125_v24  ;;  %v3527_v36 = vcombine.low %v94_v25, %v126_v26  ;;  %v3598_v23 = vcombine.high %v161_v17, %v193_v18  ;;  %v97_v25 = vld [vmem:[%s4699_s1 + $0x2a0] sm:$0xff] }
  0x70   :  { %v3464_v38 = vcombine.high %v30_v33, %v62_v34  ;;  %v129_v26 = vld [vmem:[%s4699_s1 + $0x3a0] sm:$0xff] }
  0x72   :  { %2060 = vmatpush1.bf16.msra.mxu0 %v3453_v41  ;;  %2101 = vmatpush1.bf16.msra.mxu1 %v3455_v42  ;;  %v224_v41 = vld [vmem:[%s4699_s1 + $0x698] sm:$0xff] }
  0x73   :  { %2135 = vmatprep.subr.bf16.mxu0 %v3650_v44  ;;  %2176 = vmatprep.subr.bf16.mxu1 %v3652_v45  ;;  %v256_v42 = vld [vmem:[%s4699_s1 + $0x798] sm:$0xff]  ;;  %v3461_v44 = vcombine.low %v29_v31, %v61_v32  ;;  %v3463_v45 = vcombine.low %v30_v33, %v62_v34  ;;  %v3534_v31 = vcombine.high %v97_v25, %v129_v26  ;;  %v33_v33 = vld [vmem:[%s4699_s1 + $0xa0] sm:$0xff] }
  0x74   :  { %v3660_v47 = vcombine.high %v224_v41, %v256_v42  ;;  %v65_v34 = vld [vmem:[%s4699_s1 + $0x1a0] sm:$0xff] }
  0x75   :  { %3697 = vmatmul.mubr.msk.bf16.vlgmr.msra.gmra.mxu0 %vm1549_vm0, %v3814_v43  ;;  %3698 = vmatmul.mubr.msk.bf16.vlgmr.msra.gmra.mxu1 %vm1549_vm0, %v3814_v43 }
  0x76   :  { %2136 = vmatpush1.bf16.msra.mxu0 %v3649_v50  ;;  %2177 = vmatpush1.bf16.msra.mxu1 %v3651_v51  ;;  %v160_v50 = vld [vmem:[%s4699_s1 + $0x498] sm:$0xff] }
  0x77   :  { %2137 = vmatprep.subr.bf16.mxu0 %v3586_v52  ;;  %2178 = vmatprep.subr.bf16.mxu1 %v3588_v53  ;;  %v192_v51 = vld [vmem:[%s4699_s1 + $0x598] sm:$0xff]  ;;  %v3657_v52 = vcombine.low %v223_v39, %v255_v40  ;;  %v3659_v53 = vcombine.low %v224_v41, %v256_v42  ;;  %v227_v40 = vld [vmem:[%s4699_s1 + $0x6b0] sm:$0xff] }
  0x78   :  { %2159 = vmatprep.mubr.bf16.mxu0 %v3720_v3  ;;  %2200 = vmatprep.mubr.bf16.mxu1 %v3720_v3  ;;  %v3596_v55 = vcombine.high %v160_v50, %v192_v51  ;;  %v259_v41 = vld [vmem:[%s4699_s1 + $0x7b0] sm:$0xff]  ;;  %v228_v42 = vld [vmem:[%s4699_s1 + $0x6b8] sm:$0xff] }
  0x7a   :  { %2138 = vmatpush1.bf16.msra.mxu0 %v3585_v58  ;;  %2179 = vmatpush1.bf16.msra.mxu1 %v3587_v59  ;;  %v96_v58 = vld [vmem:[%s4699_s1 + $0x298] sm:$0xff] }
  0x7b   :  { %2139 = vmatprep.subr.bf16.mxu0 %v3522_v60  ;;  %2180 = vmatprep.subr.bf16.mxu1 %v3524_v61  ;;  %v128_v59 = vld [vmem:[%s4699_s1 + $0x398] sm:$0xff]  ;;  %v3593_v60 = vcombine.low %v159_v48, %v191_v49  ;;  %v3595_v61 = vcombine.low %v160_v50, %v192_v51  ;;  %v163_v49 = vld [vmem:[%s4699_s1 + $0x4b0] sm:$0xff] }
  0x7c   :  { %v3532_v63 = vcombine.high %v96_v58, %v128_v59  ;;  %v195_v50 = vld [vmem:[%s4699_s1 + $0x5b0] sm:$0xff]  ;;  %v164_v51 = vld [vmem:[%s4699_s1 + $0x4b8] sm:$0xff] }
  0x7e   :  { %2140 = vmatpush1.bf16.msra.mxu0 %v3521_v2  ;;  %2181 = vmatpush1.bf16.msra.mxu1 %v3523_v4  ;;  %v32_v2 = vld [vmem:[%s4699_s1 + $0x98] sm:$0xff] }
  0x7f   :  { %2141 = vmatprep.subr.bf16.mxu0 %v3458_v5  ;;  %2182 = vmatprep.subr.bf16.mxu1 %v3460_v6  ;;  %v64_v4 = vld [vmem:[%s4699_s1 + $0x198] sm:$0xff]  ;;  %v3529_v5 = vcombine.low %v95_v56, %v127_v57  ;;  %v3531_v6 = vcombine.low %v96_v58, %v128_v59  ;;  %v99_v57 = vld [vmem:[%s4699_s1 + $0x2b0] sm:$0xff]  ;;  %v4365_v59 = vld [vmem:[%s4700_s0] sm:$0x1] }
  0x80   :  { %v3468_v8 = vcombine.high %v32_v2, %v64_v4  ;;  %v131_v58 = vld [vmem:[%s4699_s1 + $0x3b0] sm:$0xff] }
  0x82   :  { %2142 = vmatpush1.bf16.msra.mxu0 %v3457_v11  ;;  %2183 = vmatpush1.bf16.msra.mxu1 %v3459_v12  ;;  %v226_v11 = vld [vmem:[%s4699_s1 + $0x6a8] sm:$0xff] }
  0x83   :  { %2217 = vmatprep.subr.bf16.mxu0 %v3654_v13  ;;  %2258 = vmatprep.subr.bf16.mxu1 %v3656_v14  ;;  %v258_v12 = vld [vmem:[%s4699_s1 + $0x7a8] sm:$0xff]  ;;  %v3465_v13 = vcombine.low %v31_v0, %v63_v1  ;;  %v3467_v14 = vcombine.low %v32_v2, %v64_v4  ;;  %v3538_v0 = vcombine.high %v99_v57, %v131_v58  ;;  %v35_v2 = vld [vmem:[%s4699_s1 + $0xb0] sm:$0xff] }
  0x84   :  { %v3664_v16 = vcombine.high %v226_v11, %v258_v12  ;;  %v67_v4 = vld [vmem:[%s4699_s1 + $0x1b0] sm:$0xff] }
  0x85   :  { %3699 = vmatmul.mubr.msk.bf16.vlgmr.msra.gmra.mxu0 %vm1549_vm0, %v3814_v43  ;;  %3700 = vmatmul.mubr.msk.bf16.vlgmr.msra.gmra.mxu1 %vm1549_vm0, %v3814_v43 }
  0x86   :  { %2218 = vmatpush1.bf16.msra.mxu0 %v3653_v19  ;;  %2259 = vmatpush1.bf16.msra.mxu1 %v3655_v20  ;;  %v162_v19 = vld [vmem:[%s4699_s1 + $0x4a8] sm:$0xff] }
  0x87   :  { %2219 = vmatprep.subr.bf16.mxu0 %v3590_v21  ;;  %2260 = vmatprep.subr.bf16.mxu1 %v3592_v22  ;;  %v194_v20 = vld [vmem:[%s4699_s1 + $0x5a8] sm:$0xff]  ;;  %v3661_v21 = vcombine.low %v225_v9, %v257_v10  ;;  %v3663_v22 = vcombine.low %v226_v11, %v258_v12  ;;  %v3474_v9 = vcombine.high %v35_v2, %v67_v4  ;;  %v229_v11 = vld [vmem:[%s4699_s1 + $0x6c0] sm:$0xff] }
  0x88   :  { %2241 = vmatprep.mubr.bf16.mxu0 %v3720_v3  ;;  %2282 = vmatprep.mubr.bf16.mxu1 %v3720_v3  ;;  %v3600_v24 = vcombine.high %v162_v19, %v194_v20  ;;  %v261_v12 = vld [vmem:[%s4699_s1 + $0x7c0] sm:$0xff] }
  0x8a   :  { %2220 = vmatpush1.bf16.msra.mxu0 %v3589_v27  ;;  %2261 = vmatpush1.bf16.msra.mxu1 %v3591_v28  ;;  %v98_v27 = vld [vmem:[%s4699_s1 + $0x2a8] sm:$0xff] }
  0x8b   :  { %2221 = vmatprep.subr.bf16.mxu0 %v3526_v29  ;;  %2262 = vmatprep.subr.bf16.mxu1 %v3528_v30  ;;  %v130_v28 = vld [vmem:[%s4699_s1 + $0x3a8] sm:$0xff]  ;;  %v3597_v29 = vcombine.low %v161_v17, %v193_v18  ;;  %v3599_v30 = vcombine.low %v162_v19, %v194_v20  ;;  %v3670_v17 = vcombine.high %v229_v11, %v261_v12  ;;  %v165_v19 = vld [vmem:[%s4699_s1 + $0x4c0] sm:$0xff] }
  0x8c   :  { %v3536_v32 = vcombine.high %v98_v27, %v130_v28  ;;  %v197_v20 = vld [vmem:[%s4699_s1 + $0x5c0] sm:$0xff] }
  0x8e   :  { %2222 = vmatpush1.bf16.msra.mxu0 %v3525_v35  ;;  %2263 = vmatpush1.bf16.msra.mxu1 %v3527_v36  ;;  %v66_v35 = vld [vmem:[%s4699_s1 + $0x1a8] sm:$0xff]  ;;  %v3533_v36 = vcombine.low %v97_v25, %v129_v26  ;;  %v3606_v25 = vcombine.high %v165_v19, %v197_v20 }
  0x8f   :  { %2223 = vmatprep.subr.bf16.mxu0 %v3462_v37  ;;  %2264 = vmatprep.subr.bf16.mxu1 %v3464_v38  ;;  %v3535_v37 = vcombine.low %v98_v27, %v130_v28  ;;  %v3470_v38 = vcombine.high %v33_v33, %v65_v34  ;;  %v101_v27 = vld [vmem:[%s4699_s1 + $0x2c0] sm:$0xff] }
  0x90   :  { %v133_v28 = vld [vmem:[%s4699_s1 + $0x3c0] sm:$0xff] }
  0x92   :  { %2224 = vmatpush1.bf16.msra.mxu0 %v3461_v44  ;;  %2265 = vmatpush1.bf16.msra.mxu1 %v3463_v45  ;;  %v260_v44 = vld [vmem:[%s4699_s1 + $0x7b8] sm:$0xff]  ;;  %v3469_v45 = vcombine.low %v33_v33, %v65_v34  ;;  %v3542_v33 = vcombine.high %v101_v27, %v133_v28 }
  0x93   :  { %2299 = vmatprep.subr.bf16.mxu0 %v3658_v46  ;;  %2340 = vmatprep.subr.bf16.mxu1 %v3660_v47  ;;  %v3666_v47 = vcombine.high %v227_v40, %v259_v41  ;;  %v3668_v48 = vcombine.high %v228_v42, %v260_v44 }
  0x95   :  { %3701 = vmatmul.mubr.msk.bf16.vlgmr.msra.gmra.mxu0 %vm1549_vm0, %v3814_v43  ;;  %3702 = vmatmul.mubr.msk.bf16.vlgmr.msra.gmra.mxu1 %vm1549_vm0, %v3814_v43 }
  0x96   :  { %2300 = vmatpush1.bf16.msra.mxu0 %v3657_v52  ;;  %2341 = vmatpush1.bf16.msra.mxu1 %v3659_v53  ;;  %v196_v52 = vld [vmem:[%s4699_s1 + $0x5b8] sm:$0xff]  ;;  %v3665_v53 = vcombine.low %v227_v40, %v259_v41 }
  0x97   :  { %2301 = vmatprep.subr.bf16.mxu0 %v3594_v54  ;;  %2342 = vmatprep.subr.bf16.mxu1 %v3596_v55  ;;  %v3667_v54 = vcombine.low %v228_v42, %v260_v44  ;;  %v3602_v55 = vcombine.high %v163_v49, %v195_v50  ;;  %v3604_v56 = vcombine.high %v164_v51, %v196_v52  ;;  %v231_v42 = vld [vmem:[%s4699_s1 + $0x6d0] sm:$0xff] }
  0x98   :  { %2323 = vmatprep.mubr.bf16.mxu0 %v3720_v3  ;;  %2364 = vmatprep.mubr.bf16.mxu1 %v3720_v3  ;;  %v263_v44 = vld [vmem:[%s4699_s1 + $0x7d0] sm:$0xff] }
  0x9a   :  { %2302 = vmatpush1.bf16.msra.mxu0 %v3593_v60  ;;  %2343 = vmatpush1.bf16.msra.mxu1 %v3595_v61  ;;  %v100_v60 = vld [vmem:[%s4699_s1 + $0x2b8] sm:$0xff] }
  0x9b   :  { %2303 = vmatprep.subr.bf16.mxu0 %v3530_v62  ;;  %2344 = vmatprep.subr.bf16.mxu1 %v3532_v63  ;;  %v132_v61 = vld [vmem:[%s4699_s1 + $0x3b8] sm:$0xff]  ;;  %v3601_v62 = vcombine.low %v163_v49, %v195_v50  ;;  %v3603_v63 = vcombine.low %v164_v51, %v196_v52  ;;  %v3674_v49 = vcombine.high %v231_v42, %v263_v44  ;;  %v167_v51 = vld [vmem:[%s4699_s1 + $0x4d0] sm:$0xff] }
  0x9c   :  { %v3540_v1 = vcombine.high %v100_v60, %v132_v61  ;;  %v199_v52 = vld [vmem:[%s4699_s1 + $0x5d0] sm:$0xff] }
  0x9e   :  { %2304 = vmatpush1.bf16.msra.mxu0 %v3529_v5  ;;  %2345 = vmatpush1.bf16.msra.mxu1 %v3531_v6  ;;  %v36_v5 = vld [vmem:[%s4699_s1 + $0xb8] sm:$0xff] }
  0x9f   :  { %2305 = vmatprep.subr.bf16.mxu0 %v3466_v7  ;;  %2346 = vmatprep.subr.bf16.mxu1 %v3468_v8  ;;  %v68_v6 = vld [vmem:[%s4699_s1 + $0x1b8] sm:$0xff]  ;;  %v3537_v7 = vcombine.low %v99_v57, %v131_v58  ;;  %v3539_v8 = vcombine.low %v100_v60, %v132_v61  ;;  %v3673_v58 = vcombine.low %v231_v42, %v263_v44 }
  0xa0   :  { %v3476_v10 = vcombine.high %v36_v5, %v68_v6  ;;  %v200_v57 = vld [vmem:[%s4699_s1 + $0x5d8] sm:$0xff]  ;;  %v3610_v61 = vcombine.high %v167_v51, %v199_v52 }
  0xa2   :  { %2306 = vmatpush1.bf16.msra.mxu0 %v3465_v13  ;;  %2347 = vmatpush1.bf16.msra.mxu1 %v3467_v14  ;;  %v230_v13 = vld [vmem:[%s4699_s1 + $0x6c8] sm:$0xff] }
  0xa3   :  { %2381 = vmatprep.subr.bf16.mxu0 %v3662_v15  ;;  %2422 = vmatprep.subr.bf16.mxu1 %v3664_v16  ;;  %v262_v14 = vld [vmem:[%s4699_s1 + $0x7c8] sm:$0xff]  ;;  %v3473_v15 = vcombine.low %v35_v2, %v67_v4  ;;  %v3475_v16 = vcombine.low %v36_v5, %v68_v6  ;;  %v104_v5 = vld [vmem:[%s4699_s1 + $0x2d8] sm:$0xff] }
  0xa4   :  { %v3672_v18 = vcombine.high %v230_v13, %v262_v14  ;;  %v136_v6 = vld [vmem:[%s4699_s1 + $0x3d8] sm:$0xff] }
  0xa5   :  { %3703 = vmatmul.mubr.msk.bf16.vlgmr.msra.gmra.mxu0 %vm1549_vm0, %v3814_v43  ;;  %3704 = vmatmul.mubr.msk.bf16.vlgmr.msra.gmra.mxu1 %vm1549_vm0, %v3814_v43  ;;  %v34_v43 = vld [vmem:[%s4699_s1 + $0xa8] sm:$0xff] }
  0xa6   :  { %2382 = vmatpush1.bf16.msra.mxu0 %v3661_v21  ;;  %2423 = vmatpush1.bf16.msra.mxu1 %v3663_v22  ;;  %v3472_v39 = vcombine.high %v34_v43, %v66_v35  ;;  %v3471_v46 = vcombine.low %v34_v43, %v66_v35  ;;  %v166_v21 = vld [vmem:[%s4699_s1 + $0x4c8] sm:$0xff]  ;;  %v37_v43 = vld [vmem:[%s4699_s1 + $0xc0] sm:$0xff] }
  0xa7   :  { %2383 = vmatprep.subr.bf16.mxu0 %v3598_v23  ;;  %2424 = vmatprep.subr.bf16.mxu1 %v3600_v24  ;;  %v198_v22 = vld [vmem:[%s4699_s1 + $0x5c8] sm:$0xff]  ;;  %v3669_v23 = vcombine.low %v229_v11, %v261_v12  ;;  %v3671_v24 = vcombine.low %v230_v13, %v262_v14  ;;  %v69_v35 = vld [vmem:[%s4699_s1 + $0x1c0] sm:$0xff]  ;;  %v39_v14 = vld [vmem:[%s4699_s1 + $0xd0] sm:$0xff] }
  0xa8   :  { %2405 = vmatprep.mubr.bf16.mxu0 %v3720_v3  ;;  %2446 = vmatprep.mubr.bf16.mxu1 %v3720_v3  ;;  %v3608_v26 = vcombine.high %v166_v21, %v198_v22  ;;  %v3478_v40 = vcombine.high %v37_v43, %v69_v35 }
  0xaa   :  { %2384 = vmatpush1.bf16.msra.mxu0 %v3597_v29  ;;  %2425 = vmatpush1.bf16.msra.mxu1 %v3599_v30  ;;  %v102_v29 = vld [vmem:[%s4699_s1 + $0x2c8] sm:$0xff] }
  0xab   :  { %2385 = vmatprep.subr.bf16.mxu0 %v3534_v31  ;;  %2426 = vmatprep.subr.bf16.mxu1 %v3536_v32  ;;  %v134_v30 = vld [vmem:[%s4699_s1 + $0x3c8] sm:$0xff]  ;;  %v3605_v31 = vcombine.low %v165_v19, %v197_v20  ;;  %v3607_v32 = vcombine.low %v166_v21, %v198_v22 }
  0xac   :  { %v3544_v34 = vcombine.high %v102_v29, %v134_v30 }
  0xae   :  { %2386 = vmatpush1.bf16.msra.mxu0 %v3533_v36  ;;  %2427 = vmatpush1.bf16.msra.mxu1 %v3535_v37  ;;  %v38_v36 = vld [vmem:[%s4699_s1 + $0xc8] sm:$0xff] }
  0xaf   :  { %2387 = vmatprep.subr.bf16.mxu0 %v3470_v38  ;;  %2428 = vmatprep.subr.bf16.mxu1 %v3472_v39  ;;  %v70_v37 = vld [vmem:[%s4699_s1 + $0x1c8] sm:$0xff]  ;;  %v3541_v38 = vcombine.low %v101_v27, %v133_v28  ;;  %v3543_v39 = vcombine.low %v102_v29, %v134_v30  ;;  %v3547_v28 = vcombine.low %v104_v5, %v136_v6 }
  0xb0   :  { %v3480_v41 = vcombine.high %v38_v36, %v70_v37 }
  0xb2   :  { %2388 = vmatpush1.bf16.msra.mxu0 %v3469_v45  ;;  %2429 = vmatpush1.bf16.msra.mxu1 %v3471_v46  ;;  %v232_v45 = vld [vmem:[%s4699_s1 + $0x6d8] sm:$0xff] }
  0xb3   :  { %2463 = vmatprep.subr.bf16.mxu0 %v3666_v47  ;;  %2504 = vmatprep.subr.bf16.mxu1 %v3668_v48  ;;  %v264_v46 = vld [vmem:[%s4699_s1 + $0x7d8] sm:$0xff]  ;;  %v3477_v47 = vcombine.low %v37_v43, %v69_v35  ;;  %v3479_v48 = vcombine.low %v38_v36, %v70_v37  ;;  %v233_v36 = vld [vmem:[%s4699_s1 + $0x6e0] sm:$0xff] }
  0xb4   :  { %v3676_v50 = vcombine.high %v232_v45, %v264_v46  ;;  %v3675_v60 = vcombine.low %v232_v45, %v264_v46  ;;  %v265_v37 = vld [vmem:[%s4699_s1 + $0x7e0] sm:$0xff] }
  0xb5   :  { %3705 = vmatmul.mubr.msk.bf16.vlgmr.msra.gmra.mxu0 %vm1549_vm0, %v4365_v59  ;;  %3706 = vmatmul.mubr.msk.bf16.vlgmr.msra.gmra.mxu1 %vm1549_vm0, %v4365_v59  ;;  %v3678_v45 = vcombine.high %v233_v36, %v265_v37 }
  0xb6   :  { %2464 = vmatpush1.bf16.msra.mxu0 %v3665_v53  ;;  %2505 = vmatpush1.bf16.msra.mxu1 %v3667_v54  ;;  %v3721_v53 = vmov 1983009808  }
  0xb7   :  { %2465 = vmatprep.subr.bf16.mxu0 %v3602_v55  ;;  %2506 = vmatprep.subr.bf16.mxu1 %v3604_v56  ;;  %v3124_v54 = vunpack.c.l.s4 %v3721_v53  ;;  %v3126_v55 = vlaneseq  ;;  %v168_v56 = vld [vmem:[%s4699_s1 + $0x4d8] sm:$0xff] }
  0xb8   :  { %2487 = vmatprep.mubr.bf16.mxu0 %v3720_v3  ;;  %2528 = vmatprep.mubr.bf16.mxu1 %v3720_v3  ;;  %v3611_v12 = vcombine.low %v168_v56, %v200_v57 }
  0xb9   :  { %v3125_v2 = vunpack.c.0.s8 %v3124_v54  ;;  %v3127_v4 = vshrl.u32 %v3126_v55, 7 }
  0xba   :  { %2466 = vmatpush1.bf16.msra.mxu0 %v3601_v62  ;;  %2507 = vmatpush1.bf16.msra.mxu1 %v3603_v63  ;;  %v3612_v62 = vcombine.high %v168_v56, %v200_v57  ;;  %v103_v63 = vld [vmem:[%s4699_s1 + $0x2d0] sm:$0xff]  ;;  %v105_v56 = vld [vmem:[%s4699_s1 + $0x2e0] sm:$0xff] }
  0xbb   :  { %2467 = vmatprep.subr.bf16.mxu0 %v3538_v0  ;;  %2508 = vmatprep.subr.bf16.mxu1 %v3540_v1  ;;  %v135_v0 = vld [vmem:[%s4699_s1 + $0x3d0] sm:$0xff]  ;;  %v4492_v19 = vsub.s32 %v3125_v2, %v3127_v4  ;;  %v137_v57 = vld [vmem:[%s4699_s1 + $0x3e0] sm:$0xff] }
  0xbc   :  { %v3546_v13 = vcombine.high %v103_v63, %v135_v0  ;;  %v3545_v22 = vcombine.low %v103_v63, %v135_v0 }
  0xbe   :  { %2468 = vmatpush1.bf16.msra.mxu0 %v3537_v7  ;;  %2509 = vmatpush1.bf16.msra.mxu1 %v3539_v8 }
  0xbf   :  { %2469 = vmatprep.subr.bf16.mxu0 %v3474_v9  ;;  %2510 = vmatprep.subr.bf16.mxu1 %v3476_v10  ;;  %v3609_v9 = vcombine.low %v167_v51, %v199_v52  ;;  %v202_v51 = vld [vmem:[%s4699_s1 + $0x5e8] sm:$0xff]  ;;  %v3677_v52 = vcombine.low %v233_v36, %v265_v37 }
  0xc2   :  { %2470 = vmatpush1.bf16.msra.mxu0 %v3473_v15  ;;  %2511 = vmatpush1.bf16.msra.mxu1 %v3475_v16  ;;  %v71_v15 = vld [vmem:[%s4699_s1 + $0x1d0] sm:$0xff] }
  0xc3   :  { %2545 = vmatprep.subr.bf16.mxu0 %v3670_v17  ;;  %2586 = vmatprep.subr.bf16.mxu1 %v3672_v18  ;;  %v3548_v18 = vcombine.high %v104_v5, %v136_v6  ;;  %v3482_v29 = vcombine.high %v39_v14, %v71_v15  ;;  %v3481_v42 = vcombine.low %v39_v14, %v71_v15  ;;  %v41_v6 = vld [vmem:[%s4699_s1 + $0xe0] sm:$0xff]  ;;  %v42_v14 = vld [vmem:[%s4699_s1 + $0xe8] sm:$0xff] }
  0xc4   :  { %v3550_v5 = vcombine.high %v105_v56, %v137_v57  ;;  %v74_v15 = vld [vmem:[%s4699_s1 + $0x1e8] sm:$0xff] }
  0xc5   :  { %3707 = vmatmul.mubr.msk.bf16.vlgmr.msra.gmra.mxu0 %vm1549_vm0, %v4365_v59  ;;  %3708 = vmatmul.mubr.msk.bf16.vlgmr.msra.gmra.mxu1 %vm1549_vm0, %v4365_v59 }
  0xc6   :  { %2546 = vmatpush1.bf16.msra.mxu0 %v3669_v23  ;;  %2587 = vmatpush1.bf16.msra.mxu1 %v3671_v24  ;;  %v40_v23 = vld [vmem:[%s4699_s1 + $0xd8] sm:$0xff] }
  0xc7   :  { %2547 = vmatprep.subr.bf16.mxu0 %v3606_v25  ;;  %2588 = vmatprep.subr.bf16.mxu1 %v3608_v26  ;;  %v72_v24 = vld [vmem:[%s4699_s1 + $0x1d8] sm:$0xff] }
  0xc8   :  { %2569 = vmatprep.mubr.bf16.mxu0 %v3720_v3  ;;  %2610 = vmatprep.mubr.bf16.mxu1 %v3720_v3  ;;  %v3484_v35 = vcombine.high %v40_v23, %v72_v24  ;;  %v3483_v44 = vcombine.low %v40_v23, %v72_v24 }
  0xca   :  { %2548 = vmatpush1.bf16.msra.mxu0 %v3605_v31  ;;  %2589 = vmatpush1.bf16.msra.mxu1 %v3607_v32 }
  0xcb   :  { %2549 = vmatprep.subr.bf16.mxu0 %v3542_v33  ;;  %2590 = vmatprep.subr.bf16.mxu1 %v3544_v34 }
  0xce   :  { %2550 = vmatpush1.bf16.msra.mxu0 %v3541_v38  ;;  %2591 = vmatpush1.bf16.msra.mxu1 %v3543_v39  ;;  %v234_v39 = vld [vmem:[%s4699_s1 + $0x6e8] sm:$0xff] }
  0xcf   :  { %2551 = vmatprep.subr.bf16.mxu0 %v3478_v40  ;;  %2592 = vmatprep.subr.bf16.mxu1 %v3480_v41  ;;  %v266_v40 = vld [vmem:[%s4699_s1 + $0x7e8] sm:$0xff] }
  0xd0   :  { %v3679_v53 = vcombine.low %v234_v39, %v266_v40 }
  0xd2   :  { %2552 = vmatpush1.bf16.msra.mxu0 %v3477_v47  ;;  %2593 = vmatpush1.bf16.msra.mxu1 %v3479_v48  ;;  %v3680_v47 = vcombine.high %v234_v39, %v266_v40  ;;  %v169_v48 = vld [vmem:[%s4699_s1 + $0x4e0] sm:$0xff]  ;;  %v171_v39 = vld [vmem:[%s4699_s1 + $0x4f0] sm:$0xff] }
  0xd3   :  { %2627 = vmatprep.subr.bf16.mxu0 %v3674_v49  ;;  %2668 = vmatprep.subr.bf16.mxu1 %v3676_v50  ;;  %v201_v49 = vld [vmem:[%s4699_s1 + $0x5e0] sm:$0xff]  ;;  %v170_v50 = vld [vmem:[%s4699_s1 + $0x4e8] sm:$0xff]  ;;  %v203_v40 = vld [vmem:[%s4699_s1 + $0x5f0] sm:$0xff] }
  0xd4   :  { %v3614_v54 = vcombine.high %v169_v48, %v201_v49  ;;  %v3616_v55 = vcombine.high %v170_v50, %v202_v51  ;;  %v3613_v0 = vcombine.low %v169_v48, %v201_v49  ;;  %v3615_v4 = vcombine.low %v170_v50, %v202_v51  ;;  %v107_v48 = vld [vmem:[%s4699_s1 + $0x2f0] sm:$0xff]  ;;  %v108_v51 = vld [vmem:[%s4699_s1 + $0x2f8] sm:$0xff] }
  0xd5   :  { %v1587_v1 = vpop.f32.mrf.mxu0  ;;  %3709 = vmatmul.mubr.msk.bf16.vlgmr.msra.gmra.mxu0 %vm1549_vm0, %v4365_v59  ;;  %v1628_v8 = vpop.f32.mrf.mxu1  ;;  %3710 = vmatmul.mubr.msk.bf16.vlgmr.msra.gmra.mxu1 %vm1549_vm0, %v4365_v59  ;;  %v139_v49 = vld [vmem:[%s4699_s1 + $0x3f0] sm:$0xff] }
  0xd6   :  { %v2929_v7 = vmul.f32 0.2, %v1587_v1  ;;  %2628 = vmatpush1.bf16.msra.mxu0 %v3673_v58  ;;  %vm2865_vm1 = vcmp.ge.f32.partialorder %v1587_v1, 0.0  ;;  %v2931_v10 = vmul.f32 0.2, %v1628_v8  ;;  %2669 = vmatpush1.bf16.msra.mxu1 %v3675_v60  ;;  %vm2867_vm2 = vcmp.ge.f32.partialorder %v1628_v8, 0.0 }
  0xd7   :  { %v1589_v11 = vpop.f32.mrf.mxu0  ;;  %2629 = vmatprep.subr.bf16.mxu0 %v3610_v61  ;;  %v1630_v17 = vpop.f32.mrf.mxu1  ;;  %2670 = vmatprep.subr.bf16.mxu1 %v3612_v62  ;;  %v106_v60 = vld [vmem:[%s4699_s1 + $0x2e8] sm:$0xff] }
  0xd8   :  { %vm2866_vm3 = vcmp.ge.f32.partialorder %v1589_v11, 0.0  ;;  %v2930_v16 = vmul.f32 0.2, %v1589_v11  ;;  %2651 = vmatprep.mubr.bf16.mxu0 %v3720_v3  ;;  %vm2868_vm4 = vcmp.ge.f32.partialorder %v1630_v17, 0.0  ;;  %v2932_v20 = vmul.f32 0.2, %v1630_v17  ;;  %2692 = vmatprep.mubr.bf16.mxu1 %v3720_v3 }
  0xd9   :  { %v1591_v21 = vpop.f32.mrf.mxu0  ;;  %v2993_v25 = vsel %vm2865_vm1, %v1587_v1, %v2929_v7  ;;  %v1632_v27 = vpop.f32.mrf.mxu1  ;;  %v2995_v30 = vsel %vm2867_vm2, %v1628_v8, %v2931_v10  ;;  %v138_v61 = vld [vmem:[%s4699_s1 + $0x3e8] sm:$0xff]  ;;  %v73_v7 = vld [vmem:[%s4699_s1 + $0x1e0] sm:$0xff] }
  0xda   :  { %v2994_v26 = vsel %vm2866_vm3, %v1589_v11, %v2930_v16  ;;  %2630 = vmatpush1.bf16.msra.mxu0 %v3609_v9  ;;  %v2996_v32 = vsel %vm2868_vm4, %v1630_v17, %v2932_v20  ;;  %2671 = vmatpush1.bf16.msra.mxu1 %v3611_v12  ;;  %v3552_v10 = vcombine.high %v106_v60, %v138_v61 }
  0xdb   :  { %v3121_v31 = vcombine.low %v2993_v25, %v2994_v26  ;;  %v1592_v33 = vpop.f32.mrf.mxu0  ;;  %2631 = vmatprep.subr.bf16.mxu0 %v3546_v13  ;;  %v3122_v34 = vcombine.low %v2995_v30, %v2996_v32  ;;  %v1633_v43 = vpop.f32.mrf.mxu1  ;;  %2672 = vmatprep.subr.bf16.mxu1 %v3548_v18  ;;  %v3549_v13 = vcombine.low %v105_v56, %v137_v57  ;;  %v267_v30 = vld [vmem:[%s4699_s1 + $0x7f0] sm:$0xff]  ;;  %v236_v32 = vld [vmem:[%s4699_s1 + $0x6f8] sm:$0xff] }
  0xdc   :  { %v3551_v20 = vcombine.low %v106_v60, %v138_v61  ;;  %v3486_v21 = vcombine.high %v41_v6, %v73_v7  ;;  %v268_v33 = vld [vmem:[%s4699_s1 + $0x7f8] sm:$0xff]  ;;  %v3485_v43 = vcombine.low %v41_v6, %v73_v7  ;;  %v3554_v60 = vcombine.high %v107_v48, %v139_v49  ;;  %v43_v61 = vld [vmem:[%s4699_s1 + $0xf0] sm:$0xff] }
  0xdd   :  { %v3129_v38 = vrot.slane %v3121_v31, %v4492_v19  ;;  %v3136_v41 = vrot.slane %v3122_v34, %v4492_v19  ;;  %v44_v6 = vld [vmem:[%s4699_s1 + $0xf8] sm:$0xff] }
  0xde   :  { %2632 = vmatpush1.bf16.msra.mxu0 %v3545_v22  ;;  %2673 = vmatpush1.bf16.msra.mxu1 %v3547_v28  ;;  %v3488_v28 = vcombine.high %v42_v14, %v74_v15  ;;  %v76_v7 = vld [vmem:[%s4699_s1 + $0x1f8] sm:$0xff] }
  0xdf   :  { %2633 = vmatprep.subr.bf16.mxu0 %v3482_v29  ;;  %v3137_v46 = vcombine.low %v3129_v38, %v3136_v41  ;;  %2674 = vmatprep.subr.bf16.mxu1 %v3484_v35  ;;  %v235_v29 = vld [vmem:[%s4699_s1 + $0x6f0] sm:$0xff]  ;;  %v3487_v35 = vcombine.low %v42_v14, %v74_v15  ;;  %v3684_v38 = vcombine.high %v236_v32, %v268_v33  ;;  %v172_v41 = vld [vmem:[%s4699_s1 + $0x4f8] sm:$0xff] }
  0xe0   :  { %v3682_v36 = vcombine.high %v235_v29, %v267_v30 }
  0xe1   :  { %3409 = vst [vmem:[%s4701_s2] sm:$0xff] %v3137_v46  ;;  %v3618_v46 = vcombine.high %v171_v39, %v203_v40 }
  0xe2   :  { %2634 = vmatpush1.bf16.msra.mxu0 %v3481_v42  ;;  %2675 = vmatpush1.bf16.msra.mxu1 %v3483_v44  ;;  %v204_v42 = vld [vmem:[%s4699_s1 + $0x5f8] sm:$0xff]  ;;  %v3681_v44 = vcombine.low %v235_v29, %v267_v30 }
  0xe3   :  { %2709 = vmatprep.subr.bf16.mxu0 %v3678_v45  ;;  %2750 = vmatprep.subr.bf16.mxu1 %v3680_v47  ;;  %v3683_v45 = vcombine.low %v236_v32, %v268_v33  ;;  %v3620_v47 = vcombine.high %v172_v41, %v204_v42 }
  0xe5   :  { %v1669_v58 = vpop.f32.mrf.mxu0  ;;  %3711 = vmatmul.mubr.msk.bf16.vlgmr.msra.gmra.mxu0 %vm1549_vm0, %v4365_v59  ;;  %v1710_v63 = vpop.f32.mrf.mxu1  ;;  %3712 = vmatmul.mubr.msk.bf16.vlgmr.msra.gmra.mxu1 %vm1549_vm0, %v4365_v59 }
  0xe6   :  { %v2933_v62 = vmul.f32 0.2, %v1669_v58  ;;  %2710 = vmatpush1.bf16.msra.mxu0 %v3677_v52  ;;  %vm2869_vm5 = vcmp.ge.f32.partialorder %v1669_v58, 0.0  ;;  %v2935_v1 = vmul.f32 0.2, %v1710_v63  ;;  %2751 = vmatpush1.bf16.msra.mxu1 %v3679_v53  ;;  %vm2871_vm6 = vcmp.ge.f32.partialorder %v1710_v63, 0.0 }
  0xe7   :  { %v1671_v2 = vpop.f32.mrf.mxu0  ;;  %2711 = vmatprep.subr.bf16.mxu0 %v3614_v54  ;;  %v1712_v9 = vpop.f32.mrf.mxu1  ;;  %2752 = vmatprep.subr.bf16.mxu1 %v3616_v55  ;;  %v140_v52 = vld [vmem:[%s4699_s1 + $0x3f8] sm:$0xff]  ;;  %v3617_v55 = vcombine.low %v171_v39, %v203_v40 }
  0xe8   :  { %vm2870_vm7 = vcmp.ge.f32.partialorder %v1671_v2, 0.0  ;;  %v2934_v8 = vmul.f32 0.2, %v1671_v2  ;;  %2733 = vmatprep.mubr.bf16.mxu0 %v3720_v3  ;;  %vm2872_vm8 = vcmp.ge.f32.partialorder %v1712_v9, 0.0  ;;  %v2936_v11 = vmul.f32 0.2, %v1712_v9  ;;  %2774 = vmatprep.mubr.bf16.mxu1 %v3720_v3 }
  0xe9   :  { %v1673_v12 = vpop.f32.mrf.mxu0  ;;  %v2997_v16 = vsel %vm2869_vm5, %v1669_v58, %v2933_v62  ;;  %v1714_v18 = vpop.f32.mrf.mxu1  ;;  %v2999_v22 = vsel %vm2871_vm6, %v1710_v63, %v2935_v1  ;;  %v3619_v58 = vcombine.low %v172_v41, %v204_v42  ;;  %v75_v62 = vld [vmem:[%s4699_s1 + $0x1f0] sm:$0xff]  ;;  %v3556_v1 = vcombine.high %v108_v51, %v140_v52 }
  0xea   :  { %v2998_v17 = vsel %vm2870_vm7, %v1671_v2, %v2934_v8  ;;  %2712 = vmatpush1.bf16.msra.mxu0 %v3613_v0  ;;  %v3000_v24 = vsel %vm2872_vm8, %v1712_v9, %v2936_v11  ;;  %2753 = vmatpush1.bf16.msra.mxu1 %v3615_v4  ;;  %v3555_v11 = vcombine.low %v108_v51, %v140_v52 }
  0xeb   :  { %v3138_v23 = vcombine.low %v2997_v16, %v2998_v17  ;;  %v1674_v25 = vpop.f32.mrf.mxu0  ;;  %2713 = vmatprep.subr.bf16.mxu0 %v3550_v5  ;;  %v3139_v26 = vcombine.low %v2999_v22, %v3000_v24  ;;  %v1715_v27 = vpop.f32.mrf.mxu1  ;;  %2754 = vmatprep.subr.bf16.mxu1 %v3552_v10  ;;  %v3553_v5 = vcombine.low %v107_v48, %v139_v49 }
  0xec   :  { %v3490_v12 = vcombine.high %v43_v61, %v75_v62  ;;  %v3489_v22 = vcombine.low %v43_v61, %v75_v62 }
  0xed   :  { %v3146_v31 = vrot.slane %v3138_v23, %v4492_v19  ;;  %v3153_v34 = vrot.slane %v3139_v26, %v4492_v19  ;;  %v3491_v23 = vcombine.low %v44_v6, %v76_v7 }
  0xee   :  { %2714 = vmatpush1.bf16.msra.mxu0 %v3549_v13  ;;  %2755 = vmatpush1.bf16.msra.mxu1 %v3551_v20  ;;  %v3492_v20 = vcombine.high %v44_v6, %v76_v7 }
  0xef   :  { %2715 = vmatprep.subr.bf16.mxu0 %v3486_v21  ;;  %v3154_v37 = vcombine.low %v3146_v31, %v3153_v34  ;;  %2756 = vmatprep.subr.bf16.mxu1 %v3488_v28 }
  0xf1   :  { %3410 = vst [vmem:[%s4701_s2 + $0x8] sm:$0xff] %v3154_v37 }
  0xf2   :  { %2716 = vmatpush1.bf16.msra.mxu0 %v3485_v43  ;;  %2757 = vmatpush1.bf16.msra.mxu1 %v3487_v35 }
  0xf3   :  { %2791 = vmatprep.subr.bf16.mxu0 %v3682_v36  ;;  %2832 = vmatprep.subr.bf16.mxu1 %v3684_v38 }
  0xf5   :  { %v1751_v50 = vpop.f32.mrf.mxu0  ;;  %3713 = vmatmul.mubr.msk.bf16.vlgmr.msra.gmra.mxu0 %vm1549_vm0, %v4365_v59  ;;  %v1792_v54 = vpop.f32.mrf.mxu1  ;;  %3714 = vmatmul.mubr.msk.bf16.vlgmr.msra.gmra.mxu1 %vm1549_vm0, %v4365_v59 }
  0xf6   :  { %v2937_v53 = vmul.f32 0.2, %v1751_v50  ;;  %2792 = vmatpush1.bf16.msra.mxu0 %v3681_v44  ;;  %vm2873_vm9 = vcmp.ge.f32.partialorder %v1751_v50, 0.0  ;;  %v2939_v56 = vmul.f32 0.2, %v1792_v54  ;;  %2833 = vmatpush1.bf16.msra.mxu1 %v3683_v45  ;;  %vm2875_vm10 = vcmp.ge.f32.partialorder %v1792_v54, 0.0 }
  0xf7   :  { %v1753_v57 = vpop.f32.mrf.mxu0  ;;  %2793 = vmatprep.subr.bf16.mxu0 %v3618_v46  ;;  %v1794_v0 = vpop.f32.mrf.mxu1  ;;  %2834 = vmatprep.subr.bf16.mxu1 %v3620_v47 }
  0xf8   :  { %vm2874_vm11 = vcmp.ge.f32.partialorder %v1753_v57, 0.0  ;;  %v2938_v63 = vmul.f32 0.2, %v1753_v57  ;;  %2815 = vmatprep.mubr.bf16.mxu0 %v3720_v3  ;;  %vm2876_vm12 = vcmp.ge.f32.partialorder %v1794_v0, 0.0  ;;  %v2940_v2 = vmul.f32 0.2, %v1794_v0  ;;  %2856 = vmatprep.mubr.bf16.mxu1 %v3720_v3 }
  0xf9   :  { %v1755_v4 = vpop.f32.mrf.mxu0  ;;  %v3001_v8 = vsel %vm2873_vm9, %v1751_v50, %v2937_v53  ;;  %v1796_v10 = vpop.f32.mrf.mxu1  ;;  %v3003_v13 = vsel %vm2875_vm10, %v1792_v54, %v2939_v56 }
  0xfa   :  { %v3002_v9 = vsel %vm2874_vm11, %v1753_v57, %v2938_v63  ;;  %2794 = vmatpush1.bf16.msra.mxu0 %v3617_v55  ;;  %v3004_v15 = vsel %vm2876_vm12, %v1794_v0, %v2940_v2  ;;  %2835 = vmatpush1.bf16.msra.mxu1 %v3619_v58 }
  0xfb   :  { %v3155_v14 = vcombine.low %v3001_v8, %v3002_v9  ;;  %v1756_v16 = vpop.f32.mrf.mxu0  ;;  %2795 = vmatprep.subr.bf16.mxu0 %v3554_v60  ;;  %v3156_v17 = vcombine.low %v3003_v13, %v3004_v15  ;;  %v1797_v18 = vpop.f32.mrf.mxu1  ;;  %2836 = vmatprep.subr.bf16.mxu1 %v3556_v1 }
  0xfd   :  { %v3163_v3 = vrot.slane %v3155_v14, %v4492_v19  ;;  %v3170_v21 = vrot.slane %v3156_v17, %v4492_v19 }
  0xfe   :  { %2796 = vmatpush1.bf16.msra.mxu0 %v3553_v5  ;;  %2837 = vmatpush1.bf16.msra.mxu1 %v3555_v11 }
  0xff   :  { %2797 = vmatprep.subr.bf16.mxu0 %v3490_v12  ;;  %v3171_v24 = vcombine.low %v3163_v3, %v3170_v21  ;;  %2838 = vmatprep.subr.bf16.mxu1 %v3492_v20 }
 0x101   :  { %3411 = vst [vmem:[%s4701_s2 + $0x10] sm:$0xff] %v3171_v24 }
 0x102   :  { %2798 = vmatpush1.bf16.msra.mxu0 %v3489_v22  ;;  %2839 = vmatpush1.bf16.msra.mxu1 %v3491_v23 }
 0x105   :  { %v1833_v25 = vpop.f32.mrf.mxu0  ;;  %3715 = vmatmul.mubr.msk.bf16.vlgmr.msra.gmra.mxu0 %vm1549_vm0, %v4365_v59  ;;  %v1874_v27 = vpop.f32.mrf.mxu1  ;;  %3716 = vmatmul.mubr.msk.bf16.vlgmr.msra.gmra.mxu1 %vm1549_vm0, %v4365_v59 }
 0x106   :  { %v2941_v26 = vmul.f32 0.2, %v1833_v25  ;;  %vm2877_vm13 = vcmp.ge.f32.partialorder %v1833_v25, 0.0  ;;  %v2943_v28 = vmul.f32 0.2, %v1874_v27  ;;  %vm2879_vm14 = vcmp.ge.f32.partialorder %v1874_v27, 0.0 }
 0x107   :  { %v1835_v29 = vpop.f32.mrf.mxu0  ;;  %v1876_v31 = vpop.f32.mrf.mxu1 }
 0x108   :  { %vm2878_vm15 = vcmp.ge.f32.partialorder %v1835_v29, 0.0  ;;  %v2942_v30 = vmul.f32 0.2, %v1835_v29  ;;  %vm2880_vm1 = vcmp.ge.f32.partialorder %v1876_v31, 0.0  ;;  %v2944_v32 = vmul.f32 0.2, %v1876_v31 }
 0x109   :  { %v1837_v33 = vpop.f32.mrf.mxu0  ;;  %v3005_v34 = vsel %vm2877_vm13, %v1833_v25, %v2941_v26  ;;  %v1878_v35 = vpop.f32.mrf.mxu1  ;;  %v3007_v36 = vsel %vm2879_vm14, %v1874_v27, %v2943_v28 }
 0x10a   :  { %v3006_v43 = vsel %vm2878_vm15, %v1835_v29, %v2942_v30  ;;  %v3008_v38 = vsel %vm2880_vm1, %v1876_v31, %v2944_v32 }
 0x10b   :  { %v3172_v37 = vcombine.low %v3005_v34, %v3006_v43  ;;  %v1838_v39 = vpop.f32.mrf.mxu0  ;;  %v3173_v40 = vcombine.low %v3007_v36, %v3008_v38  ;;  %v1879_v41 = vpop.f32.mrf.mxu1 }
 0x10d   :  { %v3180_v59 = vrot.slane %v3172_v37, %v4492_v19  ;;  %v3187_v42 = vrot.slane %v3173_v40, %v4492_v19 }
 0x10f   :  { %v3188_v44 = vcombine.low %v3180_v59, %v3187_v42 }
 0x111   :  { %3412 = vst [vmem:[%s4701_s2 + $0x18] sm:$0xff] %v3188_v44 }
 0x115   :  { %v1915_v45 = vpop.f32.mrf.mxu0  ;;  %v1956_v47 = vpop.f32.mrf.mxu1 }
 0x116   :  { %v2945_v46 = vmul.f32 0.2, %v1915_v45  ;;  %vm2881_vm0 = vcmp.ge.f32.partialorder %v1915_v45, 0.0  ;;  %v2947_v48 = vmul.f32 0.2, %v1956_v47  ;;  %vm2883_vm2 = vcmp.ge.f32.partialorder %v1956_v47, 0.0 }
 0x117   :  { %v1917_v49 = vpop.f32.mrf.mxu0  ;;  %v1958_v51 = vpop.f32.mrf.mxu1 }
 0x118   :  { %vm2882_vm3 = vcmp.ge.f32.partialorder %v1917_v49, 0.0  ;;  %v2946_v50 = vmul.f32 0.2, %v1917_v49  ;;  %vm2884_vm4 = vcmp.ge.f32.partialorder %v1958_v51, 0.0  ;;  %v2948_v52 = vmul.f32 0.2, %v1958_v51 }
 0x119   :  { %v1919_v53 = vpop.f32.mrf.mxu0  ;;  %v3009_v54 = vsel %vm2881_vm0, %v1915_v45, %v2945_v46  ;;  %v1960_v56 = vpop.f32.mrf.mxu1  ;;  %v3011_v57 = vsel %vm2883_vm2, %v1956_v47, %v2947_v48 }
 0x11a   :  { %v3010_v55 = vsel %vm2882_vm3, %v1917_v49, %v2946_v50  ;;  %v3012_v60 = vsel %vm2884_vm4, %v1958_v51, %v2948_v52 }
 0x11b   :  { %v3189_v58 = vcombine.low %v3009_v54, %v3010_v55  ;;  %v1920_v61 = vpop.f32.mrf.mxu0  ;;  %v3190_v62 = vcombine.low %v3011_v57, %v3012_v60  ;;  %v1961_v63 = vpop.f32.mrf.mxu1 }
 0x11d   :  { %v3197_v0 = vrot.slane %v3189_v58, %v4492_v19  ;;  %v3204_v1 = vrot.slane %v3190_v62, %v4492_v19 }
 0x11f   :  { %v3205_v2 = vcombine.low %v3197_v0, %v3204_v1 }
 0x121   :  { %3413 = vst [vmem:[%s4701_s2 + $0x20] sm:$0xff] %v3205_v2 }
 0x125   :  { %v1997_v4 = vpop.f32.mrf.mxu0  ;;  %v2038_v6 = vpop.f32.mrf.mxu1 }
 0x126   :  { %v2949_v5 = vmul.f32 0.2, %v1997_v4  ;;  %vm2885_vm5 = vcmp.ge.f32.partialorder %v1997_v4, 0.0  ;;  %v2951_v7 = vmul.f32 0.2, %v2038_v6  ;;  %vm2887_vm6 = vcmp.ge.f32.partialorder %v2038_v6, 0.0 }
 0x127   :  { %v1999_v8 = vpop.f32.mrf.mxu0  ;;  %v2040_v10 = vpop.f32.mrf.mxu1 }
 0x128   :  { %vm2886_vm7 = vcmp.ge.f32.partialorder %v1999_v8, 0.0  ;;  %v2950_v9 = vmul.f32 0.2, %v1999_v8  ;;  %vm2888_vm8 = vcmp.ge.f32.partialorder %v2040_v10, 0.0  ;;  %v2952_v11 = vmul.f32 0.2, %v2040_v10 }
 0x129   :  { %v2001_v12 = vpop.f32.mrf.mxu0  ;;  %v3013_v13 = vsel %vm2885_vm5, %v1997_v4, %v2949_v5  ;;  %v2042_v15 = vpop.f32.mrf.mxu1  ;;  %v3015_v16 = vsel %vm2887_vm6, %v2038_v6, %v2951_v7 }
 0x12a   :  { %v3014_v14 = vsel %vm2886_vm7, %v1999_v8, %v2950_v9  ;;  %v3016_v18 = vsel %vm2888_vm8, %v2040_v10, %v2952_v11 }
 0x12b   :  { %v3206_v17 = vcombine.low %v3013_v13, %v3014_v14  ;;  %v2002_v20 = vpop.f32.mrf.mxu0  ;;  %v3207_v3 = vcombine.low %v3015_v16, %v3016_v18  ;;  %v2043_v21 = vpop.f32.mrf.mxu1 }
 0x12d   :  { %v3214_v22 = vrot.slane %v3206_v17, %v4492_v19  ;;  %v3221_v23 = vrot.slane %v3207_v3, %v4492_v19 }
 0x12f   :  { %v3222_v24 = vcombine.low %v3214_v22, %v3221_v23 }
 0x131   :  { %3414 = vst [vmem:[%s4701_s2 + $0x28] sm:$0xff] %v3222_v24 }
 0x135   :  { %v2079_v25 = vpop.f32.mrf.mxu0  ;;  %v2120_v27 = vpop.f32.mrf.mxu1 }
 0x136   :  { %v2953_v26 = vmul.f32 0.2, %v2079_v25  ;;  %vm2889_vm9 = vcmp.ge.f32.partialorder %v2079_v25, 0.0  ;;  %v2955_v28 = vmul.f32 0.2, %v2120_v27  ;;  %vm2891_vm10 = vcmp.ge.f32.partialorder %v2120_v27, 0.0 }
 0x137   :  { %v2081_v29 = vpop.f32.mrf.mxu0  ;;  %v2122_v31 = vpop.f32.mrf.mxu1 }
 0x138   :  { %vm2890_vm11 = vcmp.ge.f32.partialorder %v2081_v29, 0.0  ;;  %v2954_v30 = vmul.f32 0.2, %v2081_v29  ;;  %vm2892_vm12 = vcmp.ge.f32.partialorder %v2122_v31, 0.0  ;;  %v2956_v32 = vmul.f32 0.2, %v2122_v31 }
 0x139   :  { %v2083_v33 = vpop.f32.mrf.mxu0  ;;  %v3017_v34 = vsel %vm2889_vm9, %v2079_v25, %v2953_v26  ;;  %v2124_v35 = vpop.f32.mrf.mxu1  ;;  %v3019_v36 = vsel %vm2891_vm10, %v2120_v27, %v2955_v28 }
 0x13a   :  { %v3018_v43 = vsel %vm2890_vm11, %v2081_v29, %v2954_v30  ;;  %v3020_v38 = vsel %vm2892_vm12, %v2122_v31, %v2956_v32 }
 0x13b   :  { %v3223_v37 = vcombine.low %v3017_v34, %v3018_v43  ;;  %v2084_v39 = vpop.f32.mrf.mxu0  ;;  %v3224_v40 = vcombine.low %v3019_v36, %v3020_v38  ;;  %v2125_v41 = vpop.f32.mrf.mxu1 }
 0x13d   :  { %v3231_v59 = vrot.slane %v3223_v37, %v4492_v19  ;;  %v3238_v42 = vrot.slane %v3224_v40, %v4492_v19 }
 0x13f   :  { %v3239_v44 = vcombine.low %v3231_v59, %v3238_v42 }
 0x141   :  { %3415 = vst [vmem:[%s4701_s2 + $0x30] sm:$0xff] %v3239_v44 }
 0x145   :  { %v2161_v45 = vpop.f32.mrf.mxu0  ;;  %v2202_v47 = vpop.f32.mrf.mxu1 }
 0x146   :  { %v2957_v46 = vmul.f32 0.2, %v2161_v45  ;;  %vm2893_vm13 = vcmp.ge.f32.partialorder %v2161_v45, 0.0  ;;  %v2959_v48 = vmul.f32 0.2, %v2202_v47  ;;  %vm2895_vm14 = vcmp.ge.f32.partialorder %v2202_v47, 0.0 }
 0x147   :  { %v2163_v49 = vpop.f32.mrf.mxu0  ;;  %v2204_v51 = vpop.f32.mrf.mxu1 }
 0x148   :  { %vm2894_vm15 = vcmp.ge.f32.partialorder %v2163_v49, 0.0  ;;  %v2958_v50 = vmul.f32 0.2, %v2163_v49  ;;  %vm2896_vm1 = vcmp.ge.f32.partialorder %v2204_v51, 0.0  ;;  %v2960_v52 = vmul.f32 0.2, %v2204_v51 }
 0x149   :  { %v2165_v53 = vpop.f32.mrf.mxu0  ;;  %v3021_v54 = vsel %vm2893_vm13, %v2161_v45, %v2957_v46  ;;  %v2206_v56 = vpop.f32.mrf.mxu1  ;;  %v3023_v57 = vsel %vm2895_vm14, %v2202_v47, %v2959_v48 }
 0x14a   :  { %v3022_v55 = vsel %vm2894_vm15, %v2163_v49, %v2958_v50  ;;  %v3024_v60 = vsel %vm2896_vm1, %v2204_v51, %v2960_v52 }
 0x14b   :  { %v3240_v58 = vcombine.low %v3021_v54, %v3022_v55  ;;  %v2166_v61 = vpop.f32.mrf.mxu0  ;;  %v3241_v62 = vcombine.low %v3023_v57, %v3024_v60  ;;  %v2207_v63 = vpop.f32.mrf.mxu1 }
 0x14d   :  { %v3248_v0 = vrot.slane %v3240_v58, %v4492_v19  ;;  %v3255_v1 = vrot.slane %v3241_v62, %v4492_v19 }
 0x14f   :  { %v3256_v2 = vcombine.low %v3248_v0, %v3255_v1 }
 0x151   :  { %3416 = vst [vmem:[%s4701_s2 + $0x38] sm:$0xff] %v3256_v2 }
 0x155   :  { %v2243_v4 = vpop.f32.mrf.mxu0  ;;  %v2284_v6 = vpop.f32.mrf.mxu1 }
 0x156   :  { %v2961_v5 = vmul.f32 0.2, %v2243_v4  ;;  %vm2897_vm0 = vcmp.ge.f32.partialorder %v2243_v4, 0.0  ;;  %v2963_v7 = vmul.f32 0.2, %v2284_v6  ;;  %vm2899_vm2 = vcmp.ge.f32.partialorder %v2284_v6, 0.0 }
 0x157   :  { %v2245_v8 = vpop.f32.mrf.mxu0  ;;  %v2286_v10 = vpop.f32.mrf.mxu1 }
 0x158   :  { %vm2898_vm3 = vcmp.ge.f32.partialorder %v2245_v8, 0.0  ;;  %v2962_v9 = vmul.f32 0.2, %v2245_v8  ;;  %vm2900_vm4 = vcmp.ge.f32.partialorder %v2286_v10, 0.0  ;;  %v2964_v11 = vmul.f32 0.2, %v2286_v10 }
 0x159   :  { %v2247_v12 = vpop.f32.mrf.mxu0  ;;  %v3025_v13 = vsel %vm2897_vm0, %v2243_v4, %v2961_v5  ;;  %v2288_v15 = vpop.f32.mrf.mxu1  ;;  %v3027_v16 = vsel %vm2899_vm2, %v2284_v6, %v2963_v7 }
 0x15a   :  { %v3026_v14 = vsel %vm2898_vm3, %v2245_v8, %v2962_v9  ;;  %v3028_v18 = vsel %vm2900_vm4, %v2286_v10, %v2964_v11 }
 0x15b   :  { %v3257_v17 = vcombine.low %v3025_v13, %v3026_v14  ;;  %v2248_v20 = vpop.f32.mrf.mxu0  ;;  %v3258_v3 = vcombine.low %v3027_v16, %v3028_v18  ;;  %v2289_v21 = vpop.f32.mrf.mxu1 }
 0x15d   :  { %v3265_v22 = vrot.slane %v3257_v17, %v4492_v19  ;;  %v3272_v23 = vrot.slane %v3258_v3, %v4492_v19 }
 0x15f   :  { %v3273_v24 = vcombine.low %v3265_v22, %v3272_v23 }
 0x161   :  { %3417 = vst [vmem:[%s4701_s2 + $0x40] sm:$0xff] %v3273_v24 }
 0x165   :  { %v2325_v25 = vpop.f32.mrf.mxu0  ;;  %v2366_v27 = vpop.f32.mrf.mxu1 }
 0x166   :  { %v2965_v26 = vmul.f32 0.2, %v2325_v25  ;;  %vm2901_vm5 = vcmp.ge.f32.partialorder %v2325_v25, 0.0  ;;  %v2967_v28 = vmul.f32 0.2, %v2366_v27  ;;  %vm2903_vm6 = vcmp.ge.f32.partialorder %v2366_v27, 0.0 }
 0x167   :  { %v2327_v29 = vpop.f32.mrf.mxu0  ;;  %v2368_v31 = vpop.f32.mrf.mxu1 }
 0x168   :  { %vm2902_vm7 = vcmp.ge.f32.partialorder %v2327_v29, 0.0  ;;  %v2966_v30 = vmul.f32 0.2, %v2327_v29  ;;  %vm2904_vm8 = vcmp.ge.f32.partialorder %v2368_v31, 0.0  ;;  %v2968_v32 = vmul.f32 0.2, %v2368_v31 }
 0x169   :  { %v2329_v33 = vpop.f32.mrf.mxu0  ;;  %v3029_v34 = vsel %vm2901_vm5, %v2325_v25, %v2965_v26  ;;  %v2370_v35 = vpop.f32.mrf.mxu1  ;;  %v3031_v36 = vsel %vm2903_vm6, %v2366_v27, %v2967_v28 }
 0x16a   :  { %v3030_v43 = vsel %vm2902_vm7, %v2327_v29, %v2966_v30  ;;  %v3032_v38 = vsel %vm2904_vm8, %v2368_v31, %v2968_v32 }
 0x16b   :  { %v3274_v37 = vcombine.low %v3029_v34, %v3030_v43  ;;  %v2330_v39 = vpop.f32.mrf.mxu0  ;;  %v3275_v40 = vcombine.low %v3031_v36, %v3032_v38  ;;  %v2371_v41 = vpop.f32.mrf.mxu1 }
 0x16d   :  { %v3282_v59 = vrot.slane %v3274_v37, %v4492_v19  ;;  %v3289_v42 = vrot.slane %v3275_v40, %v4492_v19 }
 0x16f   :  { %v3290_v44 = vcombine.low %v3282_v59, %v3289_v42 }
 0x171   :  { %3418 = vst [vmem:[%s4701_s2 + $0x48] sm:$0xff] %v3290_v44 }
 0x175   :  { %v2407_v45 = vpop.f32.mrf.mxu0  ;;  %v2448_v47 = vpop.f32.mrf.mxu1 }
 0x176   :  { %v2969_v46 = vmul.f32 0.2, %v2407_v45  ;;  %vm2905_vm9 = vcmp.ge.f32.partialorder %v2407_v45, 0.0  ;;  %v2971_v48 = vmul.f32 0.2, %v2448_v47  ;;  %vm2907_vm10 = vcmp.ge.f32.partialorder %v2448_v47, 0.0 }
 0x177   :  { %v2409_v49 = vpop.f32.mrf.mxu0  ;;  %v2450_v51 = vpop.f32.mrf.mxu1 }
 0x178   :  { %vm2906_vm11 = vcmp.ge.f32.partialorder %v2409_v49, 0.0  ;;  %v2970_v50 = vmul.f32 0.2, %v2409_v49  ;;  %vm2908_vm12 = vcmp.ge.f32.partialorder %v2450_v51, 0.0  ;;  %v2972_v52 = vmul.f32 0.2, %v2450_v51 }
 0x179   :  { %v2411_v53 = vpop.f32.mrf.mxu0  ;;  %v3033_v54 = vsel %vm2905_vm9, %v2407_v45, %v2969_v46  ;;  %v2452_v56 = vpop.f32.mrf.mxu1  ;;  %v3035_v57 = vsel %vm2907_vm10, %v2448_v47, %v2971_v48 }
 0x17a   :  { %v3034_v55 = vsel %vm2906_vm11, %v2409_v49, %v2970_v50  ;;  %v3036_v60 = vsel %vm2908_vm12, %v2450_v51, %v2972_v52 }
 0x17b   :  { %v3291_v58 = vcombine.low %v3033_v54, %v3034_v55  ;;  %v2412_v61 = vpop.f32.mrf.mxu0  ;;  %v3292_v62 = vcombine.low %v3035_v57, %v3036_v60  ;;  %v2453_v63 = vpop.f32.mrf.mxu1 }
 0x17d   :  { %v3299_v0 = vrot.slane %v3291_v58, %v4492_v19  ;;  %v3306_v1 = vrot.slane %v3292_v62, %v4492_v19 }
 0x17f   :  { %v3307_v2 = vcombine.low %v3299_v0, %v3306_v1 }
 0x181   :  { %3419 = vst [vmem:[%s4701_s2 + $0x50] sm:$0xff] %v3307_v2 }
 0x185   :  { %v2489_v4 = vpop.f32.mrf.mxu0  ;;  %v2530_v6 = vpop.f32.mrf.mxu1 }
 0x186   :  { %v2973_v5 = vmul.f32 0.2, %v2489_v4  ;;  %vm2909_vm13 = vcmp.ge.f32.partialorder %v2489_v4, 0.0  ;;  %v2975_v7 = vmul.f32 0.2, %v2530_v6  ;;  %vm2911_vm14 = vcmp.ge.f32.partialorder %v2530_v6, 0.0 }
 0x187   :  { %v2491_v8 = vpop.f32.mrf.mxu0  ;;  %v2532_v10 = vpop.f32.mrf.mxu1 }
 0x188   :  { %vm2910_vm15 = vcmp.ge.f32.partialorder %v2491_v8, 0.0  ;;  %v2974_v9 = vmul.f32 0.2, %v2491_v8  ;;  %vm2912_vm1 = vcmp.ge.f32.partialorder %v2532_v10, 0.0  ;;  %v2976_v11 = vmul.f32 0.2, %v2532_v10 }
 0x189   :  { %v2493_v12 = vpop.f32.mrf.mxu0  ;;  %v3037_v13 = vsel %vm2909_vm13, %v2489_v4, %v2973_v5  ;;  %v2534_v15 = vpop.f32.mrf.mxu1  ;;  %v3039_v16 = vsel %vm2911_vm14, %v2530_v6, %v2975_v7 }
 0x18a   :  { %v3038_v14 = vsel %vm2910_vm15, %v2491_v8, %v2974_v9  ;;  %v3040_v18 = vsel %vm2912_vm1, %v2532_v10, %v2976_v11 }
 0x18b   :  { %v3308_v17 = vcombine.low %v3037_v13, %v3038_v14  ;;  %v2494_v20 = vpop.f32.mrf.mxu0  ;;  %v3309_v3 = vcombine.low %v3039_v16, %v3040_v18  ;;  %v2535_v21 = vpop.f32.mrf.mxu1 }
 0x18d   :  { %v3316_v22 = vrot.slane %v3308_v17, %v4492_v19  ;;  %v3323_v23 = vrot.slane %v3309_v3, %v4492_v19 }
 0x18f   :  { %v3324_v24 = vcombine.low %v3316_v22, %v3323_v23 }
 0x191   :  { %3420 = vst [vmem:[%s4701_s2 + $0x58] sm:$0xff] %v3324_v24 }
 0x195   :  { %v2571_v25 = vpop.f32.mrf.mxu0  ;;  %v2612_v27 = vpop.f32.mrf.mxu1 }
 0x196   :  { %v2977_v26 = vmul.f32 0.2, %v2571_v25  ;;  %vm2913_vm0 = vcmp.ge.f32.partialorder %v2571_v25, 0.0  ;;  %v2979_v28 = vmul.f32 0.2, %v2612_v27  ;;  %vm2915_vm2 = vcmp.ge.f32.partialorder %v2612_v27, 0.0 }
 0x197   :  { %v2573_v29 = vpop.f32.mrf.mxu0  ;;  %v2614_v31 = vpop.f32.mrf.mxu1 }
 0x198   :  { %vm2914_vm3 = vcmp.ge.f32.partialorder %v2573_v29, 0.0  ;;  %v2978_v30 = vmul.f32 0.2, %v2573_v29  ;;  %vm2916_vm4 = vcmp.ge.f32.partialorder %v2614_v31, 0.0  ;;  %v2980_v32 = vmul.f32 0.2, %v2614_v31 }
 0x199   :  { %v2575_v33 = vpop.f32.mrf.mxu0  ;;  %v3041_v34 = vsel %vm2913_vm0, %v2571_v25, %v2977_v26  ;;  %v2616_v35 = vpop.f32.mrf.mxu1  ;;  %v3043_v36 = vsel %vm2915_vm2, %v2612_v27, %v2979_v28 }
 0x19a   :  { %v3042_v43 = vsel %vm2914_vm3, %v2573_v29, %v2978_v30  ;;  %v3044_v38 = vsel %vm2916_vm4, %v2614_v31, %v2980_v32 }
 0x19b   :  { %v3325_v37 = vcombine.low %v3041_v34, %v3042_v43  ;;  %v2576_v39 = vpop.f32.mrf.mxu0  ;;  %v3326_v40 = vcombine.low %v3043_v36, %v3044_v38  ;;  %v2617_v41 = vpop.f32.mrf.mxu1 }
 0x19d   :  { %v3333_v59 = vrot.slane %v3325_v37, %v4492_v19  ;;  %v3340_v42 = vrot.slane %v3326_v40, %v4492_v19 }
 0x19f   :  { %v3341_v44 = vcombine.low %v3333_v59, %v3340_v42 }
 0x1a1   :  { %3421 = vst [vmem:[%s4701_s2 + $0x60] sm:$0xff] %v3341_v44 }
 0x1a5   :  { %v2653_v45 = vpop.f32.mrf.mxu0  ;;  %v2694_v47 = vpop.f32.mrf.mxu1 }
 0x1a6   :  { %v2981_v46 = vmul.f32 0.2, %v2653_v45  ;;  %vm2917_vm5 = vcmp.ge.f32.partialorder %v2653_v45, 0.0  ;;  %v2983_v48 = vmul.f32 0.2, %v2694_v47  ;;  %vm2919_vm6 = vcmp.ge.f32.partialorder %v2694_v47, 0.0 }
 0x1a7   :  { %v2655_v49 = vpop.f32.mrf.mxu0  ;;  %v2696_v51 = vpop.f32.mrf.mxu1 }
 0x1a8   :  { %vm2918_vm7 = vcmp.ge.f32.partialorder %v2655_v49, 0.0  ;;  %v2982_v50 = vmul.f32 0.2, %v2655_v49  ;;  %vm2920_vm8 = vcmp.ge.f32.partialorder %v2696_v51, 0.0  ;;  %v2984_v52 = vmul.f32 0.2, %v2696_v51 }
 0x1a9   :  { %v2657_v53 = vpop.f32.mrf.mxu0  ;;  %v3045_v54 = vsel %vm2917_vm5, %v2653_v45, %v2981_v46  ;;  %v2698_v56 = vpop.f32.mrf.mxu1  ;;  %v3047_v57 = vsel %vm2919_vm6, %v2694_v47, %v2983_v48 }
 0x1aa   :  { %v3046_v55 = vsel %vm2918_vm7, %v2655_v49, %v2982_v50  ;;  %v3048_v60 = vsel %vm2920_vm8, %v2696_v51, %v2984_v52 }
 0x1ab   :  { %v3342_v58 = vcombine.low %v3045_v54, %v3046_v55  ;;  %v2658_v61 = vpop.f32.mrf.mxu0  ;;  %v3343_v62 = vcombine.low %v3047_v57, %v3048_v60  ;;  %v2699_v63 = vpop.f32.mrf.mxu1 }
 0x1ad   :  { %v3350_v0 = vrot.slane %v3342_v58, %v4492_v19  ;;  %v3357_v1 = vrot.slane %v3343_v62, %v4492_v19 }
 0x1af   :  { %v3358_v2 = vcombine.low %v3350_v0, %v3357_v1 }
 0x1b1   :  { %3422 = vst [vmem:[%s4701_s2 + $0x68] sm:$0xff] %v3358_v2 }
 0x1b5   :  { %v2735_v4 = vpop.f32.mrf.mxu0  ;;  %v2776_v6 = vpop.f32.mrf.mxu1 }
 0x1b6   :  { %v2985_v5 = vmul.f32 0.2, %v2735_v4  ;;  %vm2921_vm9 = vcmp.ge.f32.partialorder %v2735_v4, 0.0  ;;  %v2987_v7 = vmul.f32 0.2, %v2776_v6  ;;  %vm2923_vm10 = vcmp.ge.f32.partialorder %v2776_v6, 0.0 }
 0x1b7   :  { %v2737_v8 = vpop.f32.mrf.mxu0  ;;  %v2778_v10 = vpop.f32.mrf.mxu1 }
 0x1b8   :  { %vm2922_vm11 = vcmp.ge.f32.partialorder %v2737_v8, 0.0  ;;  %v2986_v9 = vmul.f32 0.2, %v2737_v8  ;;  %vm2924_vm12 = vcmp.ge.f32.partialorder %v2778_v10, 0.0  ;;  %v2988_v11 = vmul.f32 0.2, %v2778_v10 }
 0x1b9   :  { %v2739_v12 = vpop.f32.mrf.mxu0  ;;  %v3049_v13 = vsel %vm2921_vm9, %v2735_v4, %v2985_v5  ;;  %v2780_v15 = vpop.f32.mrf.mxu1  ;;  %v3051_v16 = vsel %vm2923_vm10, %v2776_v6, %v2987_v7 }
 0x1ba   :  { %v3050_v14 = vsel %vm2922_vm11, %v2737_v8, %v2986_v9  ;;  %v3052_v18 = vsel %vm2924_vm12, %v2778_v10, %v2988_v11 }
 0x1bb   :  { %v3359_v17 = vcombine.low %v3049_v13, %v3050_v14  ;;  %v2740_v20 = vpop.f32.mrf.mxu0  ;;  %v3360_v3 = vcombine.low %v3051_v16, %v3052_v18  ;;  %v2781_v21 = vpop.f32.mrf.mxu1 }
 0x1bd   :  { %v3367_v22 = vrot.slane %v3359_v17, %v4492_v19  ;;  %v3374_v23 = vrot.slane %v3360_v3, %v4492_v19 }
 0x1bf   :  { %v3375_v24 = vcombine.low %v3367_v22, %v3374_v23 }
 0x1c1   :  { %3423 = vst [vmem:[%s4701_s2 + $0x70] sm:$0xff] %v3375_v24 }
 0x1c5   :  { %v2817_v25 = vpop.f32.mrf.mxu0  ;;  %v2858_v27 = vpop.f32.mrf.mxu1 }
 0x1c6   :  { %v2989_v26 = vmul.f32 0.2, %v2817_v25  ;;  %vm2925_vm13 = vcmp.ge.f32.partialorder %v2817_v25, 0.0  ;;  %v2991_v28 = vmul.f32 0.2, %v2858_v27  ;;  %vm2927_vm14 = vcmp.ge.f32.partialorder %v2858_v27, 0.0 }
 0x1c7   :  { %v2819_v29 = vpop.f32.mrf.mxu0  ;;  %v2860_v31 = vpop.f32.mrf.mxu1 }
 0x1c8   :  { %vm2926_vm15 = vcmp.ge.f32.partialorder %v2819_v29, 0.0  ;;  %v2990_v30 = vmul.f32 0.2, %v2819_v29  ;;  %vm2928_vm1 = vcmp.ge.f32.partialorder %v2860_v31, 0.0  ;;  %v2992_v32 = vmul.f32 0.2, %v2860_v31 }
 0x1c9   :  { %v2821_v33 = vpop.f32.mrf.mxu0  ;;  %v3053_v34 = vsel %vm2925_vm13, %v2817_v25, %v2989_v26  ;;  %v2862_v35 = vpop.f32.mrf.mxu1  ;;  %v3055_v36 = vsel %vm2927_vm14, %v2858_v27, %v2991_v28 }
 0x1ca   :  { %v3054_v43 = vsel %vm2926_vm15, %v2819_v29, %v2990_v30  ;;  %v3056_v38 = vsel %vm2928_vm1, %v2860_v31, %v2992_v32 }
 0x1cb   :  { %v3376_v37 = vcombine.low %v3053_v34, %v3054_v43  ;;  %v2822_v39 = vpop.f32.mrf.mxu0  ;;  %v3377_v40 = vcombine.low %v3055_v36, %v3056_v38  ;;  %v2863_v41 = vpop.f32.mrf.mxu1 }
 0x1cd   :  { %v3384_v59 = vrot.slane %v3376_v37, %v4492_v19  ;;  %v3391_v42 = vrot.slane %v3377_v40, %v4492_v19 }
 0x1cf   :  { %v3392_v44 = vcombine.low %v3384_v59, %v3391_v42 }
 0x1d1   :  { %3424 = vst [vmem:[%s4701_s2 + $0x78] sm:$0xff] %v3392_v44 }

// kernel: encoder_forward.6
= control target key start
LH: loop header
LB: loop body
LE: loop exit
PB: predicated region body
PF: predicated region fallthrough
CT: control target
= control target key end

     0   :  { %v742_v3 = vmov 0   ;;  %vm561_vm0 = vcmask 1043456   ;;  %s1023_s1 = inlined_call_operand.vmem [shape: bf16[128,1024], index: 1, kind: input, shape index: {}]   ;;  %s1024_s0 = inlined_call_operand.vmem [shape: bf16[4,128], index: 0, kind: input, shape index: {}]   ;;  %s1025_s2 = inlined_call_operand.vmem [shape: f32[4,1024], index: 2, kind: output, shape index: {}]  }
   0x1   :  { %v69_v0 = vld [vmem:[%s1023_s1 + $0x1c0] sm:$0xff]  ;;  %v70_v2 = vld [vmem:[%s1023_s1 + $0x1c8] sm:$0xff]  ;;  %429 = vmatprep.mubr.bf16.mxu0 %v742_v3  ;;  %470 = vmatprep.mubr.bf16.mxu1 %v742_v3  ;;  %v71_v63 = vld [vmem:[%s1023_s1 + $0x1d0] sm:$0xff] }
   0x2   :  { %v73_v1 = vld [vmem:[%s1023_s1 + $0x1e0] sm:$0xff]  ;;  %v74_v5 = vld [vmem:[%s1023_s1 + $0x1e8] sm:$0xff] }
   0x3   :  { %v732_v4 = vcombine.high %v69_v0, %v73_v1  ;;  %v731_v6 = vcombine.low %v69_v0, %v73_v1  ;;  %v61_v7 = vld [vmem:[%s1023_s1 + $0x180] sm:$0xff]  ;;  %v734_v9 = vcombine.high %v70_v2, %v74_v5  ;;  %v733_v10 = vcombine.low %v70_v2, %v74_v5  ;;  %v62_v12 = vld [vmem:[%s1023_s1 + $0x188] sm:$0xff]  ;;  %v75_v0 = vld [vmem:[%s1023_s1 + $0x1f0] sm:$0xff] }
   0x4   :  { %v65_v8 = vld [vmem:[%s1023_s1 + $0x1a0] sm:$0xff]  ;;  %v66_v13 = vld [vmem:[%s1023_s1 + $0x1a8] sm:$0xff]  ;;  %v72_v1 = vld [vmem:[%s1023_s1 + $0x1d8] sm:$0xff] }
   0x5   :  { %v724_v11 = vcombine.high %v61_v7, %v65_v8  ;;  %v53_v14 = vld [vmem:[%s1023_s1 + $0x140] sm:$0xff]  ;;  %397 = vmatprep.subr.bf16.mxu0 %v732_v4  ;;  %v726_v15 = vcombine.high %v62_v12, %v66_v13  ;;  %v54_v17 = vld [vmem:[%s1023_s1 + $0x148] sm:$0xff]  ;;  %438 = vmatprep.subr.bf16.mxu1 %v734_v9  ;;  %v723_v19 = vcombine.low %v61_v7, %v65_v8  ;;  %v76_v2 = vld [vmem:[%s1023_s1 + $0x1f8] sm:$0xff] }
   0x6   :  { %v57_v16 = vld [vmem:[%s1023_s1 + $0x160] sm:$0xff]  ;;  %v58_v18 = vld [vmem:[%s1023_s1 + $0x168] sm:$0xff]  ;;  %398 = vmatpush1.bf16.msra.mxu0 %v731_v6  ;;  %439 = vmatpush1.bf16.msra.mxu1 %v733_v10  ;;  %v725_v20 = vcombine.low %v62_v12, %v66_v13  ;;  %v736_v6 = vcombine.high %v71_v63, %v75_v0  ;;  %v738_v7 = vcombine.high %v72_v1, %v76_v2  ;;  %v63_v8 = vld [vmem:[%s1023_s1 + $0x190] sm:$0xff] }
   0x7   :  { %399 = vmatprep.subr.bf16.mxu0 %v724_v11  ;;  %v716_v21 = vcombine.high %v53_v14, %v57_v16  ;;  %440 = vmatprep.subr.bf16.mxu1 %v726_v15  ;;  %v718_v22 = vcombine.high %v54_v17, %v58_v18  ;;  %v45_v23 = vld [vmem:[%s1023_s1 + $0x100] sm:$0xff]  ;;  %v46_v25 = vld [vmem:[%s1023_s1 + $0x108] sm:$0xff]  ;;  %v715_v27 = vcombine.low %v53_v14, %v57_v16  ;;  %v67_v9 = vld [vmem:[%s1023_s1 + $0x1b0] sm:$0xff] }
   0x8   :  { %v49_v24 = vld [vmem:[%s1023_s1 + $0x120] sm:$0xff]  ;;  %v50_v26 = vld [vmem:[%s1023_s1 + $0x128] sm:$0xff]  ;;  %v717_v28 = vcombine.low %v54_v17, %v58_v18  ;;  %v64_v10 = vld [vmem:[%s1023_s1 + $0x198] sm:$0xff]  ;;  %v735_v13 = vcombine.low %v71_v63, %v75_v0  ;;  %v737_v14 = vcombine.low %v72_v1, %v76_v2  ;;  %v728_v15 = vcombine.high %v63_v8, %v67_v9 }
   0x9   :  { %v708_v29 = vcombine.high %v45_v23, %v49_v24  ;;  %v710_v30 = vcombine.high %v46_v25, %v50_v26  ;;  %v37_v31 = vld [vmem:[%s1023_s1 + $0xc0] sm:$0xff]  ;;  %v38_v33 = vld [vmem:[%s1023_s1 + $0xc8] sm:$0xff]  ;;  %v707_v35 = vcombine.low %v45_v23, %v49_v24  ;;  %v709_v36 = vcombine.low %v46_v25, %v50_v26  ;;  %v68_v11 = vld [vmem:[%s1023_s1 + $0x1b8] sm:$0xff] }
   0xa   :  { %400 = vmatpush1.bf16.msra.mxu0 %v723_v19  ;;  %441 = vmatpush1.bf16.msra.mxu1 %v725_v20  ;;  %v41_v32 = vld [vmem:[%s1023_s1 + $0xe0] sm:$0xff]  ;;  %v42_v34 = vld [vmem:[%s1023_s1 + $0xe8] sm:$0xff]  ;;  %v730_v16 = vcombine.high %v64_v10, %v68_v11  ;;  %v55_v17 = vld [vmem:[%s1023_s1 + $0x150] sm:$0xff] }
   0xb   :  { %401 = vmatprep.subr.bf16.mxu0 %v716_v21  ;;  %442 = vmatprep.subr.bf16.mxu1 %v718_v22  ;;  %v700_v37 = vcombine.high %v37_v31, %v41_v32  ;;  %v702_v38 = vcombine.high %v38_v33, %v42_v34  ;;  %v29_v39 = vld [vmem:[%s1023_s1 + $0x80] sm:$0xff]  ;;  %v30_v41 = vld [vmem:[%s1023_s1 + $0x88] sm:$0xff]  ;;  %v699_v43 = vcombine.low %v37_v31, %v41_v32  ;;  %v59_v18 = vld [vmem:[%s1023_s1 + $0x170] sm:$0xff] }
   0xc   :  { %v33_v40 = vld [vmem:[%s1023_s1 + $0xa0] sm:$0xff]  ;;  %v34_v42 = vld [vmem:[%s1023_s1 + $0xa8] sm:$0xff]  ;;  %v701_v44 = vcombine.low %v38_v33, %v42_v34  ;;  %v56_v19 = vld [vmem:[%s1023_s1 + $0x158] sm:$0xff]  ;;  %v727_v21 = vcombine.low %v63_v8, %v67_v9  ;;  %v729_v22 = vcombine.low %v64_v10, %v68_v11  ;;  %v720_v23 = vcombine.high %v55_v17, %v59_v18 }
   0xd   :  { %v692_v45 = vcombine.high %v29_v39, %v33_v40  ;;  %v694_v46 = vcombine.high %v30_v41, %v34_v42  ;;  %v21_v47 = vld [vmem:[%s1023_s1 + $0x40] sm:$0xff]  ;;  %v22_v49 = vld [vmem:[%s1023_s1 + $0x48] sm:$0xff]  ;;  %v691_v51 = vcombine.low %v29_v39, %v33_v40  ;;  %v693_v52 = vcombine.low %v30_v41, %v34_v42  ;;  %v60_v20 = vld [vmem:[%s1023_s1 + $0x178] sm:$0xff] }
   0xe   :  { %402 = vmatpush1.bf16.msra.mxu0 %v715_v27  ;;  %443 = vmatpush1.bf16.msra.mxu1 %v717_v28  ;;  %v25_v48 = vld [vmem:[%s1023_s1 + $0x60] sm:$0xff]  ;;  %v26_v50 = vld [vmem:[%s1023_s1 + $0x68] sm:$0xff]  ;;  %v722_v24 = vcombine.high %v56_v19, %v60_v20  ;;  %v47_v25 = vld [vmem:[%s1023_s1 + $0x110] sm:$0xff] }
   0xf   :  { %403 = vmatprep.subr.bf16.mxu0 %v708_v29  ;;  %444 = vmatprep.subr.bf16.mxu1 %v710_v30  ;;  %v684_v53 = vcombine.high %v21_v47, %v25_v48  ;;  %v686_v54 = vcombine.high %v22_v49, %v26_v50  ;;  %v13_v55 = vld [vmem:[%s1023_s1] sm:$0xff]  ;;  %v14_v57 = vld [vmem:[%s1023_s1 + $0x8] sm:$0xff]  ;;  %v683_v59 = vcombine.low %v21_v47, %v25_v48  ;;  %v51_v26 = vld [vmem:[%s1023_s1 + $0x130] sm:$0xff] }
  0x10   :  { %v17_v56 = vld [vmem:[%s1023_s1 + $0x20] sm:$0xff]  ;;  %v18_v58 = vld [vmem:[%s1023_s1 + $0x28] sm:$0xff]  ;;  %v685_v60 = vcombine.low %v22_v49, %v26_v50  ;;  %v48_v27 = vld [vmem:[%s1023_s1 + $0x118] sm:$0xff]  ;;  %v719_v29 = vcombine.low %v55_v17, %v59_v18  ;;  %v721_v30 = vcombine.low %v56_v19, %v60_v20  ;;  %v712_v31 = vcombine.high %v47_v25, %v51_v26 }
  0x11   :  { %v676_v61 = vcombine.high %v13_v55, %v17_v56  ;;  %v678_v62 = vcombine.high %v14_v57, %v18_v58  ;;  %v675_v4 = vcombine.low %v13_v55, %v17_v56  ;;  %v677_v5 = vcombine.low %v14_v57, %v18_v58  ;;  %v883_v12 = vld [vmem:[%s1024_s0] sm:$0x3]  ;;  %v52_v28 = vld [vmem:[%s1023_s1 + $0x138] sm:$0xff]  ;;  %v39_v33 = vld [vmem:[%s1023_s1 + $0xd0] sm:$0xff] }
  0x12   :  { %404 = vmatpush1.bf16.msra.mxu0 %v707_v35  ;;  %445 = vmatpush1.bf16.msra.mxu1 %v709_v36  ;;  %v714_v32 = vcombine.high %v48_v27, %v52_v28  ;;  %v43_v34 = vld [vmem:[%s1023_s1 + $0xf0] sm:$0xff]  ;;  %v44_v35 = vld [vmem:[%s1023_s1 + $0xf8] sm:$0xff]  ;;  %v711_v36 = vcombine.low %v47_v25, %v51_v26 }
  0x13   :  { %405 = vmatprep.subr.bf16.mxu0 %v700_v37  ;;  %446 = vmatprep.subr.bf16.mxu1 %v702_v38  ;;  %v713_v37 = vcombine.low %v48_v27, %v52_v28  ;;  %v704_v38 = vcombine.high %v39_v33, %v43_v34  ;;  %v31_v40 = vld [vmem:[%s1023_s1 + $0x90] sm:$0xff]  ;;  %v32_v42 = vld [vmem:[%s1023_s1 + $0x98] sm:$0xff] }
  0x14   :  { %v35_v41 = vld [vmem:[%s1023_s1 + $0xb0] sm:$0xff]  ;;  %v24_v50 = vld [vmem:[%s1023_s1 + $0x58] sm:$0xff] }
  0x15   :  { %v23_v48 = vld [vmem:[%s1023_s1 + $0x50] sm:$0xff]  ;;  %v16_v58 = vld [vmem:[%s1023_s1 + $0x18] sm:$0xff] }
  0x16   :  { %406 = vmatpush1.bf16.msra.mxu0 %v699_v43  ;;  %447 = vmatpush1.bf16.msra.mxu1 %v701_v44  ;;  %v36_v43 = vld [vmem:[%s1023_s1 + $0xb8] sm:$0xff]  ;;  %v703_v44 = vcombine.low %v39_v33, %v43_v34  ;;  %v27_v49 = vld [vmem:[%s1023_s1 + $0x70] sm:$0xff] }
  0x17   :  { %407 = vmatprep.subr.bf16.mxu0 %v692_v45  ;;  %448 = vmatprep.subr.bf16.mxu1 %v694_v46  ;;  %v696_v46 = vcombine.high %v31_v40, %v35_v41  ;;  %v698_v47 = vcombine.high %v32_v42, %v36_v43  ;;  %v15_v56 = vld [vmem:[%s1023_s1 + $0x10] sm:$0xff] }
  0x18   :  { %v19_v57 = vld [vmem:[%s1023_s1 + $0x30] sm:$0xff] }
  0x19   :  { %v679_v0 = vcombine.low %v15_v56, %v19_v57 }
  0x1a   :  { %408 = vmatpush1.bf16.msra.mxu0 %v691_v51  ;;  %449 = vmatpush1.bf16.msra.mxu1 %v693_v52  ;;  %v28_v51 = vld [vmem:[%s1023_s1 + $0x78] sm:$0xff]  ;;  %v695_v52 = vcombine.low %v31_v40, %v35_v41 }
  0x1b   :  { %409 = vmatprep.subr.bf16.mxu0 %v684_v53  ;;  %450 = vmatprep.subr.bf16.mxu1 %v686_v54  ;;  %v697_v53 = vcombine.low %v32_v42, %v36_v43  ;;  %v688_v54 = vcombine.high %v23_v48, %v27_v49  ;;  %v690_v55 = vcombine.high %v24_v50, %v28_v51 }
  0x1e   :  { %410 = vmatpush1.bf16.msra.mxu0 %v683_v59  ;;  %451 = vmatpush1.bf16.msra.mxu1 %v685_v60  ;;  %v20_v59 = vld [vmem:[%s1023_s1 + $0x38] sm:$0xff]  ;;  %v687_v60 = vcombine.low %v23_v48, %v27_v49 }
  0x1f   :  { %411 = vmatprep.subr.bf16.mxu0 %v676_v61  ;;  %452 = vmatprep.subr.bf16.mxu1 %v678_v62  ;;  %v689_v61 = vcombine.low %v24_v50, %v28_v51  ;;  %v680_v62 = vcombine.high %v15_v56, %v19_v57  ;;  %v682_v63 = vcombine.high %v16_v58, %v20_v59 }
  0x20   :  { %v681_v1 = vcombine.low %v16_v58, %v20_v59 }
  0x22   :  { %412 = vmatpush1.bf16.msra.mxu0 %v675_v4  ;;  %453 = vmatpush1.bf16.msra.mxu1 %v677_v5 }
  0x23   :  { %479 = vmatprep.subr.bf16.mxu0 %v736_v6  ;;  %520 = vmatprep.subr.bf16.mxu1 %v738_v7 }
  0x25   :  { %430 = vmatmul.mubr.bf16.vlgmr.msra.gmra.mxu0 %v883_v12  ;;  %471 = vmatmul.mubr.bf16.vlgmr.msra.gmra.mxu1 %v883_v12 }
  0x26   :  { %480 = vmatpush1.bf16.msra.mxu0 %v735_v13  ;;  %521 = vmatpush1.bf16.msra.mxu1 %v737_v14 }
  0x27   :  { %481 = vmatprep.subr.bf16.mxu0 %v728_v15  ;;  %522 = vmatprep.subr.bf16.mxu1 %v730_v16 }
  0x28   :  { %511 = vmatprep.mubr.bf16.mxu0 %v742_v3  ;;  %552 = vmatprep.mubr.bf16.mxu1 %v742_v3  ;;  %v40_v3 = vld [vmem:[%s1023_s1 + $0xd8] sm:$0xff] }
  0x29   :  { %v706_v39 = vcombine.high %v40_v3, %v44_v35  ;;  %v705_v45 = vcombine.low %v40_v3, %v44_v35 }
  0x2a   :  { %482 = vmatpush1.bf16.msra.mxu0 %v727_v21  ;;  %523 = vmatpush1.bf16.msra.mxu1 %v729_v22 }
  0x2b   :  { %483 = vmatprep.subr.bf16.mxu0 %v720_v23  ;;  %524 = vmatprep.subr.bf16.mxu1 %v722_v24 }
  0x2e   :  { %484 = vmatpush1.bf16.msra.mxu0 %v719_v29  ;;  %525 = vmatpush1.bf16.msra.mxu1 %v721_v30 }
  0x2f   :  { %485 = vmatprep.subr.bf16.mxu0 %v712_v31  ;;  %526 = vmatprep.subr.bf16.mxu1 %v714_v32 }
  0x32   :  { %486 = vmatpush1.bf16.msra.mxu0 %v711_v36  ;;  %527 = vmatpush1.bf16.msra.mxu1 %v713_v37 }
  0x33   :  { %487 = vmatprep.subr.bf16.mxu0 %v704_v38  ;;  %528 = vmatprep.subr.bf16.mxu1 %v706_v39 }
  0x36   :  { %488 = vmatpush1.bf16.msra.mxu0 %v703_v44  ;;  %529 = vmatpush1.bf16.msra.mxu1 %v705_v45 }
  0x37   :  { %489 = vmatprep.subr.bf16.mxu0 %v696_v46  ;;  %530 = vmatprep.subr.bf16.mxu1 %v698_v47 }
  0x3a   :  { %490 = vmatpush1.bf16.msra.mxu0 %v695_v52  ;;  %531 = vmatpush1.bf16.msra.mxu1 %v697_v53 }
  0x3b   :  { %491 = vmatprep.subr.bf16.mxu0 %v688_v54  ;;  %532 = vmatprep.subr.bf16.mxu1 %v690_v55 }
  0x3e   :  { %492 = vmatpush1.bf16.msra.mxu0 %v687_v60  ;;  %533 = vmatpush1.bf16.msra.mxu1 %v689_v61 }
  0x3f   :  { %493 = vmatprep.subr.bf16.mxu0 %v680_v62  ;;  %534 = vmatprep.subr.bf16.mxu1 %v682_v63 }
  0x42   :  { %494 = vmatpush1.bf16.msra.mxu0 %v679_v0  ;;  %535 = vmatpush1.bf16.msra.mxu1 %v681_v1 }
  0x45   :  { %512 = vmatmul.mubr.bf16.vlgmr.msra.gmra.mxu0 %v883_v12  ;;  %553 = vmatmul.mubr.bf16.vlgmr.msra.gmra.mxu1 %v883_v12 }
  0xe5   :  { %v963_v2 = vpop.f32.mrf.mxu0  ;;  %v965_v4 = vpop.f32.mrf.mxu1 }
  0xe6   :  { %v580_v11 = vmul.f32 %v963_v2, %v963_v2  ;;  %v562_v12 = vsel %vm561_vm0, %v963_v2, 0.0  ;;  %v582_v16 = vmul.f32 %v965_v4, %v965_v4  ;;  %v565_v19 = vsel %vm561_vm0, %v965_v4, 0.0 }
  0xe7   :  { %v967_v5 = vpop.f32.mrf.mxu0  ;;  %v969_v6 = vpop.f32.mrf.mxu1 }
  0xe8   :  { %v581_v13 = vmul.f32 %v967_v5, %v967_v5  ;;  %v563_v14 = vsel %vm561_vm0, %v967_v5, 0.0  ;;  %v588_v15 = vsel %vm561_vm0, %v580_v11, 0.0  ;;  %v591_v21 = vsel %vm561_vm0, %v582_v16, 0.0 }
  0xe9   :  { %v435_v7 = vpop.f32.mrf.mxu0  ;;  %v476_v8 = vpop.f32.mrf.mxu1  ;;  %v564_v18 = vadd.f32 %v563_v14, %v562_v12  ;;  %v583_v22 = vmul.f32 %v969_v6, %v969_v6  ;;  %v567_v24 = vsel %vm561_vm0, %v969_v6, 0.0 }
  0xea   :  { %v589_v17 = vsel %vm561_vm0, %v581_v13, 0.0 }
  0xeb   :  { %v436_v9 = vpop.f32.mrf.mxu0  ;;  %v477_v10 = vpop.f32.mrf.mxu1  ;;  %v590_v20 = vadd.f32 %v589_v17, %v588_v15  ;;  %v566_v23 = vadd.f32 %v565_v19, %v564_v18  ;;  %v593_v26 = vsel %vm561_vm0, %v583_v22, 0.0 }
  0xed   :  { %v592_v25 = vadd.f32 %v591_v21, %v590_v20  ;;  %v568_v27 = vadd.f32 %v567_v24, %v566_v23 }
  0xef   :  { %v594_v32 = vadd.f32 %v593_v26, %v592_v25 }
 0x105   :  { %v513_v28 = vpop.f32.mrf.mxu0  ;;  %v554_v31 = vpop.f32.mrf.mxu1 }
 0x106   :  { %v569_v29 = vsel %vm561_vm0, %v513_v28, 0.0  ;;  %v584_v30 = vmul.f32 %v513_v28, %v513_v28  ;;  %v586_v34 = vmul.f32 %v554_v31, %v554_v31  ;;  %v573_v39 = vsel %vm561_vm0, %v554_v31, 0.0 }
 0x107   :  { %v570_v33 = vadd.f32 %v569_v29, %v568_v27  ;;  %v515_v3 = vpop.f32.mrf.mxu0  ;;  %v556_v38 = vpop.f32.mrf.mxu1 }
 0x108   :  { %v595_v35 = vsel %vm561_vm0, %v584_v30, 0.0  ;;  %v571_v36 = vsel %vm561_vm0, %v515_v3, 0.0  ;;  %v585_v37 = vmul.f32 %v515_v3, %v515_v3  ;;  %v599_v45 = vsel %vm561_vm0, %v586_v34, 0.0 }
 0x109   :  { %v596_v40 = vadd.f32 %v595_v35, %v594_v32  ;;  %v517_v41 = vpop.f32.mrf.mxu0  ;;  %v572_v42 = vadd.f32 %v571_v36, %v570_v33  ;;  %v558_v44 = vpop.f32.mrf.mxu1  ;;  %v587_v49 = vmul.f32 %v556_v38, %v556_v38  ;;  %v575_v51 = vsel %vm561_vm0, %v556_v38, 0.0 }
 0x10a   :  { %v597_v43 = vsel %vm561_vm0, %v585_v37, 0.0 }
 0x10b   :  { %v518_v46 = vpop.f32.mrf.mxu0  ;;  %v574_v47 = vadd.f32 %v573_v39, %v572_v42  ;;  %v598_v48 = vadd.f32 %v597_v43, %v596_v40  ;;  %v559_v50 = vpop.f32.mrf.mxu1  ;;  %v601_v54 = vsel %vm561_vm0, %v587_v49, 0.0 }
 0x10d   :  { %v576_v52 = vadd.f32 %v575_v51, %v574_v47  ;;  %v600_v53 = vadd.f32 %v599_v45, %v598_v48 }
 0x10f   :  { %577 = vadd.xlane.f32.xlu0 %v576_v52  ;;  %v602_v55 = vadd.f32 %v601_v54, %v600_v53 }
 0x113   :  { %603 = vadd.xlane.f32.xlu0 %v602_v55 }
 0x198   :  { %v578_v56 = vpop.xlane.xlu0 %577 }
 0x199   :  { %v579_v57 = vmul.f32 0.0009765625, %v578_v56 }
 0x19b   :  { %v606_v59 = vmul.f32 %v579_v57, %v579_v57  ;;  %v609_v0 = vsub.f32 %v963_v2, %v579_v57  ;;  %v610_v1 = vsub.f32 %v967_v5, %v579_v57  ;;  %v611_v7 = vsub.f32 %v965_v4, %v579_v57 }
 0x19c   :  { %v604_v58 = vpop.xlane.xlu0 %603  ;;  %v612_v8 = vsub.f32 %v969_v6, %v579_v57  ;;  %v613_v10 = vsub.f32 %v513_v28, %v579_v57  ;;  %v614_v11 = vsub.f32 %v515_v3, %v579_v57  ;;  %v615_v13 = vsub.f32 %v554_v31, %v579_v57 }
 0x19d   :  { %v605_v60 = vmul.f32 0.0009765625, %v604_v58  ;;  %v616_v12 = vsub.f32 %v556_v38, %v579_v57 }
 0x19f   :  { %v607_v61 = vsub.f32 %v605_v60, %v606_v59 }
 0x1a1   :  { %v608_v62 = vmax.f32 %v607_v61, 0.0 }
 0x1a3   :  { %v617_v63 = vadd.f32 1e-05, %v608_v62 }
 0x1a5   :  { %740 = vrsqrt.f32 %v617_v63 }
 0x1b2   :  { %v741_v9 = vpop.eup %740 }
 0x1b3   :  { %v619_v14 = vmul.f32 %v741_v9, %v609_v0  ;;  %v620_v15 = vmul.f32 %v741_v9, %v610_v1  ;;  %v621_v16 = vmul.f32 %v741_v9, %v611_v7  ;;  %v622_v17 = vmul.f32 %v741_v9, %v612_v8 }
 0x1b4   :  { %v623_v18 = vmul.f32 %v741_v9, %v613_v10  ;;  %v624_v19 = vmul.f32 %v741_v9, %v614_v11  ;;  %v625_v20 = vmul.f32 %v741_v9, %v615_v13  ;;  %v626_v21 = vmul.f32 %v741_v9, %v616_v12 }
 0x1b5   :  { %vm627_vm1 = vcmp.ge.f32.partialorder %v619_v14, 0.0  ;;  %vm628_vm2 = vcmp.ge.f32.partialorder %v620_v15, 0.0  ;;  %vm629_vm3 = vcmp.ge.f32.partialorder %v621_v16, 0.0  ;;  %vm630_vm4 = vcmp.ge.f32.partialorder %v622_v17, 0.0 }
 0x1b6   :  { %vm631_vm5 = vcmp.ge.f32.partialorder %v623_v18, 0.0  ;;  %vm632_vm6 = vcmp.ge.f32.partialorder %v624_v19, 0.0  ;;  %vm633_vm7 = vcmp.ge.f32.partialorder %v625_v20, 0.0  ;;  %vm634_vm8 = vcmp.ge.f32.partialorder %v626_v21, 0.0 }
 0x1b7   :  { %v635_v2 = vmul.f32 0.2, %v619_v14  ;;  %v636_v4 = vmul.f32 0.2, %v620_v15  ;;  %v637_v5 = vmul.f32 0.2, %v621_v16 }
 0x1b8   :  { %v638_v6 = vmul.f32 0.2, %v622_v17  ;;  %v639_v22 = vmul.f32 0.2, %v623_v18  ;;  %v640_v23 = vmul.f32 0.2, %v624_v19 }
 0x1b9   :  { %v641_v24 = vmul.f32 0.2, %v625_v20  ;;  %v642_v25 = vmul.f32 0.2, %v626_v21  ;;  %v643_v26 = vsel %vm627_vm1, %v619_v14, %v635_v2  ;;  %v644_v27 = vsel %vm628_vm2, %v620_v15, %v636_v4 }
 0x1ba   :  { %v645_v28 = vsel %vm629_vm3, %v621_v16, %v637_v5  ;;  %v646_v29 = vsel %vm630_vm4, %v622_v17, %v638_v6  ;;  %v647_v30 = vsel %vm631_vm5, %v623_v18, %v639_v22  ;;  %v648_v31 = vsel %vm632_vm6, %v624_v19, %v640_v23 }
 0x1bb   :  { %v649_v32 = vsel %vm633_vm7, %v625_v20, %v641_v24  ;;  %v650_v33 = vsel %vm634_vm8, %v626_v21, %v642_v25  ;;  %v659_v34 = vcombine.low %v643_v26, %v644_v27  ;;  %v660_v3 = vcombine.low %v645_v28, %v646_v29 }
 0x1bc   :  { %v661_v35 = vcombine.low %v647_v30, %v648_v31  ;;  %v662_v36 = vcombine.low %v649_v32, %v650_v33 }
 0x1bd   :  { %667 = vst [vmem:[%s1025_s2] sm:$0xff] %v659_v34  ;;  %668 = vst [vmem:[%s1025_s2 + $0x8] sm:$0xff] %v660_v3 }
 0x1be   :  { %669 = vst [vmem:[%s1025_s2 + $0x10] sm:$0xff] %v661_v35  ;;  %670 = vst [vmem:[%s1025_s2 + $0x18] sm:$0xff] %v662_v36 }

// kernel: encoder_forward.7
= control target key start
LH: loop header
LB: loop body
LE: loop exit
PB: predicated region body
PF: predicated region fallthrough
CT: control target
= control target key end

     0   :  { %s339_s1 = inlined_call_operand.vmem [shape: bf16[256,128], index: 1, kind: input, shape index: {}]   ;;  %s340_s0 = inlined_call_operand.vmem [shape: bf16[8,256], index: 0, kind: input, shape index: {}]   ;;  %s341_s2 = inlined_call_operand.vmem [shape: f32[8,128], index: 2, kind: output, shape index: {}]  }
   0x1   :  { %v250_v0 = vld [vmem:[%s339_s1 + $0x78] sm:$0xff]   ;;  %v252_v2 = vld [vmem:[%s339_s1 + $0x70] sm:$0xff]   ;;  %v254_v4 = vld [vmem:[%s339_s1 + $0x68] sm:$0xff]  }
   0x2   :  { %v251_v1 = vld [vmem:[%s339_s1 + $0x38] sm:$0xff]   ;;  %228 = vmatprep.subr.bf16.mxu0 %v250_v0  ;;  %v253_v3 = vld [vmem:[%s339_s1 + $0x30] sm:$0xff]   ;;  %v255_v5 = vld [vmem:[%s339_s1 + $0x28] sm:$0xff]  }
   0x3   :  { %229 = vmatpush3.bf16.msra.mxu0 %v251_v1  ;;  %v256_v6 = vld [vmem:[%s339_s1 + $0x60] sm:$0xff]   ;;  %v258_v8 = vld [vmem:[%s339_s1 + $0x58] sm:$0xff]   ;;  %v260_v10 = vld [vmem:[%s339_s1 + $0x50] sm:$0xff]  }
   0x4   :  { %230 = vmatprep.subr.bf16.mxu0 %v252_v2  ;;  %v257_v7 = vld [vmem:[%s339_s1 + $0x20] sm:$0xff]   ;;  %v259_v9 = vld [vmem:[%s339_s1 + $0x18] sm:$0xff]   ;;  %v261_v13 = vld [vmem:[%s339_s1 + $0x10] sm:$0xff]  }
   0x5   :  { %v12_v11 = vld [vmem:[%s340_s0] sm:$0xff]  ;;  %v262_v14 = vld [vmem:[%s339_s1 + $0x48] sm:$0xff]  }
   0x6   :  { %v211_v12 = vcombine.high %v12_v11, %v12_v11  ;;  %v263_v15 = vld [vmem:[%s339_s1 + $0x8] sm:$0xff]   ;;  %v264_v16 = vld [vmem:[%s339_s1 + $0x40] sm:$0xff]   ;;  %v210_v18 = vcombine.low %v12_v11, %v12_v11 }
   0x7   :  { %231 = vmatpush3.bf16.msra.mxu0 %v253_v3  ;;  %v265_v17 = vld [vmem:[%s339_s1] sm:$0xff]  }
   0x8   :  { %232 = vmatprep.subr.bf16.mxu0 %v254_v4  ;;  %180 = vmatprep.mubr.bf16.mxu0 %v211_v12 }
   0xb   :  { %233 = vmatpush3.bf16.msra.mxu0 %v255_v5 }
   0xc   :  { %234 = vmatprep.subr.bf16.mxu0 %v256_v6 }
   0xf   :  { %235 = vmatpush3.bf16.msra.mxu0 %v257_v7 }
  0x10   :  { %236 = vmatprep.subr.bf16.mxu0 %v258_v8 }
  0x13   :  { %237 = vmatpush3.bf16.msra.mxu0 %v259_v9 }
  0x14   :  { %238 = vmatprep.subr.bf16.mxu0 %v260_v10 }
  0x17   :  { %239 = vmatpush3.bf16.msra.mxu0 %v261_v13 }
  0x18   :  { %240 = vmatprep.subr.bf16.mxu0 %v262_v14 }
  0x1b   :  { %241 = vmatpush3.bf16.msra.mxu0 %v263_v15 }
  0x1c   :  { %242 = vmatprep.subr.bf16.mxu0 %v264_v16 }
  0x1f   :  { %243 = vmatpush3.bf16.msra.mxu0 %v265_v17 }
  0x22   :  { %181 = vmatmul.mubr.bf16.vlgmr.msra.gmra.mxu0 %v210_v18 }
  0xe2   :  { %v244_v19 = vpop.f32.mrf.mxu0 }
  0xe4   :  { %v245_v20 = vpop.f32.mrf.mxu0 }
  0xe5   :  { %v246_v21 = vadd.f32 %v245_v20, %v244_v19 }
  0xe6   :  { %v247_v22 = vpop.f32.mrf.mxu0 }
  0xe7   :  { %188 = vadd.xlane.f32.xlu0 %v246_v21  ;;  %v191_v24 = vmul.f32 %v246_v21, %v246_v21 }
  0xe8   :  { %v248_v23 = vpop.f32.mrf.mxu0 }
  0xeb   :  { %192 = vadd.xlane.f32.xlu0 %v191_v24 }
 0x170   :  { %v189_v25 = vpop.xlane.xlu0 %188 }
 0x171   :  { %v190_v26 = vmul.f32 0.0078125, %v189_v25 }
 0x173   :  { %v195_v28 = vmul.f32 %v190_v26, %v190_v26  ;;  %v198_v33 = vsub.f32 %v246_v21, %v190_v26 }
 0x174   :  { %v193_v27 = vpop.xlane.xlu0 %192 }
 0x175   :  { %v194_v29 = vmul.f32 0.0078125, %v193_v27 }
 0x177   :  { %v196_v30 = vsub.f32 %v194_v29, %v195_v28 }
 0x179   :  { %v197_v31 = vmax.f32 %v196_v30, 0.0 }
 0x17b   :  { %v199_v32 = vadd.f32 1e-05, %v197_v31 }
 0x17d   :  { %268 = vrsqrt.f32 %v199_v32 }
 0x18a   :  { %v269_v34 = vpop.eup %268 }
 0x18b   :  { %v201_v35 = vmul.f32 %v269_v34, %v198_v33 }
 0x18d   :  { %vm202_vm0 = vcmp.ge.f32.partialorder %v201_v35, 0.0  ;;  %v203_v36 = vmul.f32 0.2, %v201_v35 }
 0x18f   :  { %v204_v37 = vsel %vm202_vm0, %v201_v35, %v203_v36 }
 0x190   :  { %205 = vst [vmem:[%s341_s2] sm:$0xff] %v204_v37 }

// kernel: encoder_forward.8
= control target key start
LH: loop header
LB: loop body
LE: loop exit
PB: predicated region body
PF: predicated region fallthrough
CT: control target
= control target key end

     0   :  { %vm374_vm0 = vcmask 130048   ;;  %s676_s1 = inlined_call_operand.vmem [shape: bf16[512,16], index: 1, kind: input, shape index: {}]   ;;  %s677_s0 = inlined_call_operand.vmem [shape: bf16[16,512], index: 0, kind: input, shape index: {}]   ;;  %s678_s2 = inlined_call_operand.vmem [shape: f32[16,16], index: 2, kind: output, shape index: {}]  }
   0x1   :  { %v499_v0 = vld [vmem:[%s676_s1 + $0x78] sm:$0xff]   ;;  %v503_v4 = vld [vmem:[%s676_s1 + $0x70] sm:$0xff]   ;;  %v507_v8 = vld [vmem:[%s676_s1 + $0x68] sm:$0xff]  }
   0x2   :  { %v500_v1 = vld [vmem:[%s676_s1 + $0xf8] sm:$0xff]   ;;  %455 = vmatprep.subr.bf16.mxu0 %v499_v0  ;;  %v504_v5 = vld [vmem:[%s676_s1 + $0xf0] sm:$0xff]   ;;  %v508_v9 = vld [vmem:[%s676_s1 + $0xe8] sm:$0xff]  }
   0x3   :  { %v501_v2 = vld [vmem:[%s676_s1 + $0x38] sm:$0xff]   ;;  %477 = vmatprep.subr.bf16.mxu1 %v500_v1  ;;  %v505_v6 = vld [vmem:[%s676_s1 + $0x30] sm:$0xff]   ;;  %v509_v10 = vld [vmem:[%s676_s1 + $0x28] sm:$0xff]  }
   0x4   :  { %v502_v3 = vld [vmem:[%s676_s1 + $0xb8] sm:$0xff]   ;;  %456 = vmatpush3.bf16.msra.mxu0 %v501_v2  ;;  %v506_v7 = vld [vmem:[%s676_s1 + $0xb0] sm:$0xff]   ;;  %v510_v11 = vld [vmem:[%s676_s1 + $0xa8] sm:$0xff]  }
   0x5   :  { %478 = vmatpush3.bf16.msra.mxu1 %v502_v3  ;;  %457 = vmatprep.subr.bf16.mxu0 %v503_v4  ;;  %v511_v12 = vld [vmem:[%s676_s1 + $0x60] sm:$0xff]   ;;  %v515_v16 = vld [vmem:[%s676_s1 + $0x58] sm:$0xff]   ;;  %v519_v20 = vld [vmem:[%s676_s1 + $0x50] sm:$0xff]  }
   0x6   :  { %479 = vmatprep.subr.bf16.mxu1 %v504_v5  ;;  %v512_v13 = vld [vmem:[%s676_s1 + $0xe0] sm:$0xff]   ;;  %v516_v17 = vld [vmem:[%s676_s1 + $0xd8] sm:$0xff]   ;;  %v520_v21 = vld [vmem:[%s676_s1 + $0xd0] sm:$0xff]  }
   0x7   :  { %v513_v14 = vld [vmem:[%s676_s1 + $0x20] sm:$0xff]   ;;  %v517_v18 = vld [vmem:[%s676_s1 + $0x18] sm:$0xff]   ;;  %v521_v22 = vld [vmem:[%s676_s1 + $0x10] sm:$0xff]  }
   0x8   :  { %458 = vmatpush3.bf16.msra.mxu0 %v505_v6  ;;  %v514_v15 = vld [vmem:[%s676_s1 + $0xa0] sm:$0xff]   ;;  %v518_v19 = vld [vmem:[%s676_s1 + $0x98] sm:$0xff]   ;;  %v522_v23 = vld [vmem:[%s676_s1 + $0x90] sm:$0xff]  }
   0x9   :  { %480 = vmatpush3.bf16.msra.mxu1 %v506_v7  ;;  %459 = vmatprep.subr.bf16.mxu0 %v507_v8  ;;  %v523_v24 = vld [vmem:[%s676_s1 + $0x48] sm:$0xff]   ;;  %v527_v28 = vld [vmem:[%s676_s1 + $0x40] sm:$0xff]  }
   0xa   :  { %481 = vmatprep.subr.bf16.mxu1 %v508_v9  ;;  %v524_v25 = vld [vmem:[%s676_s1 + $0xc8] sm:$0xff]   ;;  %v528_v29 = vld [vmem:[%s676_s1 + $0xc0] sm:$0xff]  }
   0xb   :  { %v525_v26 = vld [vmem:[%s676_s1 + $0x8] sm:$0xff]   ;;  %v529_v30 = vld [vmem:[%s676_s1] sm:$0xff]  }
   0xc   :  { %460 = vmatpush3.bf16.msra.mxu0 %v509_v10  ;;  %v526_v27 = vld [vmem:[%s676_s1 + $0x88] sm:$0xff]   ;;  %v530_v31 = vld [vmem:[%s676_s1 + $0x80] sm:$0xff]  }
   0xd   :  { %482 = vmatpush3.bf16.msra.mxu1 %v510_v11  ;;  %461 = vmatprep.subr.bf16.mxu0 %v511_v12  ;;  %v531_v32 = vld [vmem:[%s677_s0] ss:$16 sps:$4 sm:$0xff]   ;;  %v533_v33 = vld [vmem:[%s677_s0 + $0x4] ss:$16 sps:$4 sm:$0xff]   ;;  %v534_v34 = vld [vmem:[%s677_s0 + $0x8] ss:$16 sps:$4 sm:$0xff]  }
   0xe   :  { %483 = vmatprep.subr.bf16.mxu1 %v512_v13  ;;  %v536_v35 = vld [vmem:[%s677_s0 + $0xc] ss:$16 sps:$4 sm:$0xff]   ;;  %324 = vmatprep.mubr.bf16.mxu0 %v533_v33 }
   0xf   :  { %365 = vmatprep.mubr.bf16.mxu1 %v536_v35 }
  0x10   :  { %462 = vmatpush3.bf16.msra.mxu0 %v513_v14 }
  0x11   :  { %484 = vmatpush3.bf16.msra.mxu1 %v514_v15  ;;  %463 = vmatprep.subr.bf16.mxu0 %v515_v16 }
  0x12   :  { %485 = vmatprep.subr.bf16.mxu1 %v516_v17 }
  0x14   :  { %464 = vmatpush3.bf16.msra.mxu0 %v517_v18 }
  0x15   :  { %486 = vmatpush3.bf16.msra.mxu1 %v518_v19  ;;  %465 = vmatprep.subr.bf16.mxu0 %v519_v20 }
  0x16   :  { %487 = vmatprep.subr.bf16.mxu1 %v520_v21 }
  0x18   :  { %466 = vmatpush3.bf16.msra.mxu0 %v521_v22 }
  0x19   :  { %488 = vmatpush3.bf16.msra.mxu1 %v522_v23  ;;  %467 = vmatprep.subr.bf16.mxu0 %v523_v24 }
  0x1a   :  { %489 = vmatprep.subr.bf16.mxu1 %v524_v25 }
  0x1c   :  { %468 = vmatpush3.bf16.msra.mxu0 %v525_v26 }
  0x1d   :  { %490 = vmatpush3.bf16.msra.mxu1 %v526_v27  ;;  %469 = vmatprep.subr.bf16.mxu0 %v527_v28 }
  0x1e   :  { %491 = vmatprep.subr.bf16.mxu1 %v528_v29 }
  0x20   :  { %470 = vmatpush3.bf16.msra.mxu0 %v529_v30 }
  0x21   :  { %492 = vmatpush3.bf16.msra.mxu1 %v530_v31 }
  0x23   :  { %325 = vmatmul.mubr.bf16.vlgmr.msra.gmra.mxu0 %v531_v32 }
  0x24   :  { %366 = vmatmul.mubr.bf16.vlgmr.msra.gmra.mxu1 %v534_v34 }
  0xe3   :  { %v471_v36 = vpop.f32.mrf.mxu0 }
  0xe4   :  { %v493_v37 = vpop.f32.mrf.mxu1 }
  0xe5   :  { %v472_v38 = vpop.f32.mrf.mxu0 }
  0xe6   :  { %v473_v39 = vadd.f32 %v472_v38, %v471_v36  ;;  %v494_v40 = vpop.f32.mrf.mxu1 }
  0xe7   :  { %v495_v41 = vadd.f32 %v494_v40, %v493_v37  ;;  %v474_v42 = vpop.f32.mrf.mxu0 }
  0xe8   :  { %v496_v43 = vpop.f32.mrf.mxu1 }
  0xe9   :  { %v368_v44 = vadd.f32 %v495_v41, %v473_v39  ;;  %v475_v45 = vpop.f32.mrf.mxu0 }
  0xea   :  { %v476_v46 = vadd.f32 %v475_v45, %v474_v42  ;;  %v497_v47 = vpop.f32.mrf.mxu1 }
  0xeb   :  { %v498_v48 = vadd.f32 %v497_v47, %v496_v43  ;;  %v375_v49 = vsel %vm374_vm0, %v368_v44, 0.0  ;;  %v383_v50 = vmul.f32 %v368_v44, %v368_v44 }
  0xec   :  { %376 = vadd.xlane.f32.xlu0 %v375_v49 }
  0xed   :  { %v371_v51 = vadd.f32 %v498_v48, %v476_v46  ;;  %v385_v52 = vsel %vm374_vm0, %v383_v50, 0.0 }
  0xee   :  { %386 = vadd.xlane.f32.xlu1 %v385_v52 }
  0xef   :  { %v378_v53 = vsel %vm374_vm0, %v371_v51, 0.0  ;;  %v384_v54 = vmul.f32 %v371_v51, %v371_v51 }
  0xf0   :  { %379 = vadd.xlane.f32.xlu0 %v378_v53 }
  0xf1   :  { %v388_v55 = vsel %vm374_vm0, %v384_v54, 0.0 }
  0xf2   :  { %389 = vadd.xlane.f32.xlu1 %v388_v55 }
 0x175   :  { %v377_v56 = vpop.xlane.xlu0 %376 }
 0x176   :  { %v381_v57 = vmul.f32 0.0625, %v377_v56 }
 0x177   :  { %v387_v58 = vpop.xlane.xlu1 %386 }
 0x178   :  { %v393_v59 = vmul.f32 %v381_v57, %v381_v57  ;;  %v391_v60 = vmul.f32 0.0625, %v387_v58  ;;  %v399_v8 = vsub.f32 %v368_v44, %v381_v57 }
 0x179   :  { %v380_v61 = vpop.xlane.xlu0 %379 }
 0x17a   :  { %v395_v62 = vsub.f32 %v391_v60, %v393_v59  ;;  %v382_v63 = vmul.f32 0.0625, %v380_v61 }
 0x17b   :  { %v390_v0 = vpop.xlane.xlu1 %389 }
 0x17c   :  { %v397_v1 = vmax.f32 %v395_v62, 0.0  ;;  %v394_v2 = vmul.f32 %v382_v63, %v382_v63  ;;  %v392_v3 = vmul.f32 0.0625, %v390_v0  ;;  %v400_v12 = vsub.f32 %v371_v51, %v382_v63 }
 0x17e   :  { %v401_v4 = vadd.f32 1e-05, %v397_v1  ;;  %v396_v5 = vsub.f32 %v392_v3, %v394_v2 }
 0x180   :  { %537 = vrsqrt.f32 %v401_v4  ;;  %v398_v6 = vmax.f32 %v396_v5, 0.0 }
 0x182   :  { %v402_v7 = vadd.f32 1e-05, %v398_v6 }
 0x184   :  { %539 = vrsqrt.f32 %v402_v7 }
 0x18d   :  { %v538_v9 = vpop.eup %537 }
 0x18e   :  { %v405_v10 = vmul.f32 %v538_v9, %v399_v8 }
 0x190   :  { %vm407_vm1 = vcmp.ge.f32.partialorder %v405_v10, 0.0  ;;  %v409_v11 = vmul.f32 0.2, %v405_v10 }
 0x191   :  { %v540_v13 = vpop.eup %539 }
 0x192   :  { %v411_v14 = vsel %vm407_vm1, %v405_v10, %v409_v11  ;;  %v406_v15 = vmul.f32 %v540_v13, %v400_v12 }
 0x193   :  { %413 = vst.msk [vmem:[%s678_s2] sm:$0xff] %vm374_vm0, %v411_v14 }
 0x194   :  { %vm408_vm2 = vcmp.ge.f32.partialorder %v406_v15, 0.0  ;;  %v410_v16 = vmul.f32 0.2, %v406_v15 }
 0x196   :  { %v412_v17 = vsel %vm408_vm2, %v406_v15, %v410_v16 }
 0x197   :  { %414 = vst.msk [vmem:[%s678_s2 + $0x8] sm:$0xff] %vm374_vm0, %v412_v17 }

// kernel: encoder_forward.9
= control target key start
LH: loop header
LB: loop body
LE: loop exit
PB: predicated region body
PF: predicated region fallthrough
CT: control target
= control target key end

     0   :  { %vm840_vm0 = vcmask 15360   ;;  %s1392_s1 = inlined_call_operand.vmem [shape: bf16[1024,2], index: 1, kind: input, shape index: {}]   ;;  %s1393_s0 = inlined_call_operand.vmem [shape: bf16[32,1024], index: 0, kind: input, shape index: {}]   ;;  %s1394_s2 = inlined_call_operand.vmem [shape: f32[32,2], index: 2, kind: output, shape index: {}]  }
   0x1   :  { %v1045_v0 = vld [vmem:[%s1392_s1 + $0x78] sm:$0xff]   ;;  %v1049_v4 = vld [vmem:[%s1392_s1 + $0x70] sm:$0xff]   ;;  %v1053_v8 = vld [vmem:[%s1392_s1 + $0x68] sm:$0xff]  }
   0x2   :  { %v1046_v1 = vld [vmem:[%s1392_s1 + $0xf8] sm:$0xff]   ;;  %933 = vmatprep.subr.bf16.mxu0 %v1045_v0  ;;  %v1050_v5 = vld [vmem:[%s1392_s1 + $0xf0] sm:$0xff]   ;;  %v1054_v9 = vld [vmem:[%s1392_s1 + $0xe8] sm:$0xff]  }
   0x3   :  { %v1047_v2 = vld [vmem:[%s1392_s1 + $0x38] sm:$0xff]   ;;  %961 = vmatprep.subr.bf16.mxu1 %v1046_v1  ;;  %v1051_v6 = vld [vmem:[%s1392_s1 + $0x30] sm:$0xff]   ;;  %v1055_v10 = vld [vmem:[%s1392_s1 + $0x28] sm:$0xff]  }
   0x4   :  { %v1048_v3 = vld [vmem:[%s1392_s1 + $0xb8] sm:$0xff]   ;;  %934 = vmatpush3.bf16.msra.mxu0 %v1047_v2  ;;  %v1052_v7 = vld [vmem:[%s1392_s1 + $0xb0] sm:$0xff]   ;;  %v1056_v11 = vld [vmem:[%s1392_s1 + $0xa8] sm:$0xff]  }
   0x5   :  { %962 = vmatpush3.bf16.msra.mxu1 %v1048_v3  ;;  %935 = vmatprep.subr.bf16.mxu0 %v1049_v4  ;;  %v1057_v12 = vld [vmem:[%s1392_s1 + $0x60] sm:$0xff]   ;;  %v1061_v16 = vld [vmem:[%s1392_s1 + $0x58] sm:$0xff]   ;;  %v1065_v20 = vld [vmem:[%s1392_s1 + $0x50] sm:$0xff]  }
   0x6   :  { %963 = vmatprep.subr.bf16.mxu1 %v1050_v5  ;;  %v1058_v13 = vld [vmem:[%s1392_s1 + $0xe0] sm:$0xff]   ;;  %v1062_v17 = vld [vmem:[%s1392_s1 + $0xd8] sm:$0xff]   ;;  %v1066_v21 = vld [vmem:[%s1392_s1 + $0xd0] sm:$0xff]  }
   0x7   :  { %v1059_v14 = vld [vmem:[%s1392_s1 + $0x20] sm:$0xff]   ;;  %v1063_v18 = vld [vmem:[%s1392_s1 + $0x18] sm:$0xff]   ;;  %v1067_v22 = vld [vmem:[%s1392_s1 + $0x10] sm:$0xff]  }
   0x8   :  { %936 = vmatpush3.bf16.msra.mxu0 %v1051_v6  ;;  %v1060_v15 = vld [vmem:[%s1392_s1 + $0xa0] sm:$0xff]   ;;  %v1064_v19 = vld [vmem:[%s1392_s1 + $0x98] sm:$0xff]   ;;  %v1068_v23 = vld [vmem:[%s1392_s1 + $0x90] sm:$0xff]  }
   0x9   :  { %964 = vmatpush3.bf16.msra.mxu1 %v1052_v7  ;;  %937 = vmatprep.subr.bf16.mxu0 %v1053_v8  ;;  %v1069_v24 = vld [vmem:[%s1392_s1 + $0x48] sm:$0xff]   ;;  %v1073_v28 = vld [vmem:[%s1392_s1 + $0x40] sm:$0xff]   ;;  %v1077_v40 = vld [vmem:[%s1392_s1 + $0x178] sm:$0xff]  }
   0xa   :  { %965 = vmatprep.subr.bf16.mxu1 %v1054_v9  ;;  %v1070_v25 = vld [vmem:[%s1392_s1 + $0xc8] sm:$0xff]   ;;  %v1074_v29 = vld [vmem:[%s1392_s1 + $0xc0] sm:$0xff]   ;;  %v1078_v41 = vld [vmem:[%s1392_s1 + $0x1f8] sm:$0xff]  }
   0xb   :  { %v1071_v26 = vld [vmem:[%s1392_s1 + $0x8] sm:$0xff]   ;;  %v1075_v30 = vld [vmem:[%s1392_s1] sm:$0xff]   ;;  %v1079_v42 = vld [vmem:[%s1392_s1 + $0x138] sm:$0xff]  }
   0xc   :  { %938 = vmatpush3.bf16.msra.mxu0 %v1055_v10  ;;  %v1072_v27 = vld [vmem:[%s1392_s1 + $0x88] sm:$0xff]   ;;  %v1076_v31 = vld [vmem:[%s1392_s1 + $0x80] sm:$0xff]   ;;  %v1080_v43 = vld [vmem:[%s1392_s1 + $0x1b8] sm:$0xff]  }
   0xd   :  { %966 = vmatpush3.bf16.msra.mxu1 %v1056_v11  ;;  %939 = vmatprep.subr.bf16.mxu0 %v1057_v12  ;;  %v12_v32 = vld [vmem:[%s1393_s0] sm:$0xff]  ;;  %v13_v34 = vld [vmem:[%s1393_s0 + $0x8] sm:$0xff]  ;;  %v1081_v44 = vld [vmem:[%s1392_s1 + $0x170] sm:$0xff]  }
   0xe   :  { %967 = vmatprep.subr.bf16.mxu1 %v1058_v13  ;;  %v16_v33 = vld [vmem:[%s1393_s0 + $0x20] sm:$0xff]  ;;  %v17_v37 = vld [vmem:[%s1393_s0 + $0x28] sm:$0xff]  ;;  %v1082_v45 = vld [vmem:[%s1392_s1 + $0x1f0] sm:$0xff]  }
   0xf   :  { %v849_v35 = vcombine.low %v12_v32, %v16_v33  ;;  %v850_v36 = vcombine.high %v12_v32, %v16_v33  ;;  %v851_v38 = vcombine.low %v13_v34, %v17_v37  ;;  %v852_v39 = vcombine.high %v13_v34, %v17_v37  ;;  %v1083_v46 = vld [vmem:[%s1392_s1 + $0x130] sm:$0xff]   ;;  %v1085_v48 = vld [vmem:[%s1392_s1 + $0x168] sm:$0xff]   ;;  %v1089_v52 = vld [vmem:[%s1392_s1 + $0x160] sm:$0xff]  }
  0x10   :  { %940 = vmatpush3.bf16.msra.mxu0 %v1059_v14  ;;  %v1084_v47 = vld [vmem:[%s1392_s1 + $0x1b0] sm:$0xff]   ;;  %v1086_v49 = vld [vmem:[%s1392_s1 + $0x1e8] sm:$0xff]   ;;  %v1090_v53 = vld [vmem:[%s1392_s1 + $0x1e0] sm:$0xff]  }
  0x11   :  { %968 = vmatpush3.bf16.msra.mxu1 %v1060_v15  ;;  %941 = vmatprep.subr.bf16.mxu0 %v1061_v16  ;;  %v1087_v50 = vld [vmem:[%s1392_s1 + $0x128] sm:$0xff]   ;;  %v1091_v54 = vld [vmem:[%s1392_s1 + $0x120] sm:$0xff]   ;;  %v1093_v56 = vld [vmem:[%s1392_s1 + $0x158] sm:$0xff]  }
  0x12   :  { %969 = vmatprep.subr.bf16.mxu1 %v1062_v17  ;;  %652 = vmatprep.mubr.bf16.mxu0 %v850_v36  ;;  %v1088_v51 = vld [vmem:[%s1392_s1 + $0x1a8] sm:$0xff]   ;;  %v1092_v55 = vld [vmem:[%s1392_s1 + $0x1a0] sm:$0xff]   ;;  %v1094_v57 = vld [vmem:[%s1392_s1 + $0x1d8] sm:$0xff]  }
  0x13   :  { %701 = vmatprep.mubr.bf16.mxu1 %v852_v39  ;;  %v20_v58 = vld [vmem:[%s1393_s0 + $0x40] sm:$0xff]  ;;  %v21_v61 = vld [vmem:[%s1393_s0 + $0x48] sm:$0xff]  ;;  %v1095_v1 = vld [vmem:[%s1392_s1 + $0x118] sm:$0xff]  }
  0x14   :  { %942 = vmatpush3.bf16.msra.mxu0 %v1063_v18  ;;  %v24_v59 = vld [vmem:[%s1393_s0 + $0x60] sm:$0xff]  ;;  %v25_v62 = vld [vmem:[%s1393_s0 + $0x68] sm:$0xff]  ;;  %v1096_v3 = vld [vmem:[%s1392_s1 + $0x198] sm:$0xff]  }
  0x15   :  { %970 = vmatpush3.bf16.msra.mxu1 %v1064_v19  ;;  %943 = vmatprep.subr.bf16.mxu0 %v1065_v20  ;;  %v858_v60 = vcombine.high %v20_v58, %v24_v59  ;;  %v857_v63 = vcombine.low %v20_v58, %v24_v59  ;;  %v860_v0 = vcombine.high %v21_v61, %v25_v62  ;;  %v1097_v4 = vld [vmem:[%s1392_s1 + $0x150] sm:$0xff]   ;;  %v1101_v8 = vld [vmem:[%s1392_s1 + $0x148] sm:$0xff]   ;;  %v1105_v12 = vld [vmem:[%s1392_s1 + $0x140] sm:$0xff]  }
  0x16   :  { %971 = vmatprep.subr.bf16.mxu1 %v1066_v21  ;;  %v859_v2 = vcombine.low %v21_v61, %v25_v62  ;;  %v1098_v5 = vld [vmem:[%s1392_s1 + $0x1d0] sm:$0xff]   ;;  %v1102_v9 = vld [vmem:[%s1392_s1 + $0x1c8] sm:$0xff]   ;;  %v1106_v13 = vld [vmem:[%s1392_s1 + $0x1c0] sm:$0xff]  }
  0x17   :  { %v1099_v6 = vld [vmem:[%s1392_s1 + $0x110] sm:$0xff]   ;;  %v1103_v10 = vld [vmem:[%s1392_s1 + $0x108] sm:$0xff]   ;;  %v1107_v14 = vld [vmem:[%s1392_s1 + $0x100] sm:$0xff]  }
  0x18   :  { %944 = vmatpush3.bf16.msra.mxu0 %v1067_v22  ;;  %v1100_v7 = vld [vmem:[%s1392_s1 + $0x190] sm:$0xff]   ;;  %v1104_v11 = vld [vmem:[%s1392_s1 + $0x188] sm:$0xff]   ;;  %v1108_v15 = vld [vmem:[%s1392_s1 + $0x180] sm:$0xff]  }
  0x19   :  { %972 = vmatpush3.bf16.msra.mxu1 %v1068_v23  ;;  %945 = vmatprep.subr.bf16.mxu0 %v1069_v24  ;;  %v14_v16 = vld [vmem:[%s1393_s0 + $0x10] sm:$0xff]  ;;  %v15_v18 = vld [vmem:[%s1393_s0 + $0x18] sm:$0xff] }
  0x1a   :  { %973 = vmatprep.subr.bf16.mxu1 %v1070_v25  ;;  %v18_v17 = vld [vmem:[%s1393_s0 + $0x30] sm:$0xff]  ;;  %v19_v19 = vld [vmem:[%s1393_s0 + $0x38] sm:$0xff] }
  0x1b   :  { %v853_v20 = vcombine.low %v14_v16, %v18_v17  ;;  %v854_v21 = vcombine.high %v14_v16, %v18_v17  ;;  %v855_v22 = vcombine.low %v15_v18, %v19_v19  ;;  %v856_v23 = vcombine.high %v15_v18, %v19_v19  ;;  %v22_v24 = vld [vmem:[%s1393_s0 + $0x50] sm:$0xff] }
  0x1c   :  { %946 = vmatpush3.bf16.msra.mxu0 %v1071_v26  ;;  %v26_v25 = vld [vmem:[%s1393_s0 + $0x70] sm:$0xff]  ;;  %v23_v26 = vld [vmem:[%s1393_s0 + $0x58] sm:$0xff] }
  0x1d   :  { %974 = vmatpush3.bf16.msra.mxu1 %v1072_v27  ;;  %947 = vmatprep.subr.bf16.mxu0 %v1073_v28  ;;  %v862_v27 = vcombine.high %v22_v24, %v26_v25  ;;  %v27_v28 = vld [vmem:[%s1393_s0 + $0x78] sm:$0xff] }
  0x1e   :  { %975 = vmatprep.subr.bf16.mxu1 %v1074_v29  ;;  %v864_v29 = vcombine.high %v23_v26, %v27_v28 }
  0x20   :  { %948 = vmatpush3.bf16.msra.mxu0 %v1075_v30  ;;  %v861_v30 = vcombine.low %v22_v24, %v26_v25 }
  0x21   :  { %976 = vmatpush3.bf16.msra.mxu1 %v1076_v31  ;;  %989 = vmatprep.subr.bf16.mxu0 %v1077_v40  ;;  %v863_v31 = vcombine.low %v23_v26, %v27_v28 }
  0x22   :  { %1017 = vmatprep.subr.bf16.mxu1 %v1078_v41 }
  0x23   :  { %653 = vmatmul.mubr.bf16.vlgmr.msra.gmra.mxu0 %v849_v35 }
  0x24   :  { %702 = vmatmul.mubr.bf16.vlgmr.msra.gmra.mxu1 %v851_v38  ;;  %990 = vmatpush3.bf16.msra.mxu0 %v1079_v42 }
  0x25   :  { %1018 = vmatpush3.bf16.msra.mxu1 %v1080_v43  ;;  %991 = vmatprep.subr.bf16.mxu0 %v1081_v44 }
  0x26   :  { %1019 = vmatprep.subr.bf16.mxu1 %v1082_v45  ;;  %660 = vmatprep.mubr.bf16.mxu0 %v858_v60 }
  0x27   :  { %709 = vmatprep.mubr.bf16.mxu1 %v860_v0 }
  0x28   :  { %992 = vmatpush3.bf16.msra.mxu0 %v1083_v46 }
  0x29   :  { %1020 = vmatpush3.bf16.msra.mxu1 %v1084_v47  ;;  %993 = vmatprep.subr.bf16.mxu0 %v1085_v48 }
  0x2a   :  { %1021 = vmatprep.subr.bf16.mxu1 %v1086_v49 }
  0x2b   :  { %661 = vmatmul.mubr.bf16.gmra.mxu0 %v857_v63 }
  0x2c   :  { %994 = vmatpush3.bf16.msra.mxu0 %v1087_v50  ;;  %710 = vmatmul.mubr.bf16.gmra.mxu1 %v859_v2 }
  0x2d   :  { %1022 = vmatpush3.bf16.msra.mxu1 %v1088_v51  ;;  %995 = vmatprep.subr.bf16.mxu0 %v1089_v52 }
  0x2e   :  { %1023 = vmatprep.subr.bf16.mxu1 %v1090_v53  ;;  %750 = vmatprep.mubr.bf16.mxu0 %v854_v21 }
  0x2f   :  { %799 = vmatprep.mubr.bf16.mxu1 %v856_v23 }
  0x30   :  { %996 = vmatpush3.bf16.msra.mxu0 %v1091_v54 }
  0x31   :  { %1024 = vmatpush3.bf16.msra.mxu1 %v1092_v55  ;;  %997 = vmatprep.subr.bf16.mxu0 %v1093_v56 }
  0x32   :  { %1025 = vmatprep.subr.bf16.mxu1 %v1094_v57 }
  0x34   :  { %998 = vmatpush3.bf16.msra.mxu0 %v1095_v1 }
  0x35   :  { %1026 = vmatpush3.bf16.msra.mxu1 %v1096_v3  ;;  %999 = vmatprep.subr.bf16.mxu0 %v1097_v4 }
  0x36   :  { %1027 = vmatprep.subr.bf16.mxu1 %v1098_v5 }
  0x38   :  { %1000 = vmatpush3.bf16.msra.mxu0 %v1099_v6 }
  0x39   :  { %1028 = vmatpush3.bf16.msra.mxu1 %v1100_v7  ;;  %1001 = vmatprep.subr.bf16.mxu0 %v1101_v8 }
  0x3a   :  { %1029 = vmatprep.subr.bf16.mxu1 %v1102_v9 }
  0x3c   :  { %1002 = vmatpush3.bf16.msra.mxu0 %v1103_v10 }
  0x3d   :  { %1030 = vmatpush3.bf16.msra.mxu1 %v1104_v11  ;;  %1003 = vmatprep.subr.bf16.mxu0 %v1105_v12 }
  0x3e   :  { %1031 = vmatprep.subr.bf16.mxu1 %v1106_v13 }
  0x40   :  { %1004 = vmatpush3.bf16.msra.mxu0 %v1107_v14 }
  0x41   :  { %1032 = vmatpush3.bf16.msra.mxu1 %v1108_v15 }
  0x43   :  { %751 = vmatmul.mubr.bf16.vlgmr.msra.gmra.mxu0 %v853_v20 }
  0x44   :  { %800 = vmatmul.mubr.bf16.vlgmr.msra.gmra.mxu1 %v855_v22  ;;  %758 = vmatprep.mubr.bf16.mxu0 %v862_v27 }
  0x45   :  { %807 = vmatprep.mubr.bf16.mxu1 %v864_v29 }
  0x4b   :  { %759 = vmatmul.mubr.bf16.gmra.mxu0 %v861_v30 }
  0x4c   :  { %808 = vmatmul.mubr.bf16.gmra.mxu1 %v863_v31 }
  0xe3   :  { %v949_v32 = vpop.f32.mrf.mxu0 }
  0xe4   :  { %v977_v33 = vpop.f32.mrf.mxu1 }
  0xe5   :  { %v950_v34 = vpop.f32.mrf.mxu0 }
  0xe6   :  { %v978_v35 = vpop.f32.mrf.mxu1  ;;  %v951_v48 = vadd.f32 %v950_v34, %v949_v32 }
  0xe7   :  { %v952_v36 = vpop.f32.mrf.mxu0  ;;  %v979_v49 = vadd.f32 %v978_v35, %v977_v33 }
  0xe8   :  { %v980_v37 = vpop.f32.mrf.mxu1 }
  0xe9   :  { %v953_v38 = vpop.f32.mrf.mxu0  ;;  %v704_v54 = vadd.f32 %v979_v49, %v951_v48 }
  0xea   :  { %v981_v39 = vpop.f32.mrf.mxu1  ;;  %v954_v55 = vadd.f32 %v953_v38, %v952_v36 }
  0xeb   :  { %v955_v40 = vpop.f32.mrf.mxu0  ;;  %v982_v56 = vadd.f32 %v981_v39, %v980_v37 }
  0xec   :  { %v983_v41 = vpop.f32.mrf.mxu1 }
  0xed   :  { %v956_v42 = vpop.f32.mrf.mxu0  ;;  %v707_v2 = vadd.f32 %v982_v56, %v954_v55 }
  0xee   :  { %v984_v43 = vpop.f32.mrf.mxu1  ;;  %v957_v62 = vadd.f32 %v956_v42, %v955_v40 }
  0xef   :  { %v958_v44 = vpop.f32.mrf.mxu0  ;;  %v985_v63 = vadd.f32 %v984_v43, %v983_v41 }
  0xf0   :  { %v986_v45 = vpop.f32.mrf.mxu1 }
  0xf1   :  { %v959_v46 = vpop.f32.mrf.mxu0  ;;  %v712_v10 = vadd.f32 %v985_v63, %v957_v62 }
  0xf2   :  { %v987_v47 = vpop.f32.mrf.mxu1  ;;  %v960_v11 = vadd.f32 %v959_v46, %v958_v44 }
  0xf3   :  { %v988_v14 = vadd.f32 %v987_v47, %v986_v45 }
  0xf5   :  { %v715_v24 = vadd.f32 %v988_v14, %v960_v11 }
 0x103   :  { %v1005_v50 = vpop.f32.mrf.mxu0 }
 0x104   :  { %v1033_v51 = vpop.f32.mrf.mxu1 }
 0x105   :  { %v1006_v52 = vpop.f32.mrf.mxu0 }
 0x106   :  { %v1034_v53 = vpop.f32.mrf.mxu1  ;;  %v1007_v57 = vadd.f32 %v1006_v52, %v1005_v50 }
 0x107   :  { %v1008_v58 = vpop.f32.mrf.mxu0  ;;  %v1035_v61 = vadd.f32 %v1034_v53, %v1033_v51 }
 0x108   :  { %v1036_v59 = vpop.f32.mrf.mxu1  ;;  %v753_v60 = vadd.f32 %v1007_v57, %v704_v54 }
 0x109   :  { %v1009_v0 = vpop.f32.mrf.mxu0 }
 0x10a   :  { %v1037_v1 = vpop.f32.mrf.mxu1  ;;  %v802_v3 = vadd.f32 %v1035_v61, %v753_v60  ;;  %v1010_v4 = vadd.f32 %v1009_v0, %v1008_v58 }
 0x10b   :  { %v1011_v5 = vpop.f32.mrf.mxu0  ;;  %v1038_v9 = vadd.f32 %v1037_v1, %v1036_v59 }
 0x10c   :  { %v1039_v6 = vpop.f32.mrf.mxu1  ;;  %v929_v7 = vmul.f32 -1.442695, %v802_v3  ;;  %v756_v8 = vadd.f32 %v1010_v4, %v707_v2 }
 0x10d   :  { %v1012_v12 = vpop.f32.mrf.mxu0 }
 0x10e   :  { %v1040_v13 = vpop.f32.mrf.mxu1  ;;  %1109 = vpow2.f32 %v929_v7  ;;  %v805_v15 = vadd.f32 %v1038_v9, %v756_v8  ;;  %v1013_v16 = vadd.f32 %v1012_v12, %v1011_v5 }
 0x10f   :  { %v1014_v17 = vpop.f32.mrf.mxu0  ;;  %v1041_v21 = vadd.f32 %v1040_v13, %v1039_v6 }
 0x110   :  { %v1042_v18 = vpop.f32.mrf.mxu1  ;;  %v930_v19 = vmul.f32 -1.442695, %v805_v15  ;;  %v761_v20 = vadd.f32 %v1013_v16, %v712_v10 }
 0x111   :  { %v1015_v22 = vpop.f32.mrf.mxu0 }
 0x112   :  { %v1043_v23 = vpop.f32.mrf.mxu1  ;;  %1111 = vpow2.f32 %v930_v19  ;;  %v810_v25 = vadd.f32 %v1041_v21, %v761_v20  ;;  %v1016_v26 = vadd.f32 %v1015_v22, %v1014_v17 }
 0x113   :  { %v1044_v29 = vadd.f32 %v1043_v23, %v1042_v18 }
 0x114   :  { %v931_v27 = vmul.f32 -1.442695, %v810_v25  ;;  %v764_v28 = vadd.f32 %v1016_v26, %v715_v24 }
 0x116   :  { %1113 = vpow2.f32 %v931_v27  ;;  %v813_v30 = vadd.f32 %v1044_v29, %v764_v28 }
 0x118   :  { %v932_v31 = vmul.f32 -1.442695, %v813_v30 }
 0x11a   :  { %1115 = vpow2.f32 %v932_v31 }
 0x11b   :  { %v1110_v32 = vpop.eup %1109 }
 0x11c   :  { %v828_v33 = vadd.f32 1.0, %v1110_v32 }
 0x11e   :  { %1117 = vrcp.f32 %v828_v33 }
 0x11f   :  { %v1112_v34 = vpop.eup %1111 }
 0x120   :  { %v829_v35 = vadd.f32 1.0, %v1112_v34 }
 0x122   :  { %1119 = vrcp.f32 %v829_v35 }
 0x123   :  { %v1114_v36 = vpop.eup %1113 }
 0x124   :  { %v830_v37 = vadd.f32 1.0, %v1114_v36 }
 0x126   :  { %1121 = vrcp.f32 %v830_v37 }
 0x127   :  { %v1116_v38 = vpop.eup %1115 }
 0x128   :  { %v831_v39 = vadd.f32 1.0, %v1116_v38 }
 0x12a   :  { %1123 = vrcp.f32 %v831_v39 }
 0x12b   :  { %v1118_v40 = vpop.eup %1117 }
 0x12c   :  { %841 = vst.msk [vmem:[%s1394_s2] sm:$0xff] %vm840_vm0, %v1118_v40 }
 0x12f   :  { %v1120_v41 = vpop.eup %1119 }
 0x130   :  { %842 = vst.msk [vmem:[%s1394_s2 + $0x8] sm:$0xff] %vm840_vm0, %v1120_v41 }
 0x133   :  { %v1122_v42 = vpop.eup %1121 }
 0x134   :  { %843 = vst.msk [vmem:[%s1394_s2 + $0x10] sm:$0xff] %vm840_vm0, %v1122_v42 }
 0x137   :  { %v1124_v43 = vpop.eup %1123 }
 0x138   :  { %844 = vst.msk [vmem:[%s1394_s2 + $0x18] sm:$0xff] %vm840_vm0, %v1124_v43 }

</bundles_post_ra>
